<compile_context>
chip_gen: v5e
topology: v5e:2x2
jax: 0.10.0
libtpu: 0.0.40
codegen_flags: <defaults>
</compile_context>

<pallas_src>
import functools

import jax
import jax.numpy as jnp
from jax.experimental import pallas as pl
from jax.experimental.pallas import tpu as pltpu

_WOFF = 8  # left halo offset along W (multiple of 8 => sublane-aligned center store)


# ----------------------------------------------------------------------------
# Fused SPPF kernel: cv1 -> separable max pools -> concat-fused cv2
# ----------------------------------------------------------------------------
def _sppf_kernel(x_ref, w1_ref, b1_ref, w2_ref, b2_ref, o_ref, xp_ref,
                 *, H, W, pad, ks):
    C = x_ref.shape[-1]
    Cm = w1_ref.shape[-1]
    Cout = w2_ref.shape[-1]

    # ---- cv1: 1x1 Conv (BN folded) + SiLU — one MXU matmul, f32 accumulate ----
    a = x_ref[0].reshape(H * W, C)
    h = jnp.dot(a, w1_ref[...], preferred_element_type=jnp.float32) + b1_ref[...]
    h = h * jax.nn.sigmoid(h)                       # SiLU; stays on-chip

    # ---- -inf halo buffer built directly in VMEM scratch (no HBM pad copy) ----
    xp_ref[...] = jnp.full(xp_ref.shape, -jnp.inf, dtype=xp_ref.dtype)
    xp_ref[pad:pad + H, _WOFF:_WOFF + W, :] = h.reshape(H, W, Cm)
    xp = xp_ref[...]

    # ---- cv2 with the channel concat fused away: accumulate K-group matmuls ----
    acc = jnp.dot(h, w2_ref[0], preferred_element_type=jnp.float32)

    # Pooling branches.  Column-max (sublane-shifting slices along W) is done
    # once, incrementally over radius; the per-k row-max uses leading-dim
    # slices (address-only).  MaxPool2d(k, stride=1, pad=k//2) pads with -inf,
    # which the halo buffer provides.
    order = sorted(range(len(ks)), key=lambda i: ks[i] // 2)
    cm = xp[:, _WOFF:_WOFF + W]                     # (Hp, W, Cm), radius-0 column max
    r_done = 0
    for g in order:
        r = ks[g] // 2
        for rr in range(r_done + 1, r + 1):         # grow column window to radius r
            cm = jnp.maximum(
                cm,
                jnp.maximum(xp[:, _WOFF - rr:_WOFF - rr + W],
                            xp[:, _WOFF + rr:_WOFF + rr + W]))
        r_done = max(r_done, r)
        pooled = cm[pad - r:pad - r + H]            # row-max over 2r+1 rows (cheap)
        for d in range(1, 2 * r + 1):
            pooled = jnp.maximum(pooled, cm[pad - r + d:pad - r + d + H])
        acc = acc + jnp.dot(pooled.reshape(H * W, Cm), w2_ref[g + 1],
                            preferred_element_type=jnp.float32)

    acc = acc + b2_ref[...]
    acc = acc * jax.nn.sigmoid(acc)                 # SiLU
    o_ref[0] = acc.reshape(H, W, Cout).astype(o_ref.dtype)


# ----------------------------------------------------------------------------
# Wrapper
# ----------------------------------------------------------------------------
def sppf_forward(x_nchw, params, ks=(3, 5, 7)):
    """SPPF forward. PyTorch NCHW interface; fused Pallas TPU kernel inside."""
    assert all(k % 2 == 1 for k in ks), "SPPF kernel expects odd pooling sizes"
    x = jnp.transpose(x_nchw, (0, 2, 3, 1))         # NCHW -> NHWC
    N, H, W, C = x.shape
    Cm = params["w1"].shape[-1]
    Cout = params["w2"].shape[-1]
    pad = max(k // 2 for k in ks)
    Hp, Wp = H + 2 * pad, W + 2 * _WOFF

    kernel = functools.partial(_sppf_kernel, H=H, W=W, pad=pad, ks=tuple(ks))
    out = pl.pallas_call(
        kernel,
        out_shape=jax.ShapeDtypeStruct((N, H, W, Cout), x.dtype),
        grid=(N,),
        in_specs=[
            pl.BlockSpec((1, H, W, C), lambda n: (n, 0, 0, 0)),           # x (one image)
            pl.BlockSpec((C, Cm), lambda n: (0, 0)),                      # cv1 weight (resident)
            pl.BlockSpec((1, Cm), lambda n: (0, 0)),                      # cv1 bias
            pl.BlockSpec((len(ks) + 1, Cm, Cout), lambda n: (0, 0, 0)),   # cv2 weight (K-groups)
            pl.BlockSpec((1, Cout), lambda n: (0, 0)),                    # cv2 bias
        ],
        out_specs=pl.BlockSpec((1, H, W, Cout), lambda n: (n, 0, 0, 0)),
        scratch_shapes=[pltpu.VMEM((Hp, Wp, Cm), jnp.float32)],           # -inf halo buffer
        compiler_params=pltpu.CompilerParams(
            dimension_semantics=("parallel",),   # shard batch across TCs (v7x megacore)
            vmem_limit_bytes=32 * 1024 * 1024,
        ),
    )(x, params["w1"], params["b1"], params["w2"], params["b2"])
    # TODO(synk): for very large H*W (not reached by SPPF at stride 32) add an
    # H-band grid axis with halo input blocks instead of one image per grid step.
    return jnp.transpose(out, (0, 3, 1, 2))         # NHWC -> NCHW


# ----------------------------------------------------------------------------
# Deterministic parameter init (Conv 1x1 bias=False + BatchNorm folded to w, b)
# ----------------------------------------------------------------------------
def _init_conv_bn_1x1(key, cin, cout):
    kw, kg, kb, km, kv = jax.random.split(key, 5)
    w = jax.random.normal(kw, (cin, cout), jnp.float32) / (cin ** 0.5)
    gamma = jax.random.uniform(kg, (cout,), minval=0.5, maxval=1.5)
    beta = jax.random.normal(kb, (cout,), jnp.float32) * 0.1
    mean = jax.random.normal(km, (cout,), jnp.float32) * 0.1
    var = jax.random.uniform(kv, (cout,), minval=0.5, maxval=1.5)
    scale = gamma / jnp.sqrt(var + 1e-3)            # BN eps = 0.001
    return w * scale, (beta - mean * scale).reshape(1, cout)


def init_sppf_params(key, in_channels, out_channels, ks=(3, 5, 7)):
    c_ = in_channels // 2
    k1, k2 = jax.random.split(key)
    w1, b1 = _init_conv_bn_1x1(k1, in_channels, c_)
    w2, b2 = _init_conv_bn_1x1(k2, c_ * (len(ks) + 1), out_channels)
    return {
        "w1": w1, "b1": b1,
        # cv2 weight pre-split into (len(ks)+1) K-groups so the kernel can fuse
        # away the concat; row order matches torch.cat([x, m3(x), m5(x), m7(x)]).
        "w2": w2.reshape(len(ks) + 1, c_, out_channels),
        "b2": b2,
    }


# ----------------------------------------------------------------------------
# Pure-JAX reference (same folded weights) for correctness checking
# ----------------------------------------------------------------------------
def sppf_reference(x_nchw, params, ks=(3, 5, 7)):
    x = jnp.transpose(x_nchw, (0, 2, 3, 1))
    h = jnp.einsum("nhwc,cd->nhwd", x, params["w1"]) + params["b1"][0]
    h = h * jax.nn.sigmoid(h)
    outs = [h]
    for k in ks:
        p = k // 2
        outs.append(jax.lax.reduce_window(
            h, -jnp.inf, jax.lax.max, (1, k, k, 1), (1, 1, 1, 1),
            [(0, 0), (p, p), (p, p), (0, 0)]))
    cat = jnp.concatenate(outs, axis=-1)
    w2 = params["w2"].reshape(-1, params["w2"].shape[-1])
    y = jnp.einsum("nhwc,cd->nhwd", cat, w2) + params["b2"][0]
    y = y * jax.nn.sigmoid(y)
    return jnp.transpose(y, (0, 3, 1, 2))


# ----------------------------------------------------------------------------
if __name__ == "__main__":
    key = jax.random.PRNGKey(0)
    kx, kp = jax.random.split(key)

    # Small shapes consistent with the module (NCHW input, in_channels even).
    N, C, H, W = 2, 64, 16, 16
    Cout = 64
    x = jax.random.normal(kx, (N, C, H, W), jnp.float32)
    params = init_sppf_params(kp, C, Cout)

    y = jax.block_until_ready(sppf_forward(x, params))
    assert y.shape == (N, Cout, H, W), y.shape
    assert bool(jnp.all(jnp.isfinite(y))), "non-finite output"

    y_ref = jax.block_until_ready(sppf_reference(x, params))
    assert bool(jnp.allclose(y, y_ref, atol=5e-2, rtol=5e-2)), (
        f"mismatch vs reference, max abs err = {float(jnp.max(jnp.abs(y - y_ref)))}")

    print("KERNEL_OK")
</pallas_src>

<mosaic_0001>
module attributes {stable_mosaic.version = 11 : i64} {
  func.func @_sppf_kernel(%arg0: i32, %arg1: memref<1x16x16x64xf32, #tpu.memory_space<vmem>>, %arg2: memref<64x32xf32, #tpu.memory_space<vmem>>, %arg3: memref<1x32xf32, #tpu.memory_space<vmem>>, %arg4: memref<4x32x64xf32, #tpu.memory_space<vmem>>, %arg5: memref<1x64xf32, #tpu.memory_space<vmem>>, %arg6: memref<1x16x16x64xf32, #tpu.memory_space<vmem>>, %arg7: memref<22x32x32xf32, #tpu.memory_space<vmem>>) attributes {dimension_semantics = [#tpu.dimension_semantics<parallel>], iteration_bounds = array<i64: 2>, scalar_prefetch = 0 : i64, scratch_operands = 1 : i64, tpu.core_type = #tpu.core_type<tc>, window_params = [{transform_indices = @transform_0, window_bounds = array<i64: 1, 16, 16, 64>}, {pipeline_mode = #tpu.pipeline_mode<synchronous>, transform_indices = @transform_1, window_bounds = array<i64: 64, 32>}, {pipeline_mode = #tpu.pipeline_mode<synchronous>, transform_indices = @transform_2, window_bounds = array<i64: 1, 32>}, {pipeline_mode = #tpu.pipeline_mode<synchronous>, transform_indices = @transform_3, window_bounds = array<i64: 4, 32, 64>}, {pipeline_mode = #tpu.pipeline_mode<synchronous>, transform_indices = @transform_4, window_bounds = array<i64: 1, 64>}, {transform_indices = @transform_5, window_bounds = array<i64: 1, 16, 16, 64>}]} {
    %c0 = arith.constant 0 : index
    %c0_0 = arith.constant 0 : index
    %c0_1 = arith.constant 0 : index
    %c0_2 = arith.constant 0 : index
    %0 = vector.load %arg1[%c0, %c0_0, %c0_1, %c0_2] : memref<1x16x16x64xf32, #tpu.memory_space<vmem>>, vector<1x16x16x64xf32>
    %1 = vector.shape_cast %0 : vector<1x16x16x64xf32> to vector<16x16x64xf32>
    %2 = vector.shape_cast %1 : vector<16x16x64xf32> to vector<256x64xf32>
    %c0_3 = arith.constant 0 : index
    %c0_4 = arith.constant 0 : index
    %3 = vector.load %arg2[%c0_3, %c0_4] : memref<64x32xf32, #tpu.memory_space<vmem>>, vector<64x32xf32>
    %cst = arith.constant dense<0.000000e+00> : vector<256x32xf32>
    %4 = tpu.matmul %2, %3, %cst {dimension_numbers = #tpu.dot_dimension_numbers<[1], [0], [0], [1], [0, 0, 1, 1], [], []>} : vector<256x64xf32>, vector<64x32xf32>, vector<256x32xf32> -> vector<256x32xf32>
    %c0_5 = arith.constant 0 : index
    %c0_6 = arith.constant 0 : index
    %5 = vector.load %arg3[%c0_5, %c0_6] : memref<1x32xf32, #tpu.memory_space<vmem>>, vector<1x32xf32>
    %6 = vector.broadcast %5 : vector<1x32xf32> to vector<256x32xf32>
    %7 = arith.addf %4, %6 : vector<256x32xf32>
    %8 = arith.negf %7 : vector<256x32xf32>
    %9 = math.exp %8 : vector<256x32xf32>
    %cst_7 = arith.constant 1.000000e+00 : f32
    %10 = vector.broadcast %cst_7 : f32 to vector<256x32xf32>
    %11 = arith.addf %10, %9 : vector<256x32xf32>
    %12 = arith.divf %10, %11 : vector<256x32xf32>
    %13 = arith.mulf %7, %12 : vector<256x32xf32>
    %cst_8 = arith.constant 0xFF800000 : f32
    %14 = vector.broadcast %cst_8 : f32 to vector<22x32x32xf32>
    %c0_9 = arith.constant 0 : index
    %c0_10 = arith.constant 0 : index
    %c0_11 = arith.constant 0 : index
    %15 = vector.load %arg7[%c0_9, %c0_10, %c0_11] : memref<22x32x32xf32, #tpu.memory_space<vmem>>, vector<22x32x32xf32>
    tpu.vector_store %arg7[%c0_9, %c0_10, %c0_11], %14 {strides = array<i32>} : memref<22x32x32xf32, #tpu.memory_space<vmem>>, vector<22x32x32xf32>,
    %16 = vector.shape_cast %13 : vector<256x32xf32> to vector<16x16x32xf32>
    %c3 = arith.constant 3 : index
    %c8 = arith.constant 8 : index
    %c0_12 = arith.constant 0 : index
    %17 = vector.load %arg7[%c3, %c8, %c0_12] : memref<22x32x32xf32, #tpu.memory_space<vmem>>, vector<16x16x32xf32>
    tpu.vector_store %arg7[%c3, %c8, %c0_12], %16 {strides = array<i32>} : memref<22x32x32xf32, #tpu.memory_space<vmem>>, vector<16x16x32xf32>,
    %c0_13 = arith.constant 0 : index
    %c0_14 = arith.constant 0 : index
    %c0_15 = arith.constant 0 : index
    %18 = vector.load %arg7[%c0_13, %c0_14, %c0_15] : memref<22x32x32xf32, #tpu.memory_space<vmem>>, vector<22x32x32xf32>
    %c0_16 = arith.constant 0 : index
    %c0_17 = arith.constant 0 : index
    %c0_18 = arith.constant 0 : index
    %19 = vector.load %arg4[%c0_16, %c0_17, %c0_18] : memref<4x32x64xf32, #tpu.memory_space<vmem>>, vector<1x32x64xf32>
    %20 = vector.shape_cast %19 : vector<1x32x64xf32> to vector<32x64xf32>
    %cst_19 = arith.constant dense<0.000000e+00> : vector<256x64xf32>
    %21 = tpu.matmul %13, %20, %cst_19 {dimension_numbers = #tpu.dot_dimension_numbers<[1], [0], [0], [1], [0, 0, 1, 1], [], []>} : vector<256x32xf32>, vector<32x64xf32>, vector<256x64xf32> -> vector<256x64xf32>
    %22 = vector.extract_strided_slice %18 {offsets = [0, 8, 0], sizes = [22, 16, 32], strides = [1, 1, 1]} : vector<22x32x32xf32> to vector<22x16x32xf32>
    %23 = vector.extract_strided_slice %18 {offsets = [0, 7, 0], sizes = [22, 16, 32], strides = [1, 1, 1]} : vector<22x32x32xf32> to vector<22x16x32xf32>
    %24 = vector.extract_strided_slice %18 {offsets = [0, 9, 0], sizes = [22, 16, 32], strides = [1, 1, 1]} : vector<22x32x32xf32> to vector<22x16x32xf32>
    %25 = arith.maximumf %23, %24 : vector<22x16x32xf32>
    %26 = arith.maximumf %22, %25 : vector<22x16x32xf32>
    %27 = vector.extract_strided_slice %26 {offsets = [2, 0, 0], sizes = [16, 16, 32], strides = [1, 1, 1]} : vector<22x16x32xf32> to vector<16x16x32xf32>
    %28 = vector.extract_strided_slice %26 {offsets = [3, 0, 0], sizes = [16, 16, 32], strides = [1, 1, 1]} : vector<22x16x32xf32> to vector<16x16x32xf32>
    %29 = arith.maximumf %27, %28 : vector<16x16x32xf32>
    %30 = vector.extract_strided_slice %26 {offsets = [4, 0, 0], sizes = [16, 16, 32], strides = [1, 1, 1]} : vector<22x16x32xf32> to vector<16x16x32xf32>
    %31 = arith.maximumf %29, %30 : vector<16x16x32xf32>
    %32 = vector.shape_cast %31 : vector<16x16x32xf32> to vector<256x32xf32>
    %c1 = arith.constant 1 : index
    %c0_20 = arith.constant 0 : index
    %c0_21 = arith.constant 0 : index
    %33 = vector.load %arg4[%c1, %c0_20, %c0_21] : memref<4x32x64xf32, #tpu.memory_space<vmem>>, vector<1x32x64xf32>
    %34 = vector.shape_cast %33 : vector<1x32x64xf32> to vector<32x64xf32>
    %cst_22 = arith.constant dense<0.000000e+00> : vector<256x64xf32>
    %35 = tpu.matmul %32, %34, %cst_22 {dimension_numbers = #tpu.dot_dimension_numbers<[1], [0], [0], [1], [0, 0, 1, 1], [], []>} : vector<256x32xf32>, vector<32x64xf32>, vector<256x64xf32> -> vector<256x64xf32>
    %36 = arith.addf %21, %35 : vector<256x64xf32>
    %37 = vector.extract_strided_slice %18 {offsets = [0, 6, 0], sizes = [22, 16, 32], strides = [1, 1, 1]} : vector<22x32x32xf32> to vector<22x16x32xf32>
    %38 = vector.extract_strided_slice %18 {offsets = [0, 10, 0], sizes = [22, 16, 32], strides = [1, 1, 1]} : vector<22x32x32xf32> to vector<22x16x32xf32>
    %39 = arith.maximumf %37, %38 : vector<22x16x32xf32>
    %40 = arith.maximumf %26, %39 : vector<22x16x32xf32>
    %41 = vector.extract_strided_slice %40 {offsets = [1, 0, 0], sizes = [16, 16, 32], strides = [1, 1, 1]} : vector<22x16x32xf32> to vector<16x16x32xf32>
    %42 = vector.extract_strided_slice %40 {offsets = [2, 0, 0], sizes = [16, 16, 32], strides = [1, 1, 1]} : vector<22x16x32xf32> to vector<16x16x32xf32>
    %43 = arith.maximumf %41, %42 : vector<16x16x32xf32>
    %44 = vector.extract_strided_slice %40 {offsets = [3, 0, 0], sizes = [16, 16, 32], strides = [1, 1, 1]} : vector<22x16x32xf32> to vector<16x16x32xf32>
    %45 = arith.maximumf %43, %44 : vector<16x16x32xf32>
    %46 = vector.extract_strided_slice %40 {offsets = [4, 0, 0], sizes = [16, 16, 32], strides = [1, 1, 1]} : vector<22x16x32xf32> to vector<16x16x32xf32>
    %47 = arith.maximumf %45, %46 : vector<16x16x32xf32>
    %48 = vector.extract_strided_slice %40 {offsets = [5, 0, 0], sizes = [16, 16, 32], strides = [1, 1, 1]} : vector<22x16x32xf32> to vector<16x16x32xf32>
    %49 = arith.maximumf %47, %48 : vector<16x16x32xf32>
    %50 = vector.shape_cast %49 : vector<16x16x32xf32> to vector<256x32xf32>
    %c2 = arith.constant 2 : index
    %c0_23 = arith.constant 0 : index
    %c0_24 = arith.constant 0 : index
    %51 = vector.load %arg4[%c2, %c0_23, %c0_24] : memref<4x32x64xf32, #tpu.memory_space<vmem>>, vector<1x32x64xf32>
    %52 = vector.shape_cast %51 : vector<1x32x64xf32> to vector<32x64xf32>
    %cst_25 = arith.constant dense<0.000000e+00> : vector<256x64xf32>
    %53 = tpu.matmul %50, %52, %cst_25 {dimension_numbers = #tpu.dot_dimension_numbers<[1], [0], [0], [1], [0, 0, 1, 1], [], []>} : vector<256x32xf32>, vector<32x64xf32>, vector<256x64xf32> -> vector<256x64xf32>
    %54 = arith.addf %36, %53 : vector<256x64xf32>
    %55 = vector.extract_strided_slice %18 {offsets = [0, 5, 0], sizes = [22, 16, 32], strides = [1, 1, 1]} : vector<22x32x32xf32> to vector<22x16x32xf32>
    %56 = vector.extract_strided_slice %18 {offsets = [0, 11, 0], sizes = [22, 16, 32], strides = [1, 1, 1]} : vector<22x32x32xf32> to vector<22x16x32xf32>
    %57 = arith.maximumf %55, %56 : vector<22x16x32xf32>
    %58 = arith.maximumf %40, %57 : vector<22x16x32xf32>
    %59 = vector.extract_strided_slice %58 {offsets = [0, 0, 0], sizes = [16, 16, 32], strides = [1, 1, 1]} : vector<22x16x32xf32> to vector<16x16x32xf32>
    %60 = vector.extract_strided_slice %58 {offsets = [1, 0, 0], sizes = [16, 16, 32], strides = [1, 1, 1]} : vector<22x16x32xf32> to vector<16x16x32xf32>
    %61 = arith.maximumf %59, %60 : vector<16x16x32xf32>
    %62 = vector.extract_strided_slice %58 {offsets = [2, 0, 0], sizes = [16, 16, 32], strides = [1, 1, 1]} : vector<22x16x32xf32> to vector<16x16x32xf32>
    %63 = arith.maximumf %61, %62 : vector<16x16x32xf32>
    %64 = vector.extract_strided_slice %58 {offsets = [3, 0, 0], sizes = [16, 16, 32], strides = [1, 1, 1]} : vector<22x16x32xf32> to vector<16x16x32xf32>
    %65 = arith.maximumf %63, %64 : vector<16x16x32xf32>
    %66 = vector.extract_strided_slice %58 {offsets = [4, 0, 0], sizes = [16, 16, 32], strides = [1, 1, 1]} : vector<22x16x32xf32> to vector<16x16x32xf32>
    %67 = arith.maximumf %65, %66 : vector<16x16x32xf32>
    %68 = vector.extract_strided_slice %58 {offsets = [5, 0, 0], sizes = [16, 16, 32], strides = [1, 1, 1]} : vector<22x16x32xf32> to vector<16x16x32xf32>
    %69 = arith.maximumf %67, %68 : vector<16x16x32xf32>
    %70 = vector.extract_strided_slice %58 {offsets = [6, 0, 0], sizes = [16, 16, 32], strides = [1, 1, 1]} : vector<22x16x32xf32> to vector<16x16x32xf32>
    %71 = arith.maximumf %69, %70 : vector<16x16x32xf32>
    %72 = vector.shape_cast %71 : vector<16x16x32xf32> to vector<256x32xf32>
    %c3_26 = arith.constant 3 : index
    %c0_27 = arith.constant 0 : index
    %c0_28 = arith.constant 0 : index
    %73 = vector.load %arg4[%c3_26, %c0_27, %c0_28] : memref<4x32x64xf32, #tpu.memory_space<vmem>>, vector<1x32x64xf32>
    %74 = vector.shape_cast %73 : vector<1x32x64xf32> to vector<32x64xf32>
    %cst_29 = arith.constant dense<0.000000e+00> : vector<256x64xf32>
    %75 = tpu.matmul %72, %74, %cst_29 {dimension_numbers = #tpu.dot_dimension_numbers<[1], [0], [0], [1], [0, 0, 1, 1], [], []>} : vector<256x32xf32>, vector<32x64xf32>, vector<256x64xf32> -> vector<256x64xf32>
    %76 = arith.addf %54, %75 : vector<256x64xf32>
    %c0_30 = arith.constant 0 : index
    %c0_31 = arith.constant 0 : index
    %77 = vector.load %arg5[%c0_30, %c0_31] : memref<1x64xf32, #tpu.memory_space<vmem>>, vector<1x64xf32>
    %78 = vector.broadcast %77 : vector<1x64xf32> to vector<256x64xf32>
    %79 = arith.addf %76, %78 : vector<256x64xf32>
    %80 = arith.negf %79 : vector<256x64xf32>
    %81 = math.exp %80 : vector<256x64xf32>
    %cst_32 = arith.constant 1.000000e+00 : f32
    %82 = vector.broadcast %cst_32 : f32 to vector<256x64xf32>
    %83 = arith.addf %82, %81 : vector<256x64xf32>
    %84 = arith.divf %82, %83 : vector<256x64xf32>
    %85 = arith.mulf %79, %84 : vector<256x64xf32>
    %86 = vector.shape_cast %85 : vector<256x64xf32> to vector<16x16x64xf32>
    %c0_33 = arith.constant 0 : index
    %c0_34 = arith.constant 0 : index
    %c0_35 = arith.constant 0 : index
    %c0_36 = arith.constant 0 : index
    %87 = vector.load %arg6[%c0_33, %c0_34, %c0_35, %c0_36] : memref<1x16x16x64xf32, #tpu.memory_space<vmem>>, vector<1x16x16x64xf32>
    %88 = vector.shape_cast %87 : vector<1x16x16x64xf32> to vector<16x16x64xf32>
    %89 = vector.shape_cast %86 : vector<16x16x64xf32> to vector<1x16x16x64xf32>
    tpu.vector_store %arg6[%c0_33, %c0_34, %c0_35, %c0_36], %89 {strides = array<i32>} : memref<1x16x16x64xf32, #tpu.memory_space<vmem>>, vector<1x16x16x64xf32>,
    return
  }
  func.func @transform_0(%arg0: i32) -> (i32, i32, i32, i32) {
    %c0_i32 = arith.constant 0 : i32
    %c0_i32_0 = arith.constant 0 : i32
    %c0_i32_1 = arith.constant 0 : i32
    %c0_i32_2 = arith.constant 0 : i32
    return %arg0, %c0_i32, %c0_i32_0, %c0_i32_1 : i32, i32, i32, i32
  }
  func.func @transform_1(%arg0: i32) -> (i32, i32) {
    %c0_i32 = arith.constant 0 : i32
    %c0_i32_0 = arith.constant 0 : i32
    %c0_i32_1 = arith.constant 0 : i32
    return %c0_i32, %c0_i32_0 : i32, i32
  }
  func.func @transform_2(%arg0: i32) -> (i32, i32) {
    %c0_i32 = arith.constant 0 : i32
    %c0_i32_0 = arith.constant 0 : i32
    %c0_i32_1 = arith.constant 0 : i32
    return %c0_i32, %c0_i32_0 : i32, i32
  }
  func.func @transform_3(%arg0: i32) -> (i32, i32, i32) {
    %c0_i32 = arith.constant 0 : i32
    %c0_i32_0 = arith.constant 0 : i32
    %c0_i32_1 = arith.constant 0 : i32
    %c0_i32_2 = arith.constant 0 : i32
    return %c0_i32, %c0_i32_0, %c0_i32_1 : i32, i32, i32
  }
  func.func @transform_4(%arg0: i32) -> (i32, i32) {
    %c0_i32 = arith.constant 0 : i32
    %c0_i32_0 = arith.constant 0 : i32
    %c0_i32_1 = arith.constant 0 : i32
    return %c0_i32, %c0_i32_0 : i32, i32
  }
  func.func @transform_5(%arg0: i32) -> (i32, i32, i32, i32) {
    %c0_i32 = arith.constant 0 : i32
    %c0_i32_0 = arith.constant 0 : i32
    %c0_i32_1 = arith.constant 0 : i32
    %c0_i32_2 = arith.constant 0 : i32
    return %arg0, %c0_i32, %c0_i32_0, %c0_i32_1 : i32, i32, i32, i32
  }
}

</mosaic_0001>

<bundles_post_ra>
// kernel: tpu_custom_call.1
= control target key start
LH: loop header
LB: loop body
LE: loop exit
PB: predicated region body
PF: predicated region fallthrough
CT: control target
= control target key end

     0   :  { %10 = vsyncpa [#allocation4], 0  ;;  %s9789_s0 = inlined_call_operand.hbm [shape: f32[2,16,16,64], index: 0, kind: input, shape index: {}]   ;;  %s9790_s1 = inlined_call_operand.vmem [shape: f32[64,32], index: 1, kind: input, shape index: {}]   ;;  %s9791_s2 = inlined_call_operand.vmem [shape: f32[1,32], index: 2, kind: input, shape index: {}]   ;;  %s9792_s3 = inlined_call_operand.hbm [shape: f32[4,32,64], index: 3, kind: input, shape index: {}]   ;;  %s9793_s4 = inlined_call_operand.vmem [shape: f32[1,64], index: 4, kind: input, shape index: {}]   ;;  %s9794_s5 = inlined_call_operand.hbm [shape: f32[2,16,16,64], index: 5, kind: output, shape index: {}]  }
   0x1   :  { %12 = vsyncpa [#allocation4 + $0x1], 0 }
   0x2   :  { %13 = vsyncpa [#allocation7], 0 }
   0x3   :  { %14 = vsyncpa [#allocation5], 0 }
   0x4   :  { %16 = vsyncpa [#allocation5 + $0x1], 0  ;;  %s5822_s18 = smov 0   ;;  %s5824_s19 = smov 0  }
   0x5   :  { %s5826_s20 = smov 0   ;;  %s5828_s21 = smov 0  }
   0x6 LB: > { %s5843_s22 = sadd.s32 4294967295, %s5784_s21   ;;  %s5065_s23 = sadd.s32 4294967294, %s5784_s21   ;;  %s5784_s21 = sphi %s5828_s21, %s10297_s21   ;;  %s5780_s20 = sphi %s5826_s20, %s10296_s20   ;;  %s5776_s19 = sphi %s5824_s19, %s10295_s19   ;;  %s5772_s18 = sphi %s5822_s18, %s10294_s18  }
   0x7   : > { %p42_p0 = scmp.ne.s32.totalorder %s5776_s19, %s5772_s18  ;;  %p43_p1 = scmp.eq.s32.totalorder %s5843_s22, 0 }
   0x8   : > { %p150_p2 = scmp.eq.s32.totalorder %s5843_s22, 1  ;;  %p156_p3 = scmp.eq.s32.totalorder %s5065_s23, 1 }
   0x9   : > { %p5852_p4 = por %p43_p1, %p42_p0  ;;  %p5066_p5 = scmp.ge.s32.totalorder %s5784_s21, 1 }
   0xa   : > { %p5857_p6 = por %p156_p3, %p42_p0  ;;  %p163_p7 = scmp.lt.s32.totalorder %s5784_s21, 3 }
   0xb   : > { %s180_s28 = sshll.u32 %s9792_s3, 4  ;;  %s5786_s30 = smov [#allocation6]   ;;  %s181_s28 = int_to_ptr.hbm [resolvable:$true] %s180_s28 }
   0xc   : > { %p5865_p8 = pnand %p5066_p5, %p163_p7  ;;  %s182_s6 = sshll.u32 %s5786_s30, 4  ;;  %s183_s6 = int_to_ptr.vmem [resolvable:$true] %s182_s6 }
   0xd   : > { %s5875_s7 = sadd.s32 1, %s5784_s21   ;;  %s9795_s8 = smov 128  }
   0xe   : > { %p5327_p9 = pneg %p5865_p8  ;;  %s5788_s9 = smov 8  }
   0xf   : > { %s26_s10 = ssub.s32 %s5784_s21, %s5875_s7  ;;  %s29_s11 = sadd.s32 1, %s5780_s20 }
  0x10   : > { %p5328_p10 = pnand %p5327_p9, %p43_p1  ;;  %p27_p12 = scmp.eq.s32.totalorder %s26_s10, 0 }
  0x11   : > { %p36_p13 = scmp.ne.s32.totalorder %s5780_s20, %s5776_s19  ;;  %p37_p0 = scmp.eq.s32.totalorder %s5784_s21, 0 }
  0x12   : > { %5330 = dma.hbm_to_vmem [thread:$0]  (!%p5328_p10), %s181_s28, 2048, %s183_s6, [#allocation7], %s9795_s8, %s9795_s8, %s5788_s9  }
  0x13   : > { %s5887_s12 = scalar_select %p27_p12, %s5780_s20, %s29_s11  }
  0x14   : > { %p5891_p3 = por %p150_p2, %p36_p13  ;;  %p5340_p5 = scmp.lt.s32.totalorder %s5784_s21, 2 }
  0x15   : > { %s199_s14 = sand.u32 1, %s5780_s20   ;;  %s5305_s15 = sshll.u32 %s5784_s21, 8 }
  0x16   : > { %p38_p7 = por %p37_p0, %p36_p13  ;;  %s5069_s16 = sshll.u32 %s199_s14, 8 }
  0x17   : > { %s208_s26 = scalar_lea.hbm %s9789_s0, %s5305_s15  ;;  %s203_s28 = scalar_lea.vmem [#allocation3], %s5069_s16 }
  0x18   : > { %s209_s27 = sshll.u32 %s208_s26, 4  ;;  %s211_s30 = sshll.u32 %s203_s28, 4  ;;  %s210_s27 = int_to_ptr.hbm [resolvable:$true] %s209_s27  ;;  %s212_s30 = int_to_ptr.vmem [resolvable:$true] %s211_s30 }
  0x19   : > { %p5901_p9 = pnand %p5340_p5, %p38_p7  ;;  %s200_s10 = scalar_lea.sflag [#allocation4], %s199_s14 }
  0x1a   : > { %s5684_s11 = sshra.s32 %s210_s27, 4  ;;  %s5691_s16 = scalar_lea.hbm %s9789_s0, 512  ;;  %s5685_s11 = int_to_ptr.hbm [resolvable:$true] %s5684_s11 }
  0x1b   : > { %s5686_s8 = scalar_lea.hbm %s5685_s11, 256  ;;  %p5688_p10 = pneg %p5901_p9 }
  0x1c   : > { %p5687_p2 = scmp.ne.s32.totalorder %s5685_s11, %s5686_s8  ;;  %p5692_p0 = scmp.lt.s32.totalorder %s5685_s11, %s9789_s0 }
  0x1d   : > { %p5693_p5 = scmp.lt.s32.totalorder %s5691_s16, %s5686_s8 }
  0x1e   : > { %p5689_p12 = pnand %p5688_p10, %p5687_p2 }
  0x1f   : > { %p5694_p7 = por %p5693_p5, %p5692_p0 }
  0x20   : > { %p5690_p13 = pneg %p5689_p12 }
  0x22   : > { %p5695_p11 = pnand %p5694_p7, %p5690_p13 }
  0x24   : > { %5698 = shalt.err (!%p5695_p11)
}
  0x25   : > { %s9935_s14 = smov 128   ;;  %223 = sbr.rel (%p5865_p8) target bundleno = 1079 (0x437), region = 40 }
  0x26   : > { %5334 = dma.hbm_to_vmem [thread:$0]  (!%p5901_p9), %s210_s27, 4096, %s212_s30, %s200_s10, %s9935_s14, %s9935_s14, %s5788_s9  }
  0x2a   : > { %s5921_s28 = sand.u32 1, %s5776_s19  }
  0x2b   : > { %s5073_s8 = sshll.u32 %s5921_s28, 8  ;;  %s226_s11 = scalar_lea.sflag [#allocation4], %s5921_s28 }
  0x2c   : > { %s5927_s15 = scalar_lea.vmem [#allocation3], %s5073_s8 }
  0x2d   : > { %5759 = dma.done.wait (%p5852_p4), %s226_s11, 4096  }
  0x2e   : > { %5761 = vsyncadd (%p5852_p4), %s226_s11, 4294963200 }
  0x2f   : > { %5763 = dma.done.wait (%p43_p1), [#allocation7], 2048  }
  0x30   : > { %5765 = vsyncadd (%p43_p1), [#allocation7], 4294965248  ;;  %v301_v0 = vld [vmem:[%s9790_s1 + $0x38] sm:$0xff]  ;;  %v300_v1 = vld [vmem:[%s9790_s1 + $0x30] sm:$0xff]  ;;  %vm306_vm0 = vcmask 523264   ;;  %vm1156_vm1 = vcmask 261120  }
  0x31   : > { %411 = vmatpush.msra.mxu0 %v301_v0  ;;  %v299_v2 = vld [vmem:[%s9790_s1 + $0x28] sm:$0xff]  ;;  %v298_v3 = vld [vmem:[%s9790_s1 + $0x20] sm:$0xff]  ;;  %v297_v4 = vld [vmem:[%s9790_s1 + $0x18] sm:$0xff]  ;;  %v5789_v26 = vmov -inf   ;;  %s9270_s11 = scalar_lea.vmem [#allocation8], %s5073_s8  ;;  %s5306_s9 = sshll.u32 %s5843_s22, 8 }
  0x32   : > { %v296_v5 = vld [vmem:[%s9790_s1 + $0x10] sm:$0xff]  ;;  %v295_v6 = vld [vmem:[%s9790_s1 + $0x8] sm:$0xff]  ;;  %v294_v7 = vld [vmem:[%s9790_s1] sm:$0xff]  ;;  %1170 = vst.msk [vmem:[#allocation2 + $0x68] sm:$0xff] %vm1156_vm1, %v5789_v26  ;;  %s4978_s6 = scalar_lea.hbm %s9794_s5, %s5306_s9  ;;  %s4979_s10 = sshll.u32 %s9270_s11, 4  ;;  %s4980_s10 = int_to_ptr.vmem [resolvable:$true] %s4979_s10 }
  0x33   : > { %412 = vmatpush.msra.mxu0 %v300_v1  ;;  %v262_v8 = vld [vmem:[%s5927_s15] sm:$0xff]  ;;  %v263_v9 = vld [vmem:[%s5927_s15 + $0x8] sm:$0xff]  ;;  %v264_v10 = vld [vmem:[%s5927_s15 + $0x10] sm:$0xff]  ;;  %1157 = vst.msk [vmem:[#allocation2] sm:$0xff] %vm1156_vm1, %v5789_v26  ;;  %s4981_s22 = sshll.u32 %s4978_s6, 4  ;;  %s4967_s24 = scalar_lea.sflag [#allocation5], %s5921_s28  ;;  %s4982_s22 = int_to_ptr.hbm [resolvable:$true] %s4981_s22 }
  0x34   : > { %v265_v11 = vld [vmem:[%s5927_s15 + $0x18] sm:$0xff]  ;;  %v266_v12 = vld [vmem:[%s5927_s15 + $0x20] sm:$0xff]  ;;  %v267_v13 = vld [vmem:[%s5927_s15 + $0x28] sm:$0xff]  ;;  %1158 = vst.msk [vmem:[#allocation2 + $0x8] sm:$0xff] %vm1156_vm1, %v5789_v26  ;;  %s5734_s26 = scalar_lea.hbm %s9794_s5, 512 }
  0x35   : > { %413 = vmatpush.msra.mxu0 %v299_v2  ;;  %v268_v14 = vld [vmem:[%s5927_s15 + $0x30] sm:$0xff]  ;;  %v269_v15 = vld [vmem:[%s5927_s15 + $0x38] sm:$0xff]  ;;  %v270_v16 = vld [vmem:[%s5927_s15 + $0x40] sm:$0xff]  ;;  %1159 = vst.msk [vmem:[#allocation2 + $0x10] sm:$0xff] %vm1156_vm1, %v5789_v26 }
  0x36   : > { %v271_v17 = vld [vmem:[%s5927_s15 + $0x48] sm:$0xff]  ;;  %v272_v18 = vld [vmem:[%s5927_s15 + $0x50] sm:$0xff]  ;;  %v273_v19 = vld [vmem:[%s5927_s15 + $0x58] sm:$0xff]  ;;  %1160 = vst.msk [vmem:[#allocation2 + $0x18] sm:$0xff] %vm1156_vm1, %v5789_v26 }
  0x37   : > { %414 = vmatpush.msra.mxu0 %v298_v3  ;;  %v274_v20 = vld [vmem:[%s5927_s15 + $0x60] sm:$0xff]  ;;  %v275_v21 = vld [vmem:[%s5927_s15 + $0x68] sm:$0xff]  ;;  %v276_v22 = vld [vmem:[%s5927_s15 + $0x70] sm:$0xff]  ;;  %1161 = vst.msk [vmem:[#allocation2 + $0x20] sm:$0xff] %vm1156_vm1, %v5789_v26 }
  0x38   : > { %v277_v23 = vld [vmem:[%s5927_s15 + $0x78] sm:$0xff]  ;;  %v5996_v24 = vld [vmem:[%s9791_s2] ss:$0 sm:$0xff]  ;;  %1162 = vst.msk [vmem:[#allocation2 + $0x28] sm:$0xff] %vm1156_vm1, %v5789_v26  ;;  %v279_v41 = vld [vmem:[%s5927_s15 + $0x88] sm:$0xff] }
  0x39   : > { %415 = vmatpush.msra.mxu0 %v297_v4  ;;  %v278_v27 = vld [vmem:[%s5927_s15 + $0x80] sm:$0xff]  ;;  %1163 = vst.msk [vmem:[#allocation2 + $0x30] sm:$0xff] %vm1156_vm1, %v5789_v26  ;;  %v280_v49 = vld [vmem:[%s5927_s15 + $0x90] sm:$0xff]  ;;  %v281_v55 = vld [vmem:[%s5927_s15 + $0x98] sm:$0xff] }
  0x3a   : > { %1164 = vst.msk [vmem:[#allocation2 + $0x38] sm:$0xff] %vm1156_vm1, %v5789_v26  ;;  %v282_v62 = vld [vmem:[%s5927_s15 + $0xa0] sm:$0xff] }
  0x3b   : > { %416 = vmatpush.msra.mxu0 %v296_v5  ;;  %1165 = vst.msk [vmem:[#allocation2 + $0x40] sm:$0xff] %vm1156_vm1, %v5789_v26 }
  0x3c   : > { %1166 = vst.msk [vmem:[#allocation2 + $0x48] sm:$0xff] %vm1156_vm1, %v5789_v26 }
  0x3d   : > { %417 = vmatpush.msra.mxu0 %v295_v6  ;;  %1167 = vst.msk [vmem:[#allocation2 + $0x50] sm:$0xff] %vm1156_vm1, %v5789_v26  ;;  %v283_v6 = vld [vmem:[%s5927_s15 + $0xa8] sm:$0xff] }
  0x3e   : > { %1168 = vst.msk [vmem:[#allocation2 + $0x58] sm:$0xff] %vm1156_vm1, %v5789_v26 }
  0x3f   : > { %418 = vmatpush.msra.mxu0 %v294_v7  ;;  %1169 = vst.msk [vmem:[#allocation2 + $0x60] sm:$0xff] %vm1156_vm1, %v5789_v26 }
  0x40   : > { %5076 = vmatmul.msk.f32.vlgmr.msra.gmra.mxu0 %vm306_vm0, %v262_v8  ;;  %1171 = vst.msk [vmem:[#allocation2 + $0x70] sm:$0xff] %vm1156_vm1, %v5789_v26 }
  0x41   : > { %1172 = vst.msk [vmem:[#allocation2 + $0x78] sm:$0xff] %vm1156_vm1, %v5789_v26 }
  0x42   : > { %1173 = vst.msk [vmem:[#allocation2 + $0x80] sm:$0xff] %vm1156_vm1, %v5789_v26 }
  0x43   : > { %1174 = vst.msk [vmem:[#allocation2 + $0x88] sm:$0xff] %vm1156_vm1, %v5789_v26 }
  0x44   : > { %1175 = vst.msk [vmem:[#allocation2 + $0x90] sm:$0xff] %vm1156_vm1, %v5789_v26 }
  0x45   : > { %1176 = vst.msk [vmem:[#allocation2 + $0x98] sm:$0xff] %vm1156_vm1, %v5789_v26 }
  0x46   : > { %1177 = vst.msk [vmem:[#allocation2 + $0xa0] sm:$0xff] %vm1156_vm1, %v5789_v26 }
  0x47   : > { %1178 = vst.msk [vmem:[#allocation2 + $0xa8] sm:$0xff] %vm1156_vm1, %v5789_v26 }
  0x48   : > { %5077 = vmatmul.msk.f32.gmra.mxu0 %vm306_vm0, %v263_v9  ;;  %1179 = vst.msk [vmem:[#allocation2 + $0xb0] sm:$0xff] %vm1156_vm1, %v5789_v26 }
  0x49   : > { %1180 = vst.msk [vmem:[#allocation2 + $0xb8] sm:$0xff] %vm1156_vm1, %v5789_v26 }
  0x4a   : > { %1181 = vst.msk [vmem:[#allocation2 + $0xc0] sm:$0xff] %vm1156_vm1, %v5789_v26 }
  0x4b   : > { %1182 = vst.msk [vmem:[#allocation2 + $0xc8] sm:$0xff] %vm1156_vm1, %v5789_v26 }
  0x4c   : > { %1183 = vst.msk [vmem:[#allocation2 + $0xd0] sm:$0xff] %vm1156_vm1, %v5789_v26 }
  0x4d   : > { %1184 = vst.msk [vmem:[#allocation2 + $0xd8] sm:$0xff] %vm1156_vm1, %v5789_v26 }
  0x4e   : > { %1185 = vst.msk [vmem:[#allocation2 + $0xe0] sm:$0xff] %vm1156_vm1, %v5789_v26 }
  0x4f   : > { %1186 = vst.msk [vmem:[#allocation2 + $0xe8] sm:$0xff] %vm1156_vm1, %v5789_v26 }
  0x50   : > { %5078 = vmatmul.msk.f32.gmra.mxu0 %vm306_vm0, %v264_v10  ;;  %1187 = vst.msk [vmem:[#allocation2 + $0xf0] sm:$0xff] %vm1156_vm1, %v5789_v26 }
  0x51   : > { %1188 = vst.msk [vmem:[#allocation2 + $0xf8] sm:$0xff] %vm1156_vm1, %v5789_v26 }
  0x52   : > { %1189 = vst.msk [vmem:[#allocation2 + $0x100] sm:$0xff] %vm1156_vm1, %v5789_v26 }
  0x53   : > { %1190 = vst.msk [vmem:[#allocation2 + $0x108] sm:$0xff] %vm1156_vm1, %v5789_v26 }
  0x54   : > { %1191 = vst.msk [vmem:[#allocation2 + $0x110] sm:$0xff] %vm1156_vm1, %v5789_v26 }
  0x55   : > { %1192 = vst.msk [vmem:[#allocation2 + $0x118] sm:$0xff] %vm1156_vm1, %v5789_v26 }
  0x56   : > { %1193 = vst.msk [vmem:[#allocation2 + $0x120] sm:$0xff] %vm1156_vm1, %v5789_v26 }
  0x57   : > { %1194 = vst.msk [vmem:[#allocation2 + $0x128] sm:$0xff] %vm1156_vm1, %v5789_v26 }
  0x58   : > { %5079 = vmatmul.msk.f32.gmra.mxu0 %vm306_vm0, %v265_v11  ;;  %1195 = vst.msk [vmem:[#allocation2 + $0x130] sm:$0xff] %vm1156_vm1, %v5789_v26 }
  0x59   : > { %1196 = vst.msk [vmem:[#allocation2 + $0x138] sm:$0xff] %vm1156_vm1, %v5789_v26 }
  0x5a   : > { %1197 = vst.msk [vmem:[#allocation2 + $0x140] sm:$0xff] %vm1156_vm1, %v5789_v26 }
  0x5b   : > { %1198 = vst.msk [vmem:[#allocation2 + $0x148] sm:$0xff] %vm1156_vm1, %v5789_v26 }
  0x5c   : > { %1199 = vst.msk [vmem:[#allocation2 + $0x150] sm:$0xff] %vm1156_vm1, %v5789_v26 }
  0x5d   : > { %1200 = vst.msk [vmem:[#allocation2 + $0x158] sm:$0xff] %vm1156_vm1, %v5789_v26 }
  0x5e   : > { %1201 = vst.msk [vmem:[#allocation2 + $0x160] sm:$0xff] %vm1156_vm1, %v5789_v26 }
  0x5f   : > { %1202 = vst.msk [vmem:[#allocation2 + $0x168] sm:$0xff] %vm1156_vm1, %v5789_v26 }
  0x60   : > { %5080 = vmatmul.msk.f32.gmra.mxu0 %vm306_vm0, %v266_v12  ;;  %1203 = vst.msk [vmem:[#allocation2 + $0x170] sm:$0xff] %vm1156_vm1, %v5789_v26 }
  0x61   : > { %1204 = vst.msk [vmem:[#allocation2 + $0x178] sm:$0xff] %vm1156_vm1, %v5789_v26 }
  0x62   : > { %1205 = vst.msk [vmem:[#allocation2 + $0x180] sm:$0xff] %vm1156_vm1, %v5789_v26 }
  0x63   : > { %1206 = vst.msk [vmem:[#allocation2 + $0x188] sm:$0xff] %vm1156_vm1, %v5789_v26 }
  0x64   : > { %1207 = vst.msk [vmem:[#allocation2 + $0x190] sm:$0xff] %vm1156_vm1, %v5789_v26 }
  0x65   : > { %1208 = vst.msk [vmem:[#allocation2 + $0x198] sm:$0xff] %vm1156_vm1, %v5789_v26 }
  0x66   : > { %1209 = vst.msk [vmem:[#allocation2 + $0x1a0] sm:$0xff] %vm1156_vm1, %v5789_v26 }
  0x67   : > { %1210 = vst.msk [vmem:[#allocation2 + $0x1a8] sm:$0xff] %vm1156_vm1, %v5789_v26 }
  0x68   : > { %5081 = vmatmul.msk.f32.gmra.mxu0 %vm306_vm0, %v267_v13  ;;  %1211 = vst.msk [vmem:[#allocation2 + $0x1b0] sm:$0xff] %vm1156_vm1, %v5789_v26 }
  0x69   : > { %1212 = vst.msk [vmem:[#allocation2 + $0x1b8] sm:$0xff] %vm1156_vm1, %v5789_v26 }
  0x6a   : > { %1213 = vst.msk [vmem:[#allocation2 + $0x1c0] sm:$0xff] %vm1156_vm1, %v5789_v26 }
  0x6b   : > { %1214 = vst.msk [vmem:[#allocation2 + $0x1c8] sm:$0xff] %vm1156_vm1, %v5789_v26 }
  0x6c   : > { %1215 = vst.msk [vmem:[#allocation2 + $0x1d0] sm:$0xff] %vm1156_vm1, %v5789_v26 }
  0x6d   : > { %1216 = vst.msk [vmem:[#allocation2 + $0x1d8] sm:$0xff] %vm1156_vm1, %v5789_v26 }
  0x6e   : > { %1217 = vst.msk [vmem:[#allocation2 + $0x1e0] sm:$0xff] %vm1156_vm1, %v5789_v26 }
  0x6f   : > { %1218 = vst.msk [vmem:[#allocation2 + $0x1e8] sm:$0xff] %vm1156_vm1, %v5789_v26 }
  0x70   : > { %5082 = vmatmul.msk.f32.gmra.mxu0 %vm306_vm0, %v268_v14  ;;  %1219 = vst.msk [vmem:[#allocation2 + $0x1f0] sm:$0xff] %vm1156_vm1, %v5789_v26 }
  0x71   : > { %1220 = vst.msk [vmem:[#allocation2 + $0x1f8] sm:$0xff] %vm1156_vm1, %v5789_v26 }
  0x72   : > { %1221 = vst.msk [vmem:[#allocation2 + $0x200] sm:$0xff] %vm1156_vm1, %v5789_v26 }
  0x73   : > { %1222 = vst.msk [vmem:[#allocation2 + $0x208] sm:$0xff] %vm1156_vm1, %v5789_v26 }
  0x74   : > { %1223 = vst.msk [vmem:[#allocation2 + $0x210] sm:$0xff] %vm1156_vm1, %v5789_v26 }
  0x75   : > { %1224 = vst.msk [vmem:[#allocation2 + $0x218] sm:$0xff] %vm1156_vm1, %v5789_v26 }
  0x76   : > { %1225 = vst.msk [vmem:[#allocation2 + $0x220] sm:$0xff] %vm1156_vm1, %v5789_v26 }
  0x77   : > { %1226 = vst.msk [vmem:[#allocation2 + $0x228] sm:$0xff] %vm1156_vm1, %v5789_v26 }
  0x78   : > { %5083 = vmatmul.msk.f32.gmra.mxu0 %vm306_vm0, %v269_v15  ;;  %1227 = vst.msk [vmem:[#allocation2 + $0x230] sm:$0xff] %vm1156_vm1, %v5789_v26 }
  0x79   : > { %1228 = vst.msk [vmem:[#allocation2 + $0x238] sm:$0xff] %vm1156_vm1, %v5789_v26 }
  0x7a   : > { %1229 = vst.msk [vmem:[#allocation2 + $0x240] sm:$0xff] %vm1156_vm1, %v5789_v26 }
  0x7b   : > { %1230 = vst.msk [vmem:[#allocation2 + $0x248] sm:$0xff] %vm1156_vm1, %v5789_v26 }
  0x7c   : > { %1231 = vst.msk [vmem:[#allocation2 + $0x250] sm:$0xff] %vm1156_vm1, %v5789_v26 }
  0x7d   : > { %1232 = vst.msk [vmem:[#allocation2 + $0x258] sm:$0xff] %vm1156_vm1, %v5789_v26 }
  0x7e   : > { %1233 = vst.msk [vmem:[#allocation2 + $0x260] sm:$0xff] %vm1156_vm1, %v5789_v26 }
  0x7f   : > { %1234 = vst.msk [vmem:[#allocation2 + $0x268] sm:$0xff] %vm1156_vm1, %v5789_v26 }
  0x80   : > { %5084 = vmatmul.msk.f32.gmra.mxu0 %vm306_vm0, %v270_v16  ;;  %1235 = vst.msk [vmem:[#allocation2 + $0x270] sm:$0xff] %vm1156_vm1, %v5789_v26 }
  0x81   : > { %1236 = vst.msk [vmem:[#allocation2 + $0x278] sm:$0xff] %vm1156_vm1, %v5789_v26 }
  0x82   : > { %1237 = vst.msk [vmem:[#allocation2 + $0x280] sm:$0xff] %vm1156_vm1, %v5789_v26 }
  0x83   : > { %1238 = vst.msk [vmem:[#allocation2 + $0x288] sm:$0xff] %vm1156_vm1, %v5789_v26 }
  0x84   : > { %1239 = vst.msk [vmem:[#allocation2 + $0x290] sm:$0xff] %vm1156_vm1, %v5789_v26 }
  0x85   : > { %1240 = vst.msk [vmem:[#allocation2 + $0x298] sm:$0xff] %vm1156_vm1, %v5789_v26 }
  0x86   : > { %1241 = vst.msk [vmem:[#allocation2 + $0x2a0] sm:$0xff] %vm1156_vm1, %v5789_v26 }
  0x87   : > { %1242 = vst.msk [vmem:[#allocation2 + $0x2a8] sm:$0xff] %vm1156_vm1, %v5789_v26 }
  0x88   : > { %5085 = vmatmul.msk.f32.gmra.mxu0 %vm306_vm0, %v271_v17  ;;  %1243 = vst.msk [vmem:[#allocation2 + $0x2b0] sm:$0xff] %vm1156_vm1, %v5789_v26 }
  0x89   : > { %1244 = vst.msk [vmem:[#allocation2 + $0x2b8] sm:$0xff] %vm1156_vm1, %v5789_v26  ;;  %v287_v26 = vld [vmem:[%s5927_s15 + $0xc8] sm:$0xff] }
  0x90   : > { %5086 = vmatmul.msk.f32.gmra.mxu0 %vm306_vm0, %v272_v18 }
  0x98   : > { %5087 = vmatmul.msk.f32.gmra.mxu0 %vm306_vm0, %v273_v19  ;;  %v284_v19 = vld [vmem:[%s5927_s15 + $0xb0] sm:$0xff] }
  0xa0   : > { %5088 = vmatmul.msk.f32.gmra.mxu0 %vm306_vm0, %v274_v20 }
  0xa8   : > { %5089 = vmatmul.msk.f32.gmra.mxu0 %vm306_vm0, %v275_v21 }
  0xb0   : > { %5090 = vmatmul.msk.f32.gmra.mxu0 %vm306_vm0, %v276_v22 }
  0xb8   : > { %5091 = vmatmul.msk.f32.gmra.mxu0 %vm306_vm0, %v277_v23 }
  0xbd   : > { %v420_v25 = vpop.f32.mrf.mxu0 }
  0xbe   : > { %v421_v28 = vadd.f32 %v5996_v24, %v420_v25 }
  0xc0   : > { %v5108_v29 = vmul.f32 -1.442695, %v421_v28  ;;  %5092 = vmatmul.msk.f32.gmra.mxu0 %vm306_vm0, %v278_v27 }
  0xc2   : > { %5383 = vpow2.f32 %v5108_v29 }
  0xc5   : > { %v423_v32 = vpop.f32.mrf.mxu0 }
  0xc6   : > { %v6048_v35 = vadd.f32 %v5996_v24, %v423_v32 }
  0xc8   : > { %v5384_v30 = vpop.eup %5383  ;;  %v5109_v40 = vmul.f32 -1.442695, %v6048_v35  ;;  %5093 = vmatmul.msk.f32.gmra.mxu0 %vm306_vm0, %v279_v41 }
  0xc9   : > { %v612_v31 = vadd.f32 1.0, %v5384_v30 }
  0xcb   : > { %5385 = vrcp.f32 %v612_v31  ;;  %v655_v37 = vand.u32 2147483648, %v612_v31  ;;  %v653_v39 = vand.u32 2147483647, %v612_v31  ;;  %vm649_vm3 = vweird.f32 %v612_v31 }
  0xcc   : > { %5387 = vpow2.f32 %v5109_v40 }
  0xcd   : > { %v656_v43 = vor.u32 1.1754944e-38, %v655_v37  ;;  %vm654_vm5 = vcmp.eq.f32.partialorder %v653_v39, 8.507059e+37  ;;  %v426_v47 = vpop.f32.mrf.mxu0 }
  0xce   : > { %v6078_v48 = vadd.f32 %v5996_v24, %v426_v47 }
  0xd0   : > { %5094 = vmatmul.msk.f32.gmra.mxu0 %vm306_vm0, %v280_v49  ;;  %v5110_v51 = vmul.f32 -1.442695, %v6078_v48 }
  0xd1   : > { %v5386_v33 = vpop.eup %5385 }
  0xd2   : > { %v645_v34 = vmul.f32 %v5386_v33, %v612_v31  ;;  %vm650_vm2 = vweird.f32 %v5386_v33  ;;  %v5388_v50 = vpop.eup %5387  ;;  %5389 = vpow2.f32 %v5110_v51 }
  0xd3   : > { %vm651_vm4 = vmor %vm649_vm3, %vm650_vm2  ;;  %v6095_v52 = vadd.f32 1.0, %v5388_v50 }
  0xd4   : > { %v646_v36 = vsub.f32 1.0, %v645_v34 }
  0xd5   : > { %v429_v53 = vpop.f32.mrf.mxu0  ;;  %5391 = vrcp.f32 %v6095_v52  ;;  %v670_v16 = vand.u32 2147483648, %v6095_v52  ;;  %vm664_vm7 = vweird.f32 %v6095_v52  ;;  %v668_v20 = vand.u32 2147483647, %v6095_v52 }
  0xd6   : > { %v647_v38 = vmul.f32 %v5386_v33, %v646_v36  ;;  %v6102_v54 = vadd.f32 %v5996_v24, %v429_v53 }
  0xd7   : > { %v671_v30 = vor.u32 1.1754944e-38, %v670_v16  ;;  %vm669_vm9 = vcmp.eq.f32.partialorder %v668_v20, 8.507059e+37 }
  0xd8   : > { %v648_v42 = vadd.f32 %v5386_v33, %v647_v38  ;;  %v5111_v56 = vmul.f32 -1.442695, %v6102_v54  ;;  %5095 = vmatmul.msk.f32.gmra.mxu0 %vm306_vm0, %v281_v55  ;;  %v5390_v57 = vpop.eup %5389 }
  0xd9   : > { %v6131_v61 = vadd.f32 1.0, %v5390_v57 }
  0xda   : > { %v652_v44 = vsel %vm651_vm4, %v5386_v33, %v648_v42  ;;  %5393 = vpow2.f32 %v5111_v56  ;;  %v285_v42 = vld [vmem:[%s5927_s15 + $0xb8] sm:$0xff] }
  0xdb   : > { %v657_v45 = vsel %vm654_vm5, %v656_v43, %v652_v44  ;;  %v6122_v59 = vpop.eup %5391  ;;  %v683_v36 = vand.u32 2147483647, %v6131_v61  ;;  %v685_v38 = vand.u32 2147483648, %v6131_v61  ;;  %vm679_vm10 = vweird.f32 %v6131_v61 }
  0xdc   : > { %v6069_v46 = vmul.f32 %v657_v45, %v421_v28  ;;  %v660_v1 = vmul.f32 %v6122_v59, %v6095_v52  ;;  %vm665_vm6 = vweird.f32 %v6122_v59 }
  0xdd   : > { %v432_v58 = vpop.f32.mrf.mxu0  ;;  %vm6203_vm8 = vmor %vm664_vm7, %vm665_vm6  ;;  %vm6250_vm12 = vcmp.eq.f32.partialorder %v683_v36, 8.507059e+37  ;;  %v686_v51 = vor.u32 1.1754944e-38, %v685_v38 }
  0xde   : > { %9936 = vst [vmem:[#allocation12_spill] sm:$0xff] %v6069_v46  ;;  %v6127_v60 = vadd.f32 %v5996_v24, %v432_v58  ;;  %v661_v3 = vsub.f32 1.0, %v660_v1 }
  0xdf   : > { %1246 = vst.msk [vmem:[#allocation2 + $0x68] sm:$0xff] %vm1156_vm1, %v6069_v46 }
  0xe0   : > { %v5394_v63 = vpop.eup %5393  ;;  %v5112_v0 = vmul.f32 -1.442695, %v6127_v60  ;;  %5096 = vmatmul.msk.f32.gmra.mxu0 %vm306_vm0, %v282_v62  ;;  %v662_v10 = vmul.f32 %v6122_v59, %v661_v3 }
  0xe1   : > { %v6142_v2 = vadd.f32 1.0, %v5394_v63 }
  0xe2   : > { %5395 = vpow2.f32 %v5112_v0  ;;  %v663_v14 = vadd.f32 %v6122_v59, %v662_v10 }
  0xe3   : > { %5397 = vrcp.f32 %v6131_v61  ;;  %v698_v52 = vand.u32 2147483647, %v6142_v2  ;;  %v700_v53 = vand.u32 2147483648, %v6142_v2  ;;  %vm694_vm2 = vweird.f32 %v6142_v2 }
  0xe4   : > { %5399 = vrcp.f32 %v6142_v2  ;;  %v667_v28 = vsel %vm6203_vm8, %v6122_v59, %v663_v14 }
  0xe5   : > { %v435_v4 = vpop.f32.mrf.mxu0  ;;  %v672_v33 = vsel %vm669_vm9, %v671_v30, %v667_v28  ;;  %vm6299_vm4 = vcmp.eq.f32.partialorder %v698_v52, 8.507059e+37 }
  0xe6   : > { %v6157_v5 = vadd.f32 %v5996_v24, %v435_v4  ;;  %v6242_v43 = vmul.f32 %v672_v33, %v6048_v35 }
  0xe8   : > { %v5396_v7 = vpop.eup %5395  ;;  %v5113_v8 = vmul.f32 -1.442695, %v6157_v5  ;;  %5097 = vmatmul.msk.f32.gmra.mxu0 %vm306_vm0, %v283_v6  ;;  %9939 = vst [vmem:[#allocation13_spill] sm:$0xff] %v6242_v43 }
  0xe9   : > { %v6166_v9 = vpop.eup %5397  ;;  %v6171_v11 = vadd.f32 1.0, %v5396_v7  ;;  %1247 = vst.msk [vmem:[#allocation2 + $0x70] sm:$0xff] %vm1156_vm1, %v6242_v43 }
  0xea   : > { %5401 = vpow2.f32 %v5113_v8  ;;  %v6175_v12 = vpop.eup %5399  ;;  %v675_v13 = vmul.f32 %v6166_v9, %v6131_v61  ;;  %vm680_vm11 = vweird.f32 %v6166_v9 }
  0xeb   : > { %5403 = vrcp.f32 %v6171_v11  ;;  %v690_v17 = vmul.f32 %v6175_v12, %v6142_v2  ;;  %vm695_vm13 = vweird.f32 %v6175_v12  ;;  %vm6276_vm14 = vmor %vm679_vm10, %vm680_vm11  ;;  %v713_v62 = vand.u32 2147483647, %v6171_v11 }
  0xec   : > { %v676_v23 = vsub.f32 1.0, %v675_v13  ;;  %v715_v61 = vand.u32 2147483648, %v6171_v11  ;;  %vm6295_vm3 = vmor %vm694_vm2, %vm695_vm13  ;;  %vm709_vm5 = vweird.f32 %v6171_v11  ;;  %v701_v13 = vor.u32 1.1754944e-38, %v700_v53  ;;  %v6400_v53 = vld [vmem:[#allocation2 + $0x98] sm:$0xff] }
  0xed   : > { %v438_v15 = vpop.f32.mrf.mxu0  ;;  %v691_v31 = vsub.f32 1.0, %v690_v17  ;;  %vm6330_vm8 = vcmp.eq.f32.partialorder %v713_v62, 8.507059e+37 }
  0xee   : > { %v6194_v18 = vadd.f32 %v5996_v24, %v438_v15  ;;  %v677_v34 = vmul.f32 %v6166_v9, %v676_v23  ;;  %v716_v17 = vor.u32 1.1754944e-38, %v715_v61 }
  0xef   : > { %v692_v40 = vmul.f32 %v6175_v12, %v691_v31 }
  0xf0   : > { %v5402_v21 = vpop.eup %5401  ;;  %v5114_v25 = vmul.f32 -1.442695, %v6194_v18  ;;  %5098 = vmatmul.msk.f32.gmra.mxu0 %vm306_vm0, %v284_v19  ;;  %v678_v47 = vadd.f32 %v6166_v9, %v677_v34 }
  0xf1   : > { %v6209_v27 = vpop.eup %5403  ;;  %v6216_v29 = vadd.f32 1.0, %v5402_v21  ;;  %v693_v56 = vadd.f32 %v6175_v12, %v692_v40 }
  0xf2   : > { %v705_v32 = vmul.f32 %v6209_v27, %v6171_v11  ;;  %5405 = vpow2.f32 %v5114_v25  ;;  %vm710_vm15 = vweird.f32 %v6209_v27  ;;  %v682_v63 = vsel %vm6276_vm14, %v6166_v9, %v678_v47  ;;  %v286_v11 = vld [vmem:[%s5927_s15 + $0xc0] sm:$0xff] }
  0xf3   : > { %5407 = vrcp.f32 %v6216_v29  ;;  %v728_v2 = vand.u32 2147483647, %v6216_v29  ;;  %v730_v4 = vand.u32 2147483648, %v6216_v29  ;;  %v697_v7 = vsel %vm6295_vm3, %v6175_v12, %v693_v56  ;;  %vm6313_vm6 = vmor %vm709_vm5, %vm710_vm15 }
  0xf4   : > { %v706_v37 = vsub.f32 1.0, %v705_v32  ;;  %v687_v12 = vsel %vm6250_vm12, %v686_v51, %v682_v63  ;;  %vm724_vm9 = vweird.f32 %v6216_v29  ;;  %v702_v22 = vsel %vm6299_vm4, %v701_v13, %v697_v7 }
  0xf5   : > { %v441_v39 = vpop.f32.mrf.mxu0  ;;  %vm729_vm11 = vcmp.eq.f32.partialorder %v728_v2, 8.507059e+37  ;;  %v731_v23 = vor.u32 1.1754944e-38, %v730_v4  ;;  %v6357_v30 = vmul.f32 %v687_v12, %v6078_v48  ;;  %v6363_v32 = vmul.f32 %v702_v22, %v6102_v54  ;;  %v6421_v2 = vld [vmem:[#allocation2 + $0xb8] sm:$0xff]  ;;  %v2009_v22 = vld [vmem:[#allocation6 + $0x20] sm:$0xff] }
  0xf6   : > { %v6236_v41 = vadd.f32 %v5996_v24, %v441_v39  ;;  %v707_v44 = vmul.f32 %v6209_v27, %v706_v37 }
  0xf7   : > { %9952 = vst [vmem:[#allocation14_spill] sm:$0xff] %v6357_v30 }
  0xf8   : > { %v5406_v45 = vpop.eup %5405  ;;  %v5115_v50 = vmul.f32 -1.442695, %v6236_v41  ;;  %5099 = vmatmul.msk.f32.gmra.mxu0 %vm306_vm0, %v285_v42  ;;  %v708_v59 = vadd.f32 %v6209_v27, %v707_v44  ;;  %9953 = vst [vmem:[#allocation15_spill] sm:$0xff] %v6363_v32 }
  0xf9   : > { %v6256_v35 = vpop.eup %5407  ;;  %v6262_v55 = vadd.f32 1.0, %v5406_v45  ;;  %1248 = vst.msk [vmem:[#allocation2 + $0x88] sm:$0xff] %vm1156_vm1, %v6357_v30 }
  0xfa   : > { %v720_v57 = vmul.f32 %v6256_v35, %v6216_v29  ;;  %5409 = vpow2.f32 %v5115_v50  ;;  %vm725_vm7 = vweird.f32 %v6256_v35  ;;  %v712_v14 = vsel %vm6313_vm6, %v6209_v27, %v708_v59  ;;  %1249 = vst.msk [vmem:[#allocation2 + $0x90] sm:$0xff] %vm1156_vm1, %v6363_v32  ;;  %v288_v59 = vld [vmem:[%s5927_s15 + $0xd0] sm:$0xff] }
  0xfb   : > { %5411 = vrcp.f32 %v6262_v55  ;;  %vm726_vm10 = vmor %vm724_vm9, %vm725_vm7  ;;  %v717_v27 = vsel %vm6330_vm8, %v716_v17, %v712_v14  ;;  %v743_v48 = vand.u32 2147483647, %v6262_v55  ;;  %v745_v36 = vand.u32 2147483648, %v6262_v55 }
  0xfc   : > { %v721_v0 = vsub.f32 1.0, %v720_v57  ;;  %v6368_v34 = vmul.f32 %v717_v27, %v6127_v60  ;;  %vm739_vm13 = vweird.f32 %v6262_v55  ;;  %vm1436_vm7 = vcmask 1045504  }
  0xfd   : > { %v444_v6 = vpop.f32.mrf.mxu0  ;;  %v746_v44 = vor.u32 1.1754944e-38, %v745_v36  ;;  %vm744_vm15 = vcmp.eq.f32.partialorder %v743_v48, 8.507059e+37 }
  0xfe   : > { %v722_v9 = vmul.f32 %v6256_v35, %v721_v0  ;;  %v6320_v10 = vadd.f32 %v5996_v24, %v444_v6  ;;  %9954 = vst [vmem:[#allocation16_spill] sm:$0xff] %v6368_v34 }
  0xff   : > { %1250 = vst.msk [vmem:[#allocation2 + $0xa8] sm:$0xff] %vm1156_vm1, %v6368_v34 }
 0x100   : > { %v5410_v16 = vpop.eup %5409  ;;  %v723_v19 = vadd.f32 %v6256_v35, %v722_v9  ;;  %v5116_v20 = vmul.f32 -1.442695, %v6320_v10  ;;  %5100 = vmatmul.msk.f32.gmra.mxu0 %vm306_vm0, %v286_v11  ;;  %v6419_v3 = vld [vmem:[#allocation2 + $0x88] sm:$0xff] }
 0x101   : > { %v5412_v21 = vpop.eup %5411  ;;  %v6346_v25 = vadd.f32 1.0, %v5410_v16  ;;  %v6409_v62 = vld [vmem:[#allocation2 + $0x90] sm:$0xff]  ;;  %v9797_v17 = vrot.slane %v6419_v3, 2 }
 0x102   : > { %v727_v28 = vsel %vm726_vm10, %v6256_v35, %v723_v19  ;;  %v735_v29 = vmul.f32 %v5412_v21, %v6262_v55  ;;  %5413 = vpow2.f32 %v5116_v20  ;;  %vm740_vm12 = vweird.f32 %v5412_v21 }
 0x103   : > { %v732_v31 = vsel %vm729_vm11, %v731_v23, %v727_v28  ;;  %5415 = vrcp.f32 %v6346_v25  ;;  %vm741_vm14 = vmor %vm739_vm13, %vm740_vm12  ;;  %v758_v52 = vand.u32 2147483647, %v6346_v25  ;;  %v760_v55 = vand.u32 2147483648, %v6346_v25 }
 0x104   : > { %v736_v33 = vsub.f32 1.0, %v735_v29  ;;  %v6375_v38 = vmul.f32 %v732_v31, %v6157_v5  ;;  %vm754_vm3 = vweird.f32 %v6346_v25  ;;  %v1458_v9 = vrot.slane %v6409_v62, 2  ;;  %v289_v31 = vld [vmem:[%s5927_s15 + $0xd8] sm:$0xff] }
 0x105   : > { %v447_v37 = vpop.f32.mrf.mxu0  ;;  %vm6413_vm4 = vcmp.eq.f32.partialorder %v758_v52, 8.507059e+37  ;;  %v761_v6 = vor.u32 1.1754944e-38, %v760_v55  ;;  %v1465_v19 = vrot.slane %v6421_v2, 2  ;;  %vm1745_vm10 = vcmask 1040384  }
 0x106   : > { %9955 = vst [vmem:[#allocation17_spill] sm:$0xff] %v6375_v38  ;;  %v737_v54 = vmul.f32 %v5412_v21, %v736_v33  ;;  %v6378_v39 = vadd.f32 %v5996_v24, %v447_v37  ;;  %v6429_v14 = vld [vmem:[#allocation2 + $0xa8] sm:$0xff] }
 0x107   : > { %1251 = vst.msk [vmem:[#allocation2 + $0xb0] sm:$0xff] %vm1156_vm1, %v6375_v38  ;;  %v1462_v27 = vrot.slane %v6429_v14, 2 }
 0x108   : > { %v5414_v60 = vpop.eup %5413  ;;  %v738_v40 = vadd.f32 %v5412_v21, %v737_v54  ;;  %v5117_v42 = vmul.f32 -1.442695, %v6378_v39  ;;  %5101 = vmatmul.msk.f32.gmra.mxu0 %vm306_vm0, %v287_v26  ;;  %v2460_v54 = vrot.slane %v6421_v2, 4 }
 0x109   : > { %v5416_v5 = vpop.eup %5415  ;;  %v6390_v45 = vadd.f32 1.0, %v5414_v60 }
 0x10a   : > { %v742_v47 = vsel %vm741_vm14, %v5412_v21, %v738_v40  ;;  %v750_v49 = vmul.f32 %v5416_v5, %v6346_v25  ;;  %5417 = vpow2.f32 %v5117_v42  ;;  %vm755_vm2 = vweird.f32 %v5416_v5 }
 0x10b   : > { %v747_v50 = vsel %vm744_vm15, %v746_v44, %v742_v47  ;;  %5419 = vrcp.f32 %v6390_v45  ;;  %vm756_vm5 = vmor %vm754_vm3, %vm755_vm2  ;;  %v773_v7 = vand.u32 2147483647, %v6390_v45  ;;  %v775_v13 = vand.u32 2147483648, %v6390_v45 }
 0x10c   : > { %v6397_v35 = vmul.f32 %v747_v50, %v6194_v18  ;;  %v751_v51 = vsub.f32 1.0, %v750_v49  ;;  %v1460_v18 = vrot.slane %v6400_v53, 2  ;;  %vm769_vm6 = vweird.f32 %v6390_v45 }
 0x10d   : > { %v450_v56 = vpop.f32.mrf.mxu0  ;;  %vm6442_vm8 = vcmp.eq.f32.partialorder %v773_v7, 8.507059e+37  ;;  %v1459_v25 = vsel %vm1436_vm7, %v9797_v17, %v1458_v9  ;;  %v776_v48 = vor.u32 1.1754944e-38, %v775_v13  ;;  %vm2431_vm14 = vcmask 1043456  }
 0x10e   : > { %9956 = vst [vmem:[#allocation18_spill] sm:$0xff] %v6397_v35  ;;  %v752_v57 = vmul.f32 %v5416_v5, %v751_v51  ;;  %v6406_v58 = vadd.f32 %v5996_v24, %v450_v56  ;;  %v6431_v15 = vld [vmem:[#allocation2 + $0xb0] sm:$0xff]  ;;  %v1461_v33 = vsel %vm1436_vm7, %v1458_v9, %v1460_v18  ;;  %v1626_v42 = vmax.f32 %v6419_v3, %v1459_v25 }
 0x10f   : > { %1252 = vst.msk [vmem:[#allocation2 + $0xc8] sm:$0xff] %vm1156_vm1, %v6397_v35  ;;  %v1463_v28 = vrot.slane %v6431_v15, 2  ;;  %v1627_v50 = vmax.f32 %v6409_v62, %v1461_v33 }
 0x110   : > { %v5418_v63 = vpop.eup %5417  ;;  %v753_v61 = vadd.f32 %v5416_v5, %v752_v57  ;;  %v5118_v1 = vmul.f32 -1.442695, %v6406_v58  ;;  %5102 = vmatmul.msk.f32.gmra.mxu0 %vm306_vm0, %v288_v59  ;;  %v9800_v57 = vrot.slane %v6429_v14, 4  ;;  %v6493_v7 = vrot.slane %v1626_v42, 7 }
 0x111   : > { %v5420_v4 = vpop.eup %5419  ;;  %v6424_v8 = vadd.f32 1.0, %v5418_v63  ;;  %v1464_v36 = vsel %vm1436_vm7, %v1462_v27, %v1463_v28  ;;  %v1466_v37 = vsel %vm1436_vm7, %v1463_v28, %v1465_v19  ;;  %v1769_v9 = vrot.slane %v1627_v50, 7  ;;  %v2012_v19 = vld [vmem:[#allocation6 + $0x38] sm:$0xff] }
 0x112   : > { %v757_v11 = vsel %vm756_vm5, %v5416_v5, %v753_v61  ;;  %v765_v12 = vmul.f32 %v5420_v4, %v6390_v45  ;;  %5421 = vpow2.f32 %v5118_v1  ;;  %vm770_vm9 = vweird.f32 %v5420_v4  ;;  %5307 = vmatpush.msra.mxu1 %v2012_v19  ;;  %2121 = vmatpush.msrb.mxu0 %v2012_v19 }
 0x113   : > { %v762_v16 = vsel %vm6413_vm4, %v761_v6, %v757_v11  ;;  %5423 = vrcp.f32 %v6424_v8  ;;  %v2453_v5 = vrot.slane %v6409_v62, 4  ;;  %vm771_vm11 = vmor %vm769_vm6, %vm770_vm9  ;;  %v1629_v51 = vmax.f32 %v6429_v14, %v1464_v36  ;;  %v6491_v6 = vld [vmem:[#allocation2 + $0xd8] sm:$0xff]  ;;  %5308 = vmatpush.msra.mxu2 %v2012_v19  ;;  %5309 = vmatpush.msra.mxu3 %v2012_v19  ;;  %v2010_v19 = vld [vmem:[#allocation6 + $0x28] sm:$0xff] }
 0x114   : > { %v6439_v20 = vmul.f32 %v762_v16, %v6236_v41  ;;  %v766_v21 = vsub.f32 1.0, %v765_v12  ;;  %v1630_v52 = vmax.f32 %v6431_v15, %v1466_v37  ;;  %v788_v59 = vand.u32 2147483647, %v6424_v8  ;;  %v290_v16 = vld [vmem:[%s5927_s15 + $0xe0] sm:$0xff] }
 0x115   : > { %v453_v23 = vpop.f32.mrf.mxu0  ;;  %v790_v18 = vand.u32 2147483648, %v6424_v8  ;;  %vm784_vm12 = vweird.f32 %v6424_v8  ;;  %v6495_v11 = vrot.slane %v1629_v51, 7  ;;  %v1470_v28 = vrot.slane %v6491_v6, 2 }
 0x116   : > { %9959 = vst [vmem:[#allocation19_spill] sm:$0xff] %v6439_v20  ;;  %v767_v41 = vmul.f32 %v5420_v4, %v766_v21  ;;  %v6454_v29 = vadd.f32 %v5996_v24, %v453_v23  ;;  %v6472_v49 = vld [vmem:[#allocation2 + $0xc8] sm:$0xff]  ;;  %v1774_v12 = vrot.slane %v1630_v52, 7  ;;  %vm6504_vm15 = vcmp.eq.f32.partialorder %v788_v59, 8.507059e+37 }
 0x117   : > { %1253 = vst.msk [vmem:[#allocation2 + $0xd0] sm:$0xff] %vm1156_vm1, %v6439_v20  ;;  %v1467_v0 = vrot.slane %v6472_v49, 2  ;;  %v791_v23 = vor.u32 1.1754944e-38, %v790_v18  ;;  %v1770_v52 = vsel %vm1745_vm10, %v6493_v7, %v1769_v9  ;;  %vm2740_vm6 = vcmask 1041408  }
 0x118   : > { %v5422_v26 = vpop.eup %5421  ;;  %v768_v60 = vadd.f32 %v5420_v4, %v767_v41  ;;  %v5119_v40 = vmul.f32 -1.442695, %v6454_v29  ;;  %5103 = vmatmul.msk.f32.gmra.mxu0 %vm306_vm0, %v289_v31  ;;  %v1775_v42 = vsel %vm1745_vm10, %v6495_v11, %v1774_v12 }
 0x119   : > { %v5424_v44 = vpop.eup %5423  ;;  %v6470_v47 = vadd.f32 1.0, %v5422_v26  ;;  %v6541_v18 = vmax.f32 %v6431_v15, %v1775_v42 }
 0x11a   : > { %v772_v55 = vsel %vm771_vm11, %v5420_v4, %v768_v60  ;;  %v780_v56 = vmul.f32 %v5424_v44, %v6424_v8  ;;  %5425 = vpow2.f32 %v5119_v40  ;;  %vm785_vm13 = vweird.f32 %v5424_v44 }
 0x11b   : > { %v777_v45 = vsel %vm6442_vm8, %v776_v48, %v772_v55  ;;  %5427 = vrcp.f32 %v6470_v47  ;;  %v803_v25 = vand.u32 2147483647, %v6470_v47  ;;  %v805_v33 = vand.u32 2147483648, %v6470_v47  ;;  %vm786_vm2 = vmor %vm784_vm12, %vm785_vm13 }
 0x11c   : > { %v6485_v63 = vmul.f32 %v777_v45, %v6320_v10  ;;  %v781_v61 = vsub.f32 1.0, %v780_v56  ;;  %vm799_vm3 = vweird.f32 %v6470_v47  ;;  %v2458_v55 = vrot.slane %v6431_v15, 4  ;;  %v2011_v45 = vld [vmem:[#allocation6 + $0x30] sm:$0xff] }
 0x11d   : > { %v456_v1 = vpop.f32.mrf.mxu0  ;;  %vm6543_vm4 = vcmp.eq.f32.partialorder %v803_v25, 8.507059e+37  ;;  %5310 = vmatpush.msra.mxu1 %v2011_v45  ;;  %2122 = vmatpush.msrb.mxu0 %v2011_v45 }
 0x11e   : > { %9962 = vst [vmem:[#allocation20_spill] sm:$0xff] %v6485_v63  ;;  %v6489_v4 = vld [vmem:[#allocation2 + $0xd0] sm:$0xff]  ;;  %v782_v10 = vmul.f32 %v5424_v44, %v781_v61  ;;  %v6500_v13 = vadd.f32 %v5996_v24, %v456_v1  ;;  %v806_v1 = vor.u32 1.1754944e-38, %v805_v33  ;;  %5311 = vmatpush.msra.mxu2 %v2011_v45  ;;  %5312 = vmatpush.msra.mxu3 %v2011_v45 }
 0x11f   : > { %1254 = vst.msk [vmem:[#allocation2 + $0xe8] sm:$0xff] %vm1156_vm1, %v6485_v63  ;;  %v1468_v21 = vrot.slane %v6489_v4, 2  ;;  %5313 = vmatpush.msra.mxu1 %v2010_v19  ;;  %v2459_v25 = vsel %vm2431_vm14, %v9800_v57, %v2458_v55  ;;  %2123 = vmatpush.msrb.mxu0 %v2010_v19  ;;  %v6818_v63 = vld [vmem:[#allocation2 + $0x48] sm:$0xff] }
 0x120   : > { %v5426_v41 = vpop.eup %5425  ;;  %v783_v31 = vadd.f32 %v5424_v44, %v782_v10  ;;  %v5120_v48 = vmul.f32 -1.442695, %v6500_v13  ;;  %5104 = vmatmul.msk.f32.gmra.mxu0 %vm306_vm0, %v290_v16  ;;  %5314 = vmatpush.msra.mxu2 %v2010_v19 }
 0x121   : > { %v1469_v36 = vsel %vm1436_vm7, %v1467_v0, %v1468_v21  ;;  %v6516_v37 = vpop.eup %5427  ;;  %v6521_v26 = vadd.f32 1.0, %v5426_v41  ;;  %v1471_v60 = vsel %vm1436_vm7, %v1468_v21, %v1470_v28  ;;  %v291_v21 = vld [vmem:[%s5927_s15 + $0xe8] sm:$0xff]  ;;  %v9799_v28 = vrot.slane %v6472_v49, 4  ;;  %5316 = vmatpush.msra.mxu1 %v2009_v22  ;;  %2124 = vmatpush.msrb.mxu0 %v2009_v22 }
 0x122   : > { %v1632_v40 = vmax.f32 %v6472_v49, %v1469_v36  ;;  %v787_v50 = vsel %vm786_vm2, %v5424_v44, %v783_v31  ;;  %v795_v51 = vmul.f32 %v6516_v37, %v6470_v47  ;;  %5429 = vpow2.f32 %v5120_v48  ;;  %5317 = vmatpush.msra.mxu2 %v2009_v22  ;;  %5315 = vmatpush.msra.mxu3 %v2010_v19 }
 0x123   : > { %v792_v8 = vsel %vm6504_vm15, %v791_v23, %v787_v50  ;;  %5431 = vrcp.f32 %v6521_v26  ;;  %v1633_v59 = vmax.f32 %v6489_v4, %v1471_v60  ;;  %vm800_vm5 = vweird.f32 %v6516_v37 }
 0x124   : > { %v6537_v56 = vmul.f32 %v792_v8, %v6378_v39  ;;  %v796_v44 = vsub.f32 1.0, %v795_v51  ;;  %v6547_v12 = vrot.slane %v1632_v40, 7  ;;  %v6550_v39 = vmax.f32 %v6409_v62, %v1770_v52  ;;  %vm801_vm8 = vmor %vm799_vm3, %vm800_vm5  ;;  %5318 = vmatpush.msra.mxu3 %v2009_v22 }
 0x125   : > { %v459_v9 = vpop.f32.mrf.mxu0  ;;  %v1779_v23 = vrot.slane %v1633_v59, 7  ;;  %v2463_v41 = vrot.slane %v6489_v4, 4  ;;  %v2465_v31 = vrot.slane %v6491_v6, 4  ;;  %v2461_v47 = vsel %vm2431_vm14, %v2458_v55, %v2460_v54 }
 0x126   : > { %9965 = vst [vmem:[#allocation21_spill] sm:$0xff] %v6537_v56  ;;  %v797_v10 = vmul.f32 %v6516_v37, %v796_v44  ;;  %v6557_v16 = vadd.f32 %v5996_v24, %v459_v9  ;;  %v1949_v60 = vmax.f32 %v6550_v39, %v6541_v18  ;;  %v9796_v59 = vrot.slane %v6419_v3, 4 }
 0x127   : > { %1255 = vst.msk [vmem:[#allocation2 + $0xf0] sm:$0xff] %vm1156_vm1, %v6537_v56  ;;  %v1780_v36 = vsel %vm1745_vm10, %v6547_v12, %v1779_v23  ;;  %v2464_v51 = vsel %vm2431_vm14, %v9799_v28, %v2463_v41  ;;  %v2466_v52 = vsel %vm2431_vm14, %v2463_v41, %v2465_v31  ;;  %v2624_v9 = vmax.f32 %v6429_v14, %v2459_v25 }
 0x128   : > { %v5430_v24 = vpop.eup %5429  ;;  %v798_v33 = vadd.f32 %v6516_v37, %v797_v10  ;;  %v5121_v48 = vmul.f32 -1.442695, %v6557_v16  ;;  %5105 = vmatmul.msk.f32.gmra.mxu0 %vm306_vm0, %v291_v21  ;;  %v6580_v50 = vmax.f32 %v6489_v4, %v1780_v36  ;;  %v820_v21 = vand.u32 2147483648, %v6521_v26 }
 0x129   : > { %v5432_v40 = vpop.eup %5431  ;;  %v6577_v42 = vadd.f32 1.0, %v5430_v24  ;;  %v2455_v54 = vrot.slane %v6400_v53, 4  ;;  %v2625_v55 = vmax.f32 %v6431_v15, %v2461_v47  ;;  %v2627_v61 = vmax.f32 %v6472_v49, %v2464_v51 }
 0x12a   : > { %v802_v8 = vsel %vm801_vm8, %v6516_v37, %v798_v33  ;;  %v810_v44 = vmul.f32 %v5432_v40, %v6521_v26  ;;  %5433 = vpow2.f32 %v5121_v48  ;;  %v1981_v23 = vmax.f32 %v1949_v60, %v6580_v50 }
 0x12b   : > { %v807_v45 = vsel %vm6543_vm4, %v806_v1, %v802_v8  ;;  %5435 = vrcp.f32 %v6577_v42  ;;  %v2628_v1 = vmax.f32 %v6489_v4, %v2466_v52  ;;  %vm815_vm9 = vweird.f32 %v5432_v40 }
 0x12c   : > { %v6597_v37 = vmul.f32 %v807_v45, %v6406_v58  ;;  %v811_v10 = vsub.f32 1.0, %v810_v44  ;;  %v818_v25 = vand.u32 2147483647, %v6521_v26  ;;  %5145 = vmatmul.msk.f32.vlgmr.msra.gmra.mxu1 %vm1156_vm1, %v1981_v23  ;;  %v6614_v22 = vsel %vm2431_vm14, %v9796_v59, %v2453_v5 }
 0x12d   : > { %v462_v19 = vpop.f32.mrf.mxu0  ;;  %v6616_v41 = vrot.slane %v2624_v9, 6  ;;  %v2769_v31 = vrot.slane %v2625_v55, 6  ;;  %v6618_v24 = vrot.slane %v2627_v61, 6  ;;  %v2774_v33 = vrot.slane %v2628_v1, 6 }
 0x12e   : > { %9968 = vst [vmem:[#allocation22_spill] sm:$0xff] %v6597_v37  ;;  %v812_v58 = vmul.f32 %v5432_v40, %v811_v10  ;;  %vm814_vm11 = vweird.f32 %v6521_v26  ;;  %v821_v60 = vor.u32 1.1754944e-38, %v820_v21  ;;  %v833_v51 = vand.u32 2147483647, %v6577_v42  ;;  %v6639_v21 = vld [vmem:[#allocation2 + $0xe8] sm:$0xff] }
 0x12f   : > { %1256 = vst.msk [vmem:[#allocation2 + $0x108] sm:$0xff] %vm1156_vm1, %v6597_v37  ;;  %vm816_vm12 = vmor %vm814_vm11, %vm815_vm9  ;;  %v835_v8 = vand.u32 2147483648, %v6577_v42  ;;  %v6627_v47 = vsel %vm2740_vm6, %v6616_v41, %v2769_v31  ;;  %v6631_v45 = vsel %vm2740_vm6, %v6618_v24, %v2774_v33  ;;  %vm819_vm13 = vcmp.eq.f32.partialorder %v818_v25, 8.507059e+37  ;;  %v6661_v33 = vld [vmem:[%s9791_s2] ss:$0 sm:$0xff] }
 0x130   : > { %v5434_v48 = vpop.eup %5433  ;;  %v813_v36 = vadd.f32 %v5432_v40, %v812_v58  ;;  %v6637_v10 = vsel %vm2431_vm14, %v2453_v5, %v2455_v54  ;;  %v9798_v61 = vrot.slane %v6489_v4, 6  ;;  %vm829_vm15 = vweird.f32 %v6577_v42  ;;  %v6655_v54 = vld [vmem:[#allocation2 + $0xc0] sm:$0xff] }
 0x131   : > { %v5436_v52 = vpop.eup %5435  ;;  %v6623_v44 = vadd.f32 1.0, %v5434_v48  ;;  %vm6651_vm2 = vcmp.eq.f32.partialorder %v833_v51, 8.507059e+37  ;;  %v836_v25 = vor.u32 1.1754944e-38, %v835_v8  ;;  %v3346_v31 = vrot.slane %v6491_v6, 6  ;;  %v292_v48 = vld [vmem:[%s5927_s15 + $0xf0] sm:$0xff] }
 0x132   : > { %v817_v9 = vsel %vm816_vm12, %v5432_v40, %v813_v36  ;;  %v825_v26 = vmul.f32 %v5436_v52, %v6577_v42  ;;  %v6645_v40 = vld [vmem:[#allocation2 + $0xa0] sm:$0xff]  ;;  %v1472_v51 = vrot.slane %v6639_v21, 2  ;;  %vm830_vm3 = vweird.f32 %v5436_v52  ;;  %5106 = vmatmul.msk.f32.gmra.mxu0 %vm306_vm0, %v292_v48  ;;  %v293_v42 = vld [vmem:[%s5927_s15 + $0xf8] sm:$0xff]  ;;  %s5728_s15 = sshra.s32 %s4982_s22, 4  ;;  %s5729_s15 = int_to_ptr.hbm [resolvable:$true] %s5728_s15 }
 0x133   : > { %v822_v23 = vsel %vm819_vm13, %v821_v60, %v817_v9  ;;  %5437 = vrcp.f32 %v6623_v44  ;;  %v6667_v60 = vld [vmem:[#allocation2 + $0xe0] sm:$0xff]  ;;  %v6676_v9 = vld [vmem:[#allocation2 + $0xf0] sm:$0xff]  ;;  %v1631_v48 = vmax.f32 %v6655_v54, %v1467_v0  ;;  %vm831_vm4 = vmor %vm829_vm15, %vm830_vm3  ;;  %v2467_v5 = vrot.slane %v6639_v21, 4  ;;  %s5730_s17 = scalar_lea.hbm %s5729_s15, 256  ;;  %p5735_p11 = scmp.lt.s32.totalorder %s5729_s15, %s9794_s5 }
 0x134   : > { %v6648_v1 = vmul.f32 %v822_v23, %v6454_v29  ;;  %v826_v58 = vsub.f32 1.0, %v825_v26  ;;  %v6664_v29 = vadd.f32 %v6661_v33, %v462_v19  ;;  %9972 = vst [vmem:[#allocation24_spill] sm:$0xff] %v6676_v9  ;;  %v1628_v19 = vmax.f32 %v6645_v40, %v1462_v27  ;;  %p5731_p1 = scmp.ne.s32.totalorder %s5729_s15, %s5730_s17  ;;  %p5736_p9 = scmp.lt.s32.totalorder %s5734_s26, %s5730_s17 }
 0x135   : > { %v465_v36 = vpop.f32.mrf.mxu0  ;;  %v6684_v26 = vsel %vm2740_vm6, %v9798_v61, %v3346_v31  ;;  %v1634_v17 = vmax.f32 %v6667_v60, %v1472_v51  ;;  %v848_v31 = vand.u32 2147483647, %v6623_v44  ;;  %vm844_vm8 = vweird.f32 %v6623_v44 }
 0x136   : > { %9969 = vst [vmem:[#allocation23_spill] sm:$0xff] %v6648_v1  ;;  %v827_v8 = vmul.f32 %v5436_v52, %v826_v58  ;;  %v6674_v6 = vadd.f32 %v6661_v33, %v465_v36  ;;  %v5122_v23 = vmul.f32 -1.442695, %v6664_v29  ;;  %v9805_v58 = vrot.slane %v6676_v9, 2  ;;  %p5732_p4 = pnand %p5731_p1, %p5891_p3  ;;  %p5737_p2 = por %p5736_p9, %p5735_p11 }
 0x137   : > { %1257 = vst.msk [vmem:[#allocation2 + $0x110] sm:$0xff] %vm1156_vm1, %v6648_v1  ;;  %v1771_v59 = vrot.slane %v1628_v19, 7  ;;  %v850_v1 = vand.u32 2147483648, %v6623_v44  ;;  %vm849_vm11 = vcmp.eq.f32.partialorder %v848_v31, 8.507059e+37  ;;  %vm3621_vm3 = vcmask 1042432  }
 0x138   : > { %9973 = vst [vmem:[#allocation25_spill] sm:$0xff] %v6684_v26  ;;  %v828_v36 = vadd.f32 %v5436_v52, %v827_v8  ;;  %v5123_v27 = vmul.f32 -1.442695, %v6674_v6  ;;  %5439 = vpow2.f32 %v5122_v23  ;;  %v1474_v0 = vsel %vm1436_vm7, %v1472_v51, %v9805_v58  ;;  %p5733_p8 = pneg %p5732_p4 }
 0x139   : > { %v5438_v55 = vpop.eup %5437  ;;  %v1776_v8 = vrot.slane %v1631_v48, 7  ;;  %v1635_v37 = vmax.f32 %v6639_v21, %v1474_v0  ;;  %v1781_v48 = vrot.slane %v1634_v17, 7  ;;  %v10000_v30 = vrot.slane %v6676_v9, 6 }
 0x13a   : > { %v832_v61 = vsel %vm831_vm4, %v5436_v52, %v828_v36  ;;  %v840_v28 = vmul.f32 %v5438_v55, %v6623_v44  ;;  %5441 = vpow2.f32 %v5123_v27  ;;  %v1773_v52 = vsel %vm1745_vm10, %v1771_v59, %v6495_v11  ;;  %5107 = vmatmul.msk.f32.gmra.mxu0 %vm306_vm0, %v293_v42  ;;  %p5738_p10 = pnand %p5737_p2, %p5733_p8 }
 0x13b   : > { %v837_v57 = vsel %vm6651_vm2, %v836_v25, %v832_v61  ;;  %v1778_v23 = vsel %vm1745_vm10, %v1776_v8, %v6547_v12  ;;  %v6714_v19 = vrot.slane %v1635_v37, 7  ;;  %v9804_v25 = vrot.slane %v6676_v9, 4 }
 0x13c   : > { %v6710_v56 = vmul.f32 %v837_v57, %v6500_v13  ;;  %v841_v51 = vsub.f32 1.0, %v840_v28  ;;  %v6717_v61 = vmax.f32 %v6472_v49, %v1778_v23  ;;  %vm845_vm5 = vweird.f32 %v5438_v55 }
 0x13d   : > { %v9975_v57 = vrot.slane %v6429_v14, 4  ;;  %v9976_v11 = vrot.slane %v6472_v49, 4  ;;  %v1783_v59 = vsel %vm1745_vm10, %v1781_v48, %v6714_v19  ;;  %v2469_v37 = vsel %vm2431_vm14, %v2467_v5, %v9804_v25  ;;  %vm846_vm9 = vmor %vm844_vm8, %vm845_vm5 }
 0x13e   : > { %9974 = vst [vmem:[#allocation26_spill] sm:$0xff] %v6710_v56  ;;  %v842_v12 = vmul.f32 %v5438_v55, %v841_v51  ;;  %v5440_v28 = vpop.eup %5439  ;;  %v2629_v36 = vmax.f32 %v6667_v60, %v2467_v5  ;;  %v6740_v42 = vmax.f32 %v6429_v14, %v1773_v52  ;;  %v2630_v23 = vmax.f32 %v6639_v21, %v2469_v37 }
 0x13f   : > { %1258 = vst.msk [vmem:[#allocation2 + $0x128] sm:$0xff] %vm1156_vm1, %v6710_v56  ;;  %v2623_v17 = vmax.f32 %v6645_v40, %v9975_v57  ;;  %v2626_v13 = vmax.f32 %v6655_v54, %v9976_v11  ;;  %v6737_v8 = vadd.f32 1.0, %v5440_v28  ;;  %v851_v44 = vor.u32 1.1754944e-38, %v850_v1 }
 0x140   : > { %v5442_v27 = vpop.eup %5441  ;;  %v843_v0 = vadd.f32 %v5438_v55, %v842_v12  ;;  %v2622_v51 = vmax.f32 %v6409_v62, %v6637_v10  ;;  %v6748_v57 = vmax.f32 %v6639_v21, %v1783_v59  ;;  %v1950_v52 = vmax.f32 %v6740_v42, %v6717_v61 }
 0x141   : > { %v6745_v48 = vadd.f32 1.0, %v5442_v27  ;;  %5443 = vrcp.f32 %v6737_v8  ;;  %v2766_v11 = vrot.slane %v2623_v17, 6  ;;  %v2771_v1 = vrot.slane %v2626_v13, 6 }
 0x142   : > { %v847_v5 = vsel %vm846_vm9, %v5438_v55, %v843_v0  ;;  %v863_v62 = vand.u32 2147483647, %v6737_v8  ;;  %v9806_v10 = vrot.slane %v6429_v14, 6  ;;  %v865_v55 = vand.u32 2147483648, %v6737_v8 }
 0x143   : > { %v852_v12 = vsel %vm849_vm11, %v851_v44, %v847_v5  ;;  %5445 = vrcp.f32 %v6745_v48  ;;  %v1982_v31 = vmax.f32 %v1950_v52, %v6748_v57  ;;  %v6763_v59 = vsel %vm2740_vm6, %v2766_v11, %v6616_v41 }
 0x144   : > { %v6755_v28 = vmul.f32 %v852_v12, %v6557_v16  ;;  %v6767_v37 = vsel %vm2740_vm6, %v2771_v1, %v6618_v24  ;;  %v878_v16 = vand.u32 2147483647, %v6745_v48  ;;  %v880_v17 = vand.u32 2147483648, %v6745_v48 }
 0x145   : > { %v2776_v13 = vrot.slane %v2629_v36, 6  ;;  %v6773_v27 = vrot.slane %v2630_v23, 6  ;;  %v9978_v0 = vmax.f32 %v6419_v3, %v6614_v22  ;;  %v6780_v41 = vrot.slane %v2622_v51, 6  ;;  %5146 = vmatmul.msk.f32.gmra.mxu1 %vm1156_vm1, %v1982_v31 }
 0x146   : > { %9977 = vst [vmem:[#allocation27_spill] sm:$0xff] %v6755_v28  ;;  %vm859_vm12 = vweird.f32 %v6737_v8  ;;  %v3343_v24 = vrot.slane %v6472_v49, 6  ;;  %vm874_vm13 = vweird.f32 %v6745_v48  ;;  %v3348_v23 = vrot.slane %v6639_v21, 6 }
 0x147   : > { %1259 = vst.msk [vmem:[#allocation2 + $0x130] sm:$0xff] %vm1156_vm1, %v6755_v28  ;;  %v6778_v44 = vrot.slane %v9978_v0, 6  ;;  %v5444_v5 = vpop.eup %5443  ;;  %v2778_v36 = vsel %vm2740_vm6, %v2776_v13, %v6773_v27  ;;  %v9811_v22 = vrot.slane %v6676_v9, 6  ;;  %v6793_v51 = vmax.f32 %v6645_v40, %v9806_v10  ;;  %v468_v28 = vpop.f32.mrf.mxu0 }
 0x148   : > { %v855_v12 = vmul.f32 %v5444_v5, %v6737_v8  ;;  %vm6796_vm15 = vcmp.eq.f32.partialorder %v863_v62, 8.507059e+37  ;;  %v866_v1 = vor.u32 1.1754944e-38, %v865_v55  ;;  %v6801_v31 = vmax.f32 %v6748_v57, %v2778_v36 }
 0x149   : > { %v5446_v52 = vpop.eup %5445  ;;  %vm6804_vm2 = vcmp.eq.f32.partialorder %v878_v16, 8.507059e+37  ;;  %v881_v25 = vor.u32 1.1754944e-38, %v880_v17  ;;  %v9984_v40 = vrot.slane %v6489_v4, 6  ;;  %v3350_v62 = vsel %vm2740_vm6, %v3348_v23, %v9811_v22 }
 0x14a   : > { %9981 = vst [vmem:[#allocation28_spill] sm:$0xff] %v6801_v31  ;;  %v870_v13 = vmul.f32 %v5446_v52, %v6745_v48  ;;  %v856_v10 = vsub.f32 1.0, %v855_v12  ;;  %v3507_v55 = vmax.f32 %v6655_v54, %v3343_v24  ;;  %vm860_vm4 = vweird.f32 %v5444_v5 }
 0x14b   : > { %v3345_v58 = vsel %vm2740_vm6, %v3343_v24, %v9984_v40  ;;  %v3510_v56 = vmax.f32 %v6667_v60, %v3348_v23  ;;  %v3511_v17 = vmax.f32 %v6639_v21, %v3350_v62  ;;  %v6820_v40 = vld [vmem:[#allocation2 + $0x50] sm:$0xff]  ;;  %vm875_vm5 = vweird.f32 %v5446_v52  ;;  %vm861_vm8 = vmor %vm859_vm12, %vm860_vm4 }
 0x14c   : > { %v3508_v36 = vmax.f32 %v6472_v49, %v3345_v58  ;;  %v871_v16 = vsub.f32 1.0, %v870_v13  ;;  %v857_v20 = vmul.f32 %v5444_v5, %v856_v10  ;;  %v3652_v22 = vrot.slane %v3507_v55, 5  ;;  %v6829_v13 = vld [vmem:[#allocation2 + $0x68] sm:$0xff]  ;;  %v6831_v60 = vld [vmem:[#allocation2 + $0x70] sm:$0xff]  ;;  %v1286_v10 = vld [vmem:[#allocation2 + $0x40] sm:$0xff] }
 0x14d   : > { %v3657_v24 = vrot.slane %v3510_v56, 5  ;;  %v6824_v49 = vrot.slane %v3511_v17, 5  ;;  %v6827_v58 = vadd.f32 %v6661_v33, %v468_v28  ;;  %v1447_v62 = vrot.slane %v6818_v63, 2  ;;  %vm876_vm9 = vmor %vm874_vm13, %vm875_vm5  ;;  %v1294_v17 = vld [vmem:[#allocation2 + $0x80] sm:$0xff] }
 0x14e   : > { %v6822_v12 = vrot.slane %v3508_v36, 5  ;;  %v872_v54 = vmul.f32 %v5446_v52, %v871_v16  ;;  %v858_v21 = vadd.f32 %v5444_v5, %v857_v20  ;;  %v9813_v55 = vrot.slane %v6820_v40, 2  ;;  %v1290_v16 = vld [vmem:[#allocation2 + $0x60] sm:$0xff] }
 0x14f   : > { %9986 = vst [vmem:[#allocation30_spill] sm:$0xff] %v6824_v49  ;;  %v6845_v36 = vsel %vm3621_vm3, %v3657_v24, %v6824_v49  ;;  %v5124_v20 = vmul.f32 -1.442695, %v6827_v58  ;;  %v9818_v28 = vrot.slane %v6831_v60, 2  ;;  %v9817_v0 = vrot.slane %v6820_v40, 4 }
 0x150   : > { %9985 = vst [vmem:[#allocation29_spill] sm:$0xff] %v6822_v12  ;;  %v6835_v23 = vsel %vm3621_vm3, %v3652_v22, %v6822_v12  ;;  %v873_v56 = vadd.f32 %v5446_v52, %v872_v54  ;;  %v862_v22 = vsel %vm861_vm8, %v5444_v5, %v858_v21  ;;  %v1449_v8 = vsel %vm1436_vm7, %v1447_v62, %v9813_v55 }
 0x151   : > { %9987 = vst [vmem:[#allocation31_spill] sm:$0xff] %v6845_v36  ;;  %v1452_v54 = vrot.slane %v6829_v13, 2  ;;  %v867_v24 = vsel %vm6796_vm15, %v866_v1, %v862_v22  ;;  %5447 = vpow2.f32 %v5124_v20  ;;  %v1619_v5 = vmax.f32 %v1286_v10, %v1447_v62 }
 0x152   : > { %v877_v35 = vsel %vm876_vm9, %v5446_v52, %v873_v56  ;;  %v6859_v21 = vmul.f32 %v867_v24, %v6664_v29  ;;  %v1620_v38 = vmax.f32 %v6818_v63, %v1449_v8  ;;  %v9990_v1 = vrot.slane %v6419_v3, 2 }
 0x153   : > { %v882_v48 = vsel %vm6804_vm2, %v881_v25, %v877_v35  ;;  %v1454_v55 = vsel %vm1436_vm7, %v1452_v54, %v9818_v28  ;;  %v1622_v11 = vmax.f32 %v1290_v16, %v1452_v54  ;;  %v1756_v29 = vrot.slane %v1619_v5, 7 }
 0x154   : > { %9988 = vst [vmem:[#allocation32_spill] sm:$0xff] %v6859_v21  ;;  %v6868_v34 = vmul.f32 %v882_v48, %v6674_v6  ;;  %v1623_v52 = vmax.f32 %v6829_v13, %v1454_v55  ;;  %v1625_v62 = vmax.f32 %v1294_v17, %v9990_v1  ;;  %v6875_v35 = vrot.slane %v1620_v38, 7 }
 0x155   : > { %1260 = vst.msk [vmem:[#allocation2 + $0x148] sm:$0xff] %vm1156_vm1, %v6859_v21  ;;  %v2442_v25 = vrot.slane %v6818_v63, 4  ;;  %v9991_v6 = vrot.slane %v6431_v15, 6  ;;  %v9992_v55 = vrot.slane %v6429_v14, 6  ;;  %v1761_v20 = vrot.slane %v1622_v11, 7 }
 0x156   : > { %9989 = vst [vmem:[#allocation33_spill] sm:$0xff] %v6868_v34  ;;  %v6886_v22 = vrot.slane %v1623_v52, 7  ;;  %v1766_v8 = vrot.slane %v1625_v62, 7  ;;  %v1758_v54 = vsel %vm1745_vm10, %v1756_v29, %v6875_v35  ;;  %v2447_v24 = vrot.slane %v6829_v13, 4 }
 0x157   : > { %1261 = vst.msk [vmem:[#allocation2 + $0x150] sm:$0xff] %vm1156_vm1, %v6868_v34  ;;  %v3340_v56 = vsel %vm2740_vm6, %v9992_v55, %v9991_v6  ;;  %v9816_v5 = vrot.slane %v6831_v60, 4  ;;  %v5448_v48 = vpop.eup %5447  ;;  %v2765_v1 = vsel %vm2740_vm6, %v6778_v44, %v6780_v41  ;;  %v2444_v62 = vsel %vm2431_vm14, %v2442_v25, %v9817_v0 }
 0x158   : > { %v1763_v11 = vsel %vm1745_vm10, %v1761_v20, %v6886_v22  ;;  %v1768_v52 = vsel %vm1745_vm10, %v1766_v8, %v6493_v7  ;;  %v3505_v29 = vmax.f32 %v6429_v14, %v3340_v56  ;;  %v6904_v6 = vadd.f32 1.0, %v5448_v48  ;;  %v1309_v14 = vld [vmem:[#allocation2 + $0xf8] sm:$0xff] }
 0x159   : > { %v6907_v55 = vmax.f32 %v6829_v13, %v1763_v11  ;;  %v2449_v41 = vsel %vm2431_vm14, %v2447_v24, %v9816_v5  ;;  %v6914_v38 = vmax.f32 %v6818_v63, %v1758_v54  ;;  %v6917_v7 = vmax.f32 %v6419_v3, %v1768_v52 }
 0x15a   : > { %v6919_v8 = vmax.f32 %v1286_v10, %v2442_v25  ;;  %v6922_v56 = vmax.f32 %v6550_v39, %v2765_v1  ;;  %5449 = vrcp.f32 %v6904_v6  ;;  %v2615_v48 = vmax.f32 %v6818_v63, %v2444_v62 }
 0x15b   : > { %v6926_v11 = vmax.f32 %v1290_v16, %v2447_v24  ;;  %v6930_v20 = vmax.f32 %v6541_v18, %v6627_v47  ;;  %v6934_v54 = vmax.f32 %v6740_v42, %v6763_v59  ;;  %v1944_v10 = vmax.f32 %v6914_v38, %v6907_v55 }
 0x15c   : > { %9993 = vst [vmem:[#allocation34_spill] sm:$0xff] %v6922_v56  ;;  %v2618_v25 = vmax.f32 %v6829_v13, %v2449_v41  ;;  %v6941_v1 = vmax.f32 %v6717_v61, %v6767_v37  ;;  %v6944_v16 = vrot.slane %v3505_v29, 5  ;;  %v1475_v24 = vrot.slane %v1309_v14, 2  ;;  %v471_v13 = vpop.f32.mrf.mxu0  ;;  %v6953_v41 = vld [vmem:[#allocation2 + $0x58] sm:$0xff]  ;;  %v5649_v56 = vld [vmem:[#allocation2 + $0x80] sm:$0xff] }
 0x15d   : > { %9994 = vst [vmem:[#allocation35_spill] sm:$0xff] %v6930_v20  ;;  %v893_v47 = vand.u32 2147483647, %v6904_v6  ;;  %v1976_v52 = vmax.f32 %v1944_v10, %v6917_v7  ;;  %v9997_v59 = vrot.slane %v6419_v3, 4  ;;  %v2751_v5 = vrot.slane %v6919_v8, 6  ;;  %v6955_v37 = vld [vmem:[#allocation2 + $0x78] sm:$0xff] }
 0x15e   : > { %9995 = vst [vmem:[#allocation36_spill] sm:$0xff] %v6934_v54  ;;  %v895_v63 = vand.u32 2147483648, %v6904_v6  ;;  %v2752_v29 = vrot.slane %v2615_v48, 6  ;;  %v9998_v28 = vrot.slane %v6676_v9, 2  ;;  %vm889_vm11 = vweird.f32 %v6904_v6 }
 0x15f   : > { %9996 = vst [vmem:[#allocation37_spill] sm:$0xff] %v6941_v1  ;;  %v6950_v62 = vmax.f32 %v1294_v17, %v9997_v59  ;;  %5140 = vmatmul.msk.f32.vlgmr.msrb.gmra.mxu0 %vm1156_vm1, %v1976_v52  ;;  %v6964_v3 = vrot.slane %v2618_v25, 6  ;;  %v2470_v8 = vrot.slane %v1309_v14, 4  ;;  %v3351_v59 = vrot.slane %v1309_v14, 6 }
 0x160   : > { %v1476_v10 = vsel %vm1436_vm7, %v9998_v28, %v1475_v24  ;;  %v5450_v34 = vpop.eup %5449  ;;  %v1951_v48 = vmax.f32 %v6541_v18, %v6580_v50  ;;  %v6970_v0 = vadd.f32 %v6661_v33, %v471_v13  ;;  %v1450_v21 = vrot.slane %v6953_v41, 2 }
 0x161   : > { %v1636_v17 = vmax.f32 %v6676_v9, %v1476_v10  ;;  %v1455_v28 = vrot.slane %v6955_v37, 2  ;;  %v885_v24 = vmul.f32 %v5450_v34, %v6904_v6  ;;  %v9999_v25 = vrot.slane %v6676_v9, 4 }
 0x162   : > { %v2445_v14 = vrot.slane %v6953_v41, 4  ;;  %v6983_v13 = vsel %vm2740_vm6, %v10000_v30, %v3351_v59  ;;  %v5125_v43 = vmul.f32 -1.442695, %v6970_v0  ;;  %v10002_v46 = vrot.slane %v6820_v40, 2 }
 0x163   : > { %v1784_v52 = vrot.slane %v1636_v17, 7  ;;  %v2471_v10 = vsel %vm2431_vm14, %v9999_v25, %v2470_v8  ;;  %10001 = vst [vmem:[#allocation38_spill] sm:$0xff] %v6983_v13  ;;  %v886_v17 = vsub.f32 1.0, %v885_v24  ;;  %v10003_v25 = vrot.slane %v6831_v60, 2 }
 0x164   : > { %v2631_v32 = vmax.f32 %v6676_v9, %v2471_v10  ;;  %v1451_v49 = vsel %vm1436_vm7, %v10002_v46, %v1450_v21  ;;  %5451 = vpow2.f32 %v5125_v43  ;;  %vm890_vm12 = vweird.f32 %v5450_v34 }
 0x165   : > { %v1785_v31 = vsel %vm1745_vm10, %v6714_v19, %v1784_v52  ;;  %v1456_v10 = vsel %vm1436_vm7, %v10003_v25, %v1455_v28  ;;  %v1621_v36 = vmax.f32 %v6820_v40, %v1451_v49  ;;  %v887_v20 = vmul.f32 %v5450_v34, %v886_v17  ;;  %vm891_vm15 = vmor %vm889_vm11, %vm890_vm12  ;;  %v7019_v25 = vld [vmem:[#allocation2 + $0x110] sm:$0xff] }
 0x166   : > { %v6997_v30 = vmax.f32 %v6676_v9, %v1785_v31  ;;  %v2779_v59 = vrot.slane %v2631_v32, 6  ;;  %v1624_v46 = vmax.f32 %v6831_v60, %v1456_v10  ;;  %v10004_v19 = vrot.slane %v6820_v40, 4  ;;  %v7008_v32 = vld [vmem:[#allocation2 + $0x108] sm:$0xff]  ;;  %10006 = vst [vmem:[#allocation40_spill] sm:$0xff] %v7019_v25 }
 0x167   : > { %v1759_v52 = vrot.slane %v1621_v36, 7  ;;  %v888_v43 = vadd.f32 %v5450_v34, %v887_v20  ;;  %vm894_vm13 = vcmp.eq.f32.partialorder %v893_v47, 8.507059e+37  ;;  %v1477_v6 = vrot.slane %v7008_v32, 2 }
 0x168   : > { %v2446_v21 = vsel %vm2431_vm14, %v10004_v19, %v2445_v14  ;;  %v1983_v24 = vmax.f32 %v1951_v48, %v6997_v30  ;;  %v2780_v28 = vsel %vm2740_vm6, %v6773_v27, %v2779_v59  ;;  %v1764_v17 = vrot.slane %v1624_v46, 7  ;;  %v1310_v19 = vld [vmem:[#allocation2 + $0x100] sm:$0xff] }
 0x169   : > { %v2616_v31 = vmax.f32 %v6820_v40, %v2446_v21  ;;  %v7011_v49 = vmax.f32 %v6997_v30, %v2780_v28  ;;  %v896_v14 = vor.u32 1.1754944e-38, %v895_v63  ;;  %v2761_v48 = vrot.slane %v6950_v62, 6  ;;  %v474_v21 = vpop.f32.mrf.mxu0 }
 0x16a   : > { %5147 = vmatmul.msk.f32.gmra.mxu1 %vm1156_vm1, %v1983_v24  ;;  %v1760_v27 = vsel %vm1745_vm10, %v6875_v35, %v1759_v52  ;;  %v892_v20 = vsel %vm891_vm15, %v5450_v34, %v888_v43  ;;  %v1765_v47 = vsel %vm1745_vm10, %v6886_v22, %v1764_v17  ;;  %v5452_v59 = vpop.eup %5451  ;;  %v2753_v62 = vsel %vm2740_vm6, %v2751_v5, %v2752_v29  ;;  %v1313_v17 = vld [vmem:[#allocation2 + $0x118] sm:$0xff] }
 0x16b   : > { %10005 = vst [vmem:[#allocation39_spill] sm:$0xff] %v7011_v49  ;;  %v2754_v36 = vrot.slane %v2616_v31, 6  ;;  %v1905_v10 = vmax.f32 %v6820_v40, %v1760_v27  ;;  %v897_v63 = vsel %vm894_vm13, %v896_v14, %v892_v20  ;;  %v7027_v46 = vmax.f32 %v6831_v60, %v1765_v47 }
 0x16c   : > { %v7031_v34 = vmul.f32 %v897_v63, %v6827_v58  ;;  %v7033_v24 = vadd.f32 1.0, %v5452_v59  ;;  %v1478_v40 = vrot.slane %v7019_v25, 2  ;;  %v7040_v28 = vmax.f32 %v6941_v1, %v6835_v23 }
 0x16d   : > { %v2755_v35 = vsel %vm2740_vm6, %v2752_v29, %v2754_v36  ;;  %v10009_v5 = vrot.slane %v6926_v11, 6  ;;  %v7048_v52 = vsel %vm2740_vm6, %v2761_v48, %v6778_v44  ;;  %v1945_v58 = vmax.f32 %v1905_v10, %v7027_v46 }
 0x16e   : > { %10007 = vst [vmem:[#allocation41_spill] sm:$0xff] %v7031_v34  ;;  %v7035_v22 = vmax.f32 %v1905_v10, %v2755_v35  ;;  %v7054_v31 = vmax.f32 %v6914_v38, %v2753_v62  ;;  %5453 = vrcp.f32 %v7033_v24  ;;  %v1637_v11 = vmax.f32 %v1310_v19, %v1477_v6 }
 0x16f   : > { %v2758_v29 = vsel %vm2740_vm6, %v10009_v5, %v6964_v3  ;;  %1262 = vst.msk [vmem:[#allocation2 + $0x168] sm:$0xff] %vm1156_vm1, %v7031_v34  ;;  %v1977_v43 = vmax.f32 %v1945_v58, %v6550_v39  ;;  %v1479_v44 = vsel %vm1436_vm7, %v1477_v6, %v1478_v40  ;;  %v1952_v14 = vmax.f32 %v6717_v61, %v6748_v57 }
 0x170   : > { %10008 = vst [vmem:[#allocation42_spill] sm:$0xff] %v7035_v22  ;;  %v7057_v23 = vmax.f32 %v6907_v55, %v2758_v29  ;;  %v908_v48 = vand.u32 2147483647, %v7033_v24  ;;  %v910_v38 = vand.u32 2147483648, %v7033_v24  ;;  %v1638_v27 = vmax.f32 %v7008_v32, %v1479_v44 }
 0x171   : > { %10010 = vst [vmem:[#allocation43_spill] sm:$0xff] %v7054_v31  ;;  %v2472_v36 = vrot.slane %v7008_v32, 4  ;;  %5141 = vmatmul.msk.f32.gmra.mxu0 %vm1156_vm1, %v1977_v43  ;;  %v2473_v20 = vrot.slane %v7019_v25, 4  ;;  %v3353_v47 = vrot.slane %v7008_v32, 6  ;;  %v3354_v10 = vrot.slane %v7019_v25, 6 }
 0x172   : > { %10011 = vst [vmem:[#allocation44_spill] sm:$0xff] %v7057_v23  ;;  %v7074_v6 = vadd.f32 %v6661_v33, %v474_v21  ;;  %v1786_v59 = vrot.slane %v1637_v11, 7  ;;  %v1787_v63 = vrot.slane %v1638_v27, 7  ;;  %v1946_v35 = vmax.f32 %v6907_v55, %v6917_v7 }
 0x173   : > { %v2632_v62 = vmax.f32 %v1310_v19, %v2472_v36  ;;  %vm904_vm2 = vweird.f32 %v7033_v24  ;;  %v2474_v5 = vsel %vm2431_vm14, %v2472_v36, %v2473_v20  ;;  %v3355_v29 = vsel %vm2740_vm6, %v3353_v47, %v3354_v10 }
 0x174   : > { %v3513_v58 = vmax.f32 %v1310_v19, %v3353_v47  ;;  %v5126_v43 = vmul.f32 -1.442695, %v7074_v6  ;;  %v5454_v44 = vpop.eup %5453  ;;  %v1788_v8 = vsel %vm1745_vm10, %v1786_v59, %v1787_v63  ;;  %v2633_v21 = vmax.f32 %v7008_v32, %v2474_v5  ;;  %v477_v47 = vpop.f32.mrf.mxu0 }
 0x175   : > { %v2781_v11 = vrot.slane %v2632_v62, 6  ;;  %v3514_v27 = vmax.f32 %v7008_v32, %v3355_v29  ;;  %v900_v55 = vmul.f32 %v5454_v44, %v7033_v24  ;;  %vm905_vm4 = vweird.f32 %v5454_v44 }
 0x176   : > { %vm7086_vm5 = vcmp.eq.f32.partialorder %v908_v48, 8.507059e+37  ;;  %v7091_v19 = vmax.f32 %v7008_v32, %v1788_v8  ;;  %v3662_v36 = vrot.slane %v3513_v58, 5  ;;  %v2782_v1 = vrot.slane %v2633_v21, 6  ;;  %v7105_v58 = vld [vmem:[#allocation2 + $0x128] sm:$0xff]  ;;  %v7113_v21 = vld [vmem:[#allocation2 + $0x130] sm:$0xff]  ;;  %vm906_vm8 = vmor %vm904_vm2, %vm905_vm4 }
 0x177   : > { %v7093_v59 = vrot.slane %v3514_v27, 5  ;;  %5455 = vpow2.f32 %v5126_v43  ;;  %v1978_v62 = vmax.f32 %v1946_v35, %v6740_v42  ;;  %v901_v5 = vsub.f32 1.0, %v900_v55  ;;  %10017 = vst [vmem:[#allocation48_spill] sm:$0xff] %v7113_v21 }
 0x178   : > { %v1984_v29 = vmax.f32 %v1952_v14, %v7091_v19  ;;  %v1480_v49 = vrot.slane %v1313_v17, 2  ;;  %v2475_v13 = vrot.slane %v1313_v17, 4  ;;  %v2783_v48 = vsel %vm2740_vm6, %v2781_v11, %v2782_v1 }
 0x179   : > { %10014 = vst [vmem:[#allocation45_spill] sm:$0xff] %v7093_v59  ;;  %v7100_v9 = vsel %vm3621_vm3, %v3662_v36, %v7093_v59  ;;  %v3356_v8 = vrot.slane %v1313_v17, 6  ;;  %v7103_v32 = vadd.f32 %v6661_v33, %v477_v47  ;;  %v902_v43 = vmul.f32 %v5454_v44, %v901_v5  ;;  %5142 = vmatmul.msk.f32.gmra.mxu0 %vm1156_vm1, %v1978_v62  ;;  %v7122_v47 = vld [vmem:[#allocation2 + $0x120] sm:$0xff] }
 0x17a   : > { %10015 = vst [vmem:[#allocation46_spill] sm:$0xff] %v7100_v9  ;;  %5148 = vmatmul.msk.f32.gmra.mxu1 %vm1156_vm1, %v1984_v29  ;;  %v7109_v35 = vmax.f32 %v7091_v19, %v2783_v48  ;;  %v1481_v14 = vsel %vm1436_vm7, %v1478_v40, %v1480_v49  ;;  %v1482_v11 = vrot.slane %v7105_v58, 2  ;;  %v2476_v27 = vsel %vm2431_vm14, %v2473_v20, %v2475_v13 }
 0x17b   : > { %v1639_v17 = vmax.f32 %v7019_v25, %v1481_v14  ;;  %v7119_v55 = vsel %vm2740_vm6, %v3354_v10, %v3356_v8  ;;  %v5127_v36 = vmul.f32 -1.442695, %v7103_v32  ;;  %v903_v5 = vadd.f32 %v5454_v44, %v902_v43 }
 0x17c   : > { %10016 = vst [vmem:[#allocation47_spill] sm:$0xff] %v7109_v35  ;;  %v911_v29 = vor.u32 1.1754944e-38, %v910_v38  ;;  %v2634_v62 = vmax.f32 %v7019_v25, %v2476_v27  ;;  %v1947_v20 = vmax.f32 %v7027_v46, %v6550_v39  ;;  %v9835_v10 = vrot.slane %v7113_v21, 2  ;;  %v7578_v35 = vld [vmem:[#allocation2 + $0x90] sm:$0xff] }
 0x17d   : > { %10018 = vst [vmem:[#allocation49_spill] sm:$0xff] %v7119_v55  ;;  %v5456_v40 = vpop.eup %5455  ;;  %v1789_v13 = vrot.slane %v1639_v17, 7  ;;  %5457 = vpow2.f32 %v5127_v36  ;;  %v907_v48 = vsel %vm906_vm8, %v5454_v44, %v903_v5  ;;  %v1640_v43 = vmax.f32 %v7122_v47, %v1482_v11 }
 0x17e   : > { %v7133_v8 = vadd.f32 1.0, %v5456_v40  ;;  %v2784_v38 = vrot.slane %v2634_v62, 6  ;;  %v7138_v14 = vmax.f32 %v6917_v7, %v7048_v52  ;;  %v912_v24 = vsel %vm7086_vm5, %v911_v29, %v907_v48 }
 0x17f   : > { %v1790_v17 = vsel %vm1745_vm10, %v1787_v63, %v1789_v13  ;;  %v1484_v39 = vsel %vm1436_vm7, %v1482_v11, %v9835_v10  ;;  %v7147_v44 = vmul.f32 %v912_v24, %v6970_v0  ;;  %v10021_v27 = vrot.slane %v6955_v37, 4  ;;  %v480_v37 = vpop.f32.mrf.mxu0 }
 0x180   : > { %10019 = vst [vmem:[#allocation50_spill] sm:$0xff] %v7138_v14  ;;  %v10022_v36 = vrot.slane %v6831_v60, 4  ;;  %5459 = vrcp.f32 %v7133_v8  ;;  %v1979_v34 = vmax.f32 %v1947_v20, %v6541_v18  ;;  %v7159_v52 = vmax.f32 %v7019_v25, %v1790_v17 }
 0x181   : > { %10020 = vst [vmem:[#allocation51_spill] sm:$0xff] %v7147_v44  ;;  %v1953_v63 = vmax.f32 %v6580_v50, %v6997_v30  ;;  %v2785_v0 = vsel %vm2740_vm6, %v2782_v1, %v2784_v38  ;;  %v1641_v11 = vmax.f32 %v7105_v58, %v1484_v39  ;;  %v923_v29 = vand.u32 2147483647, %v7133_v8 }
 0x182   : > { %v7154_v5 = vsel %vm2431_vm14, %v10022_v36, %v10021_v27  ;;  %1263 = vst.msk [vmem:[#allocation2 + $0x170] sm:$0xff] %vm1156_vm1, %v7147_v44  ;;  %5143 = vmatmul.msk.f32.gmra.mxu0 %vm1156_vm1, %v1979_v34  ;;  %v1791_v62 = vrot.slane %v1640_v43, 7  ;;  %v2477_v18 = vrot.slane %v7105_v58, 4  ;;  %v9834_v40 = vrot.slane %v7113_v21, 4 }
 0x183   : > { %v5458_v13 = vpop.eup %5457  ;;  %v925_v20 = vand.u32 2147483648, %v7133_v8  ;;  %v1985_v1 = vmax.f32 %v1953_v63, %v7159_v52  ;;  %v7174_v48 = vmax.f32 %v7159_v52, %v2785_v0  ;;  %v7176_v38 = vrot.slane %v1641_v11, 7 }
 0x184   : > { %v7180_v17 = vadd.f32 1.0, %v5458_v13  ;;  %v2479_v43 = vsel %vm2431_vm14, %v2477_v18, %v9834_v40  ;;  %v2635_v39 = vmax.f32 %v7122_v47, %v2477_v18  ;;  %v3358_v34 = vrot.slane %v7105_v58, 6  ;;  %v1317_v40 = vld [vmem:[#allocation2 + $0x138] sm:$0xff] }
 0x185   : > { %10023 = vst [vmem:[#allocation52_spill] sm:$0xff] %v7174_v48  ;;  %5149 = vmatmul.msk.f32.gmra.mxu1 %vm1156_vm1, %v1985_v1  ;;  %v1793_v27 = vsel %vm1745_vm10, %v1791_v62, %v7176_v38  ;;  %v2636_v36 = vmax.f32 %v7105_v58, %v2479_v43  ;;  %v3359_v63 = vrot.slane %v7113_v21, 6  ;;  %vm919_vm9 = vweird.f32 %v7133_v8 }
 0x186   : > { %v5460_v0 = vpop.eup %5459  ;;  %5461 = vrcp.f32 %v7180_v17  ;;  %v7196_v18 = vadd.f32 %v6661_v33, %v480_v37  ;;  %vm7199_vm11 = vcmp.eq.f32.partialorder %v923_v29, 8.507059e+37  ;;  %v926_v1 = vor.u32 1.1754944e-38, %v925_v20 }
 0x187   : > { %v915_v13 = vmul.f32 %v5460_v0, %v7133_v8  ;;  %v7204_v43 = vmax.f32 %v7105_v58, %v1793_v27  ;;  %v1954_v49 = vmax.f32 %v6748_v57, %v7091_v19  ;;  %vm920_vm12 = vweird.f32 %v5460_v0 }
 0x188   : > { %v2786_v11 = vrot.slane %v2635_v39, 6  ;;  %v7208_v24 = vrot.slane %v2636_v36, 6  ;;  %v3360_v37 = vsel %vm2740_vm6, %v3358_v34, %v3359_v63  ;;  %v3516_v44 = vmax.f32 %v7122_v47, %v3358_v34  ;;  %vm921_vm15 = vmor %vm919_vm9, %vm920_vm12 }
 0x189   : > { %v916_v10 = vsub.f32 1.0, %v915_v13  ;;  %v1986_v29 = vmax.f32 %v1954_v49, %v7204_v43  ;;  %v3517_v20 = vmax.f32 %v7105_v58, %v3360_v37  ;;  %v5128_v48 = vmul.f32 -1.442695, %v7196_v18  ;;  %v483_v49 = vpop.f32.mrf.mxu0 }
 0x18a   : > { %v2788_v27 = vsel %vm2740_vm6, %v2786_v11, %v7208_v24  ;;  %v1948_v57 = vmax.f32 %v6917_v7, %v6740_v42  ;;  %v1485_v39 = vrot.slane %v1317_v40, 2  ;;  %v3667_v13 = vrot.slane %v3516_v44, 5 }
 0x18b   : > { %v917_v36 = vmul.f32 %v5460_v0, %v916_v10  ;;  %v7220_v59 = vmax.f32 %v7204_v43, %v2788_v27  ;;  %v7222_v55 = vrot.slane %v3517_v20, 5  ;;  %vm934_vm13 = vweird.f32 %v7180_v17 }
 0x18c   : > { %v5462_v47 = vpop.eup %5461  ;;  %5463 = vpow2.f32 %v5128_v48  ;;  %v1980_v58 = vmax.f32 %v1948_v57, %v6717_v61  ;;  %v10028_v34 = vrot.slane %v7113_v21, 2  ;;  %v938_v10 = vand.u32 2147483647, %v7180_v17 }
 0x18d   : > { %10026 = vst [vmem:[#allocation53_spill] sm:$0xff] %v7220_v59  ;;  %v918_v42 = vadd.f32 %v5460_v0, %v917_v36  ;;  %v930_v7 = vmul.f32 %v5462_v47, %v7180_v17  ;;  %5150 = vmatmul.msk.f32.gmra.mxu1 %vm1156_vm1, %v1986_v29  ;;  %v7234_v44 = vsel %vm3621_vm3, %v3667_v13, %v7222_v55  ;;  %v2480_v48 = vrot.slane %v1317_v40, 4 }
 0x18e   : > { %10027 = vst [vmem:[#allocation54_spill] sm:$0xff] %v7222_v55  ;;  %v1486_v11 = vsel %vm1436_vm7, %v10028_v34, %v1485_v39  ;;  %5144 = vmatmul.msk.f32.gmra.mxu0 %vm1156_vm1, %v1980_v58  ;;  %v3361_v37 = vrot.slane %v1317_v40, 6  ;;  %v7242_v20 = vadd.f32 %v6661_v33, %v483_v49  ;;  %vm935_vm2 = vweird.f32 %v5462_v47  ;;  %v7253_v40 = vld [vmem:[#allocation2 + $0x148] sm:$0xff]  ;;  %v7255_v49 = vld [vmem:[#allocation2 + $0x150] sm:$0xff] }
 0x18f   : > { %10029 = vst [vmem:[#allocation55_spill] sm:$0xff] %v7234_v44  ;;  %v1642_v61 = vmax.f32 %v7113_v21, %v1486_v11  ;;  %v922_v27 = vsel %vm921_vm15, %v5460_v0, %v918_v42  ;;  %v931_v57 = vsub.f32 1.0, %v930_v7  ;;  %v940_v29 = vand.u32 2147483648, %v7180_v17  ;;  %v1318_v7 = vld [vmem:[#allocation2 + $0x140] sm:$0xff]  ;;  %vm936_vm4 = vmor %vm934_vm13, %vm935_vm2 }
 0x190   : > { %v927_v39 = vsel %vm7199_vm11, %v926_v1, %v922_v27  ;;  %v10030_v8 = vrot.slane %v7113_v21, 4  ;;  %v7251_v58 = vsel %vm2740_vm6, %v3359_v63, %v3361_v37  ;;  %10032 = vst [vmem:[#allocation57_spill] sm:$0xff] %v7255_v49  ;;  %v5129_v63 = vmul.f32 -1.442695, %v7242_v20 }
 0x191   : > { %v1794_v36 = vrot.slane %v1642_v61, 7  ;;  %10031 = vst [vmem:[#allocation56_spill] sm:$0xff] %v7251_v58  ;;  %v7258_v0 = vmul.f32 %v927_v39, %v7074_v6  ;;  %v932_v34 = vmul.f32 %v5462_v47, %v931_v57  ;;  %v1487_v61 = vrot.slane %v7253_v40, 2 }
 0x192   : > { %v2481_v13 = vsel %vm2431_vm14, %v10030_v8, %v2480_v48  ;;  %v5464_v1 = vpop.eup %5463  ;;  %v9840_v48 = vrot.slane %v7255_v49, 2  ;;  %v1955_v39 = vmax.f32 %v6997_v30, %v7159_v52  ;;  %5465 = vpow2.f32 %v5129_v63  ;;  %v7283_v8 = vld [vmem:[#allocation2 + $0x8] sm:$0xff] }
 0x193   : > { %10033 = vst [vmem:[#allocation58_spill] sm:$0xff] %v7258_v0  ;;  %v2637_v11 = vmax.f32 %v7113_v21, %v2481_v13  ;;  %v1795_v42 = vsel %vm1745_vm10, %v7176_v38, %v1794_v36  ;;  %v933_v6 = vadd.f32 %v5462_v47, %v932_v34  ;;  %v7270_v37 = vadd.f32 1.0, %v5464_v1 }
 0x194   : > { %1264 = vst.msk [vmem:[#allocation2 + $0x188] sm:$0xff] %vm1156_vm1, %v7258_v0  ;;  %v7273_v27 = vmax.f32 %v7113_v21, %v1795_v42  ;;  %v941_v38 = vor.u32 1.1754944e-38, %v940_v29  ;;  %v1489_v36 = vsel %vm1436_vm7, %v1487_v61, %v9840_v48  ;;  %vm939_vm5 = vcmp.eq.f32.partialorder %v938_v10, 8.507059e+37  ;;  %v486_v42 = vpop.f32.mrf.mxu0  ;;  %v4016_v0 = vld [vmem:[#allocation6 + $0x78] sm:$0xff] }
 0x195   : > { %v2789_v57 = vrot.slane %v2637_v11, 6  ;;  %v937_v13 = vsel %vm936_vm4, %v5462_v47, %v933_v6  ;;  %5467 = vrcp.f32 %v7270_v37  ;;  %v1643_v34 = vmax.f32 %v1318_v7, %v1487_v61  ;;  %v7301_v61 = vld [vmem:[#allocation2 + $0x10] sm:$0xff]  ;;  %4125 = vmatpush.msrb.mxu1 %v4016_v0 }
 0x196   : > { %v10034_v17 = vmax.f32 %v6831_v60, %v7154_v5  ;;  %v942_v29 = vsel %vm939_vm5, %v941_v38, %v937_v13  ;;  %v1987_v30 = vmax.f32 %v1955_v39, %v7273_v27  ;;  %v1644_v10 = vmax.f32 %v7253_v40, %v1489_v36 }
 0x197   : > { %v2790_v1 = vsel %vm2740_vm6, %v7208_v24, %v2789_v57  ;;  %v7295_v63 = vmul.f32 %v942_v29, %v7103_v32  ;;  %v953_v5 = vand.u32 2147483647, %v7270_v37  ;;  %v955_v6 = vand.u32 2147483648, %v7270_v37 }
 0x198   : > { %v7289_v11 = vrot.slane %v10034_v17, 6  ;;  %v7298_v47 = vmax.f32 %v7273_v27, %v2790_v1  ;;  %5151 = vmatmul.msk.f32.gmra.mxu1 %vm1156_vm1, %v1987_v30  ;;  %v2482_v24 = vrot.slane %v7253_v40, 4  ;;  %v2483_v32 = vrot.slane %v7255_v49, 4  ;;  %v5466_v13 = vpop.eup %5465  ;;  %v1321_v1 = vld [vmem:[#allocation2 + $0x158] sm:$0xff] }
 0x199   : > { %10035 = vst [vmem:[#allocation59_spill] sm:$0xff] %v7295_v63  ;;  %v1796_v57 = vrot.slane %v1643_v34, 7  ;;  %v7311_v38 = vrot.slane %v1644_v10, 7  ;;  %v3363_v39 = vrot.slane %v7253_v40, 6  ;;  %v3364_v36 = vrot.slane %v7255_v49, 6 }
 0x19a   : > { %10036 = vst [vmem:[#allocation60_spill] sm:$0xff] %v7298_v47  ;;  %v2484_v17 = vsel %vm2431_vm14, %v2482_v24, %v2483_v32  ;;  %v2638_v29 = vmax.f32 %v1318_v7, %v2482_v24  ;;  %v7317_v30 = vadd.f32 %v6661_v33, %v486_v42  ;;  %v7320_v48 = vadd.f32 1.0, %v5466_v13  ;;  %v7333_v42 = vld [vmem:[#allocation2 + $0x28] sm:$0xff]  ;;  %v4013_v13 = vld [vmem:[#allocation6 + $0x60] sm:$0xff] }
 0x19b   : > { %1265 = vst.msk [vmem:[#allocation2 + $0x190] sm:$0xff] %vm1156_vm1, %v7295_v63  ;;  %v5468_v62 = vpop.eup %5467  ;;  %v1798_v34 = vsel %vm1745_vm10, %v1796_v57, %v7311_v38  ;;  %v2639_v10 = vmax.f32 %v7253_v40, %v2484_v17  ;;  %v3365_v60 = vsel %vm2740_vm6, %v3363_v39, %v3364_v36  ;;  %vm949_vm8 = vweird.f32 %v7270_v37 }
 0x19c   : > { %v945_v63 = vmul.f32 %v5468_v62, %v7270_v37  ;;  %v7329_v24 = vmax.f32 %v7253_v40, %v1798_v34  ;;  %v1956_v33 = vmax.f32 %v7091_v19, %v7204_v43  ;;  %vm7335_vm9 = vcmp.eq.f32.partialorder %v953_v5, 8.507059e+37 }
 0x19d   : > { %v956_v57 = vor.u32 1.1754944e-38, %v955_v6  ;;  %5469 = vrcp.f32 %v7320_v48  ;;  %v2791_v17 = vrot.slane %v2638_v29, 6  ;;  %v2792_v34 = vrot.slane %v2639_v10, 6 }
 0x19e   : > { %10037 = vst [vmem:[#allocation61_spill] sm:$0xff] %v7329_v24  ;;  %v946_v47 = vsub.f32 1.0, %v945_v63  ;;  %v1988_v55 = vmax.f32 %v1956_v33, %v7329_v24  ;;  %v3519_v58 = vmax.f32 %v1318_v7, %v3363_v39  ;;  %v3520_v19 = vmax.f32 %v7253_v40, %v3365_v60  ;;  %v489_v40 = vpop.f32.mrf.mxu0 }
 0x19f   : > { %v5130_v21 = vmul.f32 -1.442695, %v7317_v30  ;;  %v10040_v5 = vrot.slane %v7301_v61, 2  ;;  %v10041_v59 = vrot.slane %v7283_v8, 2  ;;  %vm950_vm11 = vweird.f32 %v5468_v62 }
 0x1a0   : > { %v947_v44 = vmul.f32 %v5468_v62, %v946_v47  ;;  %5152 = vmatmul.msk.f32.gmra.mxu1 %vm1156_vm1, %v1988_v55  ;;  %v7353_v7 = vsel %vm2740_vm6, %v2791_v17, %v2792_v34  ;;  %v1490_v0 = vrot.slane %v1321_v1, 2  ;;  %v968_v63 = vand.u32 2147483647, %v7320_v48  ;;  %vm951_vm12 = vmor %vm949_vm8, %vm950_vm11 }
 0x1a1   : > { %v7348_v6 = vsel %vm1436_vm7, %v10041_v59, %v10040_v5  ;;  %10042 = vst [vmem:[#allocation62_spill] sm:$0xff] %v7353_v7  ;;  %v3672_v60 = vrot.slane %v3519_v58, 5  ;;  %v7356_v39 = vrot.slane %v3520_v19, 5  ;;  %5471 = vpow2.f32 %v5130_v21  ;;  %v7372_v21 = vld [vmem:[%s9791_s2] ss:$0 sm:$0xff] }
 0x1a2   : > { %v948_v10 = vadd.f32 %v5468_v62, %v947_v44  ;;  %v10044_v59 = vrot.slane %v7255_v49, 2  ;;  %v2485_v47 = vrot.slane %v1321_v1, 4  ;;  %v3366_v5 = vrot.slane %v1321_v1, 6 }
 0x1a3   : > { %10043 = vst [vmem:[#allocation63_spill] sm:$0xff] %v7356_v39  ;;  %v5470_v29 = vpop.eup %5469  ;;  %v970_v55 = vand.u32 2147483648, %v7320_v48  ;;  %v7366_v17 = vsel %vm3621_vm3, %v3672_v60, %v7356_v39  ;;  %v7375_v44 = vadd.f32 %v7372_v21, %v489_v40  ;;  %v7385_v40 = vld [vmem:[#allocation2 + $0x168] sm:$0xff]  ;;  %vm964_vm15 = vweird.f32 %v7320_v48 }
 0x1a4   : > { %v1491_v33 = vsel %vm1436_vm7, %v10044_v59, %v1490_v0  ;;  %10045 = vst [vmem:[#allocation64_spill] sm:$0xff] %v7366_v17  ;;  %v952_v1 = vsel %vm951_vm12, %v5468_v62, %v948_v10  ;;  %v960_v37 = vmul.f32 %v5470_v29, %v7320_v48  ;;  %vm965_vm13 = vweird.f32 %v5470_v29  ;;  %v4015_v0 = vld [vmem:[#allocation6 + $0x70] sm:$0xff]  ;;  %v4014_v59 = vld [vmem:[#allocation6 + $0x68] sm:$0xff] }
 0x1a5   : > { %v1645_v58 = vmax.f32 %v7255_v49, %v1491_v33  ;;  %v2486_v19 = vsel %vm2431_vm14, %v2483_v32, %v2485_v47  ;;  %v957_v60 = vsel %vm7335_vm9, %v956_v57, %v952_v1  ;;  %v7383_v39 = vsel %vm2740_vm6, %v3364_v36, %v3366_v5  ;;  %4126 = vmatpush.msrb.mxu1 %v4015_v0  ;;  %v7393_v57 = vld [vmem:[#allocation2 + $0x160] sm:$0xff]  ;;  %v7408_v32 = vld [vmem:[#allocation2 + $0x30] sm:$0xff]  ;;  %vm966_vm4 = vmor %vm964_vm15, %vm965_vm13 }
 0x1a6   : > { %v2640_v17 = vmax.f32 %v7255_v49, %v2486_v19  ;;  %10046 = vst [vmem:[#allocation65_spill] sm:$0xff] %v7383_v39  ;;  %v7388_v62 = vmul.f32 %v957_v60, %v7196_v18  ;;  %v961_v10 = vsub.f32 1.0, %v960_v37  ;;  %v5131_v47 = vmul.f32 -1.442695, %v7375_v44 }
 0x1a7   : > { %v1799_v33 = vrot.slane %v1645_v58, 7  ;;  %v7395_v58 = vld [vmem:[#allocation2 + $0x170] sm:$0xff]  ;;  %v5472_v1 = vpop.eup %5471  ;;  %4127 = vmatpush.msrb.mxu1 %v4014_v59  ;;  %v1492_v18 = vrot.slane %v7385_v40, 2  ;;  %vm969_vm2 = vcmp.eq.f32.partialorder %v968_v63, 8.507059e+37  ;;  %v10055_v7 = vrot.slane %v7283_v8, 2 }
 0x1a8   : > { %10047 = vst [vmem:[#allocation66_spill] sm:$0xff] %v7388_v62  ;;  %v2794_v5 = vrot.slane %v2640_v17, 6  ;;  %v9849_v37 = vrot.slane %v7395_v58, 2  ;;  %v962_v19 = vmul.f32 %v5470_v29, %v961_v10  ;;  %v7403_v0 = vadd.f32 1.0, %v5472_v1 }
 0x1a9   : > { %v1800_v36 = vsel %vm1745_vm10, %v7311_v38, %v1799_v33  ;;  %1266 = vst.msk [vmem:[#allocation2 + $0x1a8] sm:$0xff] %vm1156_vm1, %v7388_v62  ;;  %5473 = vpow2.f32 %v5131_v47  ;;  %v1957_v38 = vmax.f32 %v7159_v52, %v7273_v27  ;;  %4128 = vmatpush.msrb.mxu1 %v4013_v13  ;;  %v1646_v33 = vmax.f32 %v7393_v57, %v1492_v18 }
 0x1aa   : > { %v7406_v60 = vmax.f32 %v7255_v49, %v1800_v36  ;;  %v7413_v17 = vsel %vm2740_vm6, %v2792_v34, %v2794_v5  ;;  %v1494_v59 = vsel %vm1436_vm7, %v1492_v18, %v9849_v37  ;;  %v963_v10 = vadd.f32 %v5470_v29, %v962_v19 }
 0x1ab   : > { %10048 = vst [vmem:[#allocation67_spill] sm:$0xff] %v7413_v17  ;;  %5475 = vrcp.f32 %v7403_v0  ;;  %v971_v47 = vor.u32 1.1754944e-38, %v970_v55  ;;  %v1647_v34 = vmax.f32 %v7385_v40, %v1494_v59  ;;  %v983_v36 = vand.u32 2147483647, %v7403_v0  ;;  %v7476_v17 = vld [vmem:[#allocation2 + $0x20] sm:$0xff] }
 0x1ac   : > { %v1989_v52 = vmax.f32 %v1957_v38, %v7406_v60  ;;  %v967_v1 = vsel %vm966_vm4, %v5470_v29, %v963_v10  ;;  %v985_v5 = vand.u32 2147483648, %v7403_v0  ;;  %v2487_v18 = vrot.slane %v7385_v40, 4 }
 0x1ad   : > { %v972_v48 = vsel %vm969_vm2, %v971_v47, %v967_v1  ;;  %v1801_v63 = vrot.slane %v1646_v33, 7  ;;  %v7429_v19 = vrot.slane %v1647_v34, 7  ;;  %v9850_v55 = vrot.slane %v7395_v58, 4 }
 0x1ae   : > { %5153 = vmatmul.msk.f32.gmra.mxu1 %vm1156_vm1, %v1989_v52  ;;  %v7433_v59 = vmul.f32 %v972_v48, %v7242_v20  ;;  %v2641_v29 = vmax.f32 %v7393_v57, %v2487_v18  ;;  %v3368_v10 = vrot.slane %v7385_v40, 6  ;;  %v9852_v37 = vrot.slane %v7395_v58, 6 }
 0x1af   : > { %v5474_v38 = vpop.eup %5473  ;;  %v1803_v47 = vsel %vm1745_vm10, %v1801_v63, %v7429_v19  ;;  %v1958_v33 = vmax.f32 %v7204_v43, %v7329_v24  ;;  %v2489_v52 = vsel %vm2431_vm14, %v2487_v18, %v9850_v55  ;;  %vm979_vm5 = vweird.f32 %v7403_v0  ;;  %v7457_v43 = vld [vmem:[#allocation2] sm:$0xff] }
 0x1b0   : > { %10049 = vst [vmem:[#allocation68_spill] sm:$0xff] %v7433_v59  ;;  %v7438_v13 = vadd.f32 1.0, %v5474_v38  ;;  %v7451_v34 = vmax.f32 %v7385_v40, %v1803_v47  ;;  %v2642_v1 = vmax.f32 %v7385_v40, %v2489_v52  ;;  %v3370_v48 = vsel %vm2740_vm6, %v3368_v10, %v9852_v37 }
 0x1b1   : > { %v5476_v20 = vpop.eup %5475  ;;  %1267 = vst.msk [vmem:[#allocation2 + $0x1b0] sm:$0xff] %vm1156_vm1, %v7433_v59  ;;  %vm7460_vm8 = vcmp.eq.f32.partialorder %v983_v36, 8.507059e+37  ;;  %v986_v38 = vor.u32 1.1754944e-38, %v985_v5  ;;  %v10053_v47 = vrot.slane %v7408_v32, 2  ;;  %v10054_v55 = vrot.slane %v7333_v42, 2 }
 0x1b2   : > { %10050 = vst [vmem:[#allocation69_spill] sm:$0xff] %v7451_v34  ;;  %v975_v63 = vmul.f32 %v5476_v20, %v7403_v0  ;;  %5477 = vrcp.f32 %v7438_v13  ;;  %v1000_v59 = vand.u32 2147483648, %v7438_v13  ;;  %v1990_v37 = vmax.f32 %v1958_v33, %v7451_v34 }
 0x1b3   : > { %v1444_v52 = vsel %vm1436_vm7, %v10054_v55, %v10053_v47  ;;  %v2796_v62 = vrot.slane %v2641_v29, 6  ;;  %v7472_v39 = vrot.slane %v2642_v1, 6  ;;  %v3522_v49 = vmax.f32 %v7393_v57, %v3368_v10 }
 0x1b4   : > { %v976_v36 = vsub.f32 1.0, %v975_v63  ;;  %v3523_v5 = vmax.f32 %v7385_v40, %v3370_v48  ;;  %v1613_v25 = vmax.f32 %v7457_v43, %v10055_v7  ;;  %vm980_vm9 = vweird.f32 %v5476_v20  ;;  %5154 = vmatmul.msk.f32.vlgmr.msra.gmra.mxu2 %vm1156_vm1, %v1990_v37 }
 0x1b5   : > { %v998_v55 = vand.u32 2147483647, %v7438_v13  ;;  %v7485_v29 = vsel %vm2740_vm6, %v2796_v62, %v7472_v39  ;;  %v1614_v57 = vmax.f32 %v7283_v8, %v7348_v6  ;;  %v1001_v40 = vor.u32 1.1754944e-38, %v1000_v59  ;;  %vm981_vm12 = vmor %vm979_vm5, %vm980_vm9 }
 0x1b6   : > { %10056 = vst [vmem:[#allocation70_spill] sm:$0xff] %v7485_v29  ;;  %v977_v10 = vmul.f32 %v5476_v20, %v976_v36  ;;  %v3677_v33 = vrot.slane %v3522_v49, 5  ;;  %v7489_v1 = vrot.slane %v3523_v5, 5  ;;  %vm994_vm11 = vweird.f32 %v7438_v13 }
 0x1b7   : > { %v10058_v7 = vrot.slane %v7333_v42, 2  ;;  %v1617_v37 = vmax.f32 %v7333_v42, %v1444_v52  ;;  %v1746_v63 = vrot.slane %v1613_v25, 7  ;;  %v7496_v47 = vrot.slane %v1614_v57, 7  ;;  %v7575_v25 = vld [vmem:[#allocation2 + $0x70] sm:$0xff] }
 0x1b8   : > { %10057 = vst [vmem:[#allocation71_spill] sm:$0xff] %v7489_v1  ;;  %v5478_v62 = vpop.eup %5477  ;;  %v978_v29 = vadd.f32 %v5476_v20, %v977_v10  ;;  %v7500_v6 = vsel %vm3621_vm3, %v3677_v33, %v7489_v1  ;;  %v2432_v49 = vrot.slane %v7283_v8, 4  ;;  %v9859_v59 = vrot.slane %v7301_v61, 4 }
 0x1b9   : > { %v1616_v48 = vmax.f32 %v7476_v17, %v10058_v7  ;;  %10059 = vst [vmem:[#allocation72_spill] sm:$0xff] %v7500_v6  ;;  %v990_v36 = vmul.f32 %v5478_v62, %v7438_v13  ;;  %vm995_vm13 = vweird.f32 %v5478_v62  ;;  %vm7508_vm15 = vcmp.eq.f32.partialorder %v998_v55, 8.507059e+37 }
 0x1ba   : > { %v1748_v52 = vsel %vm1745_vm10, %v1746_v63, %v7496_v47  ;;  %v982_v57 = vsel %vm981_vm12, %v5476_v20, %v978_v29  ;;  %v7514_v10 = vrot.slane %v1617_v37, 7  ;;  %v2434_v0 = vsel %vm2431_vm14, %v2432_v49, %v9859_v59  ;;  %vm996_vm2 = vmor %vm994_vm11, %vm995_vm13  ;;  %v7557_v59 = vld [vmem:[#allocation2 + $0x50] sm:$0xff] }
 0x1bb   : > { %v1751_v5 = vrot.slane %v1616_v48, 7  ;;  %v1900_v33 = vmax.f32 %v7283_v8, %v1748_v52  ;;  %v987_v7 = vsel %vm7460_vm8, %v986_v38, %v982_v57  ;;  %v991_v55 = vsub.f32 1.0, %v990_v36 }
 0x1bc   : > { %v2437_v1 = vrot.slane %v7333_v42, 4  ;;  %v9858_v6 = vrot.slane %v7408_v32, 4  ;;  %v7525_v63 = vmul.f32 %v987_v7, %v7317_v30  ;;  %v2608_v29 = vmax.f32 %v7457_v43, %v2432_v49 }
 0x1bd   : > { %v1753_v20 = vsel %vm1745_vm10, %v1751_v5, %v7514_v10  ;;  %v2609_v48 = vmax.f32 %v7283_v8, %v2434_v0  ;;  %v992_v37 = vmul.f32 %v5478_v62, %v991_v55  ;;  %v3313_v49 = vrot.slane %v7283_v8, 6 }
 0x1be   : > { %10062 = vst [vmem:[#allocation73_spill] sm:$0xff] %v7525_v63  ;;  %v1902_v52 = vmax.f32 %v7333_v42, %v1753_v20  ;;  %v2439_v18 = vsel %vm2431_vm14, %v2437_v1, %v9858_v6  ;;  %v2611_v38 = vmax.f32 %v7476_v17, %v2437_v1  ;;  %v2741_v36 = vrot.slane %v2608_v29, 6 }
 0x1bf   : > { %1268 = vst.msk [vmem:[#allocation2 + $0x1c8] sm:$0xff] %vm1156_vm1, %v7525_v63  ;;  %v2612_v30 = vmax.f32 %v7333_v42, %v2439_v18  ;;  %v7539_v5 = vrot.slane %v2609_v48, 6  ;;  %v993_v57 = vadd.f32 %v5478_v62, %v992_v37  ;;  %v9860_v7 = vrot.slane %v7301_v61, 6  ;;  %v5641_v48 = vld [vmem:[#allocation2 + $0x48] sm:$0xff] }
 0x1c0   : > { %v2746_v0 = vrot.slane %v2611_v38, 6  ;;  %v3318_v55 = vrot.slane %v7333_v42, 6  ;;  %v9863_v29 = vrot.slane %v7408_v32, 6  ;;  %v3323_v18 = vrot.slane %v5641_v48, 6 }
 0x1c1   : > { %v2743_v1 = vsel %vm2740_vm6, %v2741_v36, %v7539_v5  ;;  %v7549_v20 = vrot.slane %v2612_v30, 6  ;;  %v997_v6 = vsel %vm996_vm2, %v5478_v62, %v993_v57  ;;  %v3315_v38 = vsel %vm2740_vm6, %v3313_v49, %v9860_v7 }
 0x1c2   : > { %v7552_v37 = vmax.f32 %v1900_v33, %v2743_v1  ;;  %v9864_v13 = vrot.slane %v7557_v59, 6  ;;  %v1002_v36 = vsel %vm7508_vm15, %v1001_v40, %v997_v6  ;;  %v3320_v62 = vsel %vm2740_vm6, %v3318_v55, %v9863_v29  ;;  %v5643_v33 = vld [vmem:[#allocation2 + $0x68] sm:$0xff] }
 0x1c3   : > { %v2748_v30 = vsel %vm2740_vm6, %v2746_v0, %v7549_v20  ;;  %v3328_v57 = vrot.slane %v5643_v33, 6  ;;  %v7568_v1 = vmul.f32 %v1002_v36, %v7375_v44  ;;  %v9874_v40 = vrot.slane %v7575_v25, 6  ;;  %v5645_v6 = vld [vmem:[#allocation2 + $0x88] sm:$0xff] }
 0x1c4   : > { %v7570_v7 = vmax.f32 %v1902_v52, %v2748_v30  ;;  %v3325_v63 = vsel %vm2740_vm6, %v3323_v18, %v9864_v13  ;;  %v3333_v0 = vrot.slane %v5645_v6, 6  ;;  %v3334_v29 = vrot.slane %v7578_v35, 6  ;;  %v5647_v13 = vld [vmem:[#allocation2 + $0x40] sm:$0xff] }
 0x1c5   : > { %10063 = vst [vmem:[#allocation74_spill] sm:$0xff] %v7568_v1  ;;  %v3489_v9 = vmax.f32 %v7457_v43, %v3313_v49  ;;  %v3490_v44 = vmax.f32 %v7283_v8, %v3315_v38  ;;  %v3330_v52 = vsel %vm2740_vm6, %v3328_v57, %v9874_v40  ;;  %v3492_v36 = vmax.f32 %v7476_v17, %v3318_v55  ;;  %v5648_v49 = vld [vmem:[#allocation2 + $0x60] sm:$0xff] }
 0x1c6   : > { %10064 = vst [vmem:[#allocation75_spill] sm:$0xff] %v7570_v7  ;;  %v3493_v30 = vmax.f32 %v7333_v42, %v3320_v62  ;;  %v3495_v24 = vmax.f32 %v5647_v13, %v3323_v18  ;;  %v3335_v34 = vsel %vm2740_vm6, %v3333_v0, %v3334_v29  ;;  %v3496_v43 = vmax.f32 %v5641_v48, %v3325_v63  ;;  %v492_v62 = vpop.f32.mrf.mxu0 }
 0x1c7   : > { %1269 = vst.msk [vmem:[#allocation2 + $0x1d0] sm:$0xff] %vm1156_vm1, %v7568_v1  ;;  %v3498_v8 = vmax.f32 %v5648_v49, %v3328_v57  ;;  %v3499_v38 = vmax.f32 %v5643_v33, %v3330_v52  ;;  %v3501_v1 = vmax.f32 %v5649_v56, %v3333_v0  ;;  %v3502_v22 = vmax.f32 %v5645_v6, %v3335_v34  ;;  %v7622_v6 = vld [vmem:[#allocation2 + $0x18] sm:$0xff] }
 0x1c8   : > { %v3622_v12 = vrot.slane %v3489_v9, 5  ;;  %v7593_v26 = vrot.slane %v3490_v44, 5  ;;  %v3627_v40 = vrot.slane %v3492_v36, 5  ;;  %v7595_v17 = vrot.slane %v3493_v30, 5  ;;  %v1325_v44 = vld [vmem:[#allocation2 + $0x178] sm:$0xff] }
 0x1c9   : > { %v3632_v42 = vrot.slane %v3495_v24, 5  ;;  %v7597_v55 = vrot.slane %v3496_v43, 5  ;;  %v3637_v13 = vrot.slane %v3498_v8, 5  ;;  %v7601_v63 = vrot.slane %v3499_v38, 5  ;;  %v7635_v52 = vld [vmem:[#allocation2 + $0x38] sm:$0xff] }
 0x1ca   : > { %v3624_v18 = vsel %vm3621_vm3, %v3622_v12, %v7593_v26  ;;  %v3642_v48 = vrot.slane %v3501_v1, 5  ;;  %v3629_v56 = vsel %vm3621_vm3, %v3627_v40, %v7595_v17  ;;  %v7607_v34 = vrot.slane %v3502_v22, 5 }
 0x1cb   : > { %v3634_v9 = vsel %vm3621_vm3, %v3632_v42, %v7597_v55  ;;  %v10065_v24 = vrot.slane %v6793_v51, 5  ;;  %v3639_v12 = vsel %vm3621_vm3, %v3637_v13, %v7601_v63  ;;  %v3776_v57 = vmax.f32 %v7552_v37, %v3624_v18 }
 0x1cc   : > { %v7617_v1 = vmax.f32 %v7570_v7, %v3629_v56  ;;  %v7620_v40 = vmax.f32 %v7054_v31, %v3634_v9  ;;  %v2760_v22 = vsel %vm2740_vm6, %v6964_v3, %v7289_v11  ;;  %v3644_v51 = vsel %vm3621_vm3, %v3642_v48, %v7607_v34 }
 0x1cd   : > { %v3649_v33 = vsel %vm3621_vm3, %v10065_v24, %v6944_v16  ;;  %v7630_v0 = vmax.f32 %v7057_v23, %v3639_v12  ;;  %v7633_v37 = vadd.f32 %v7372_v21, %v492_v62  ;;  %v7638_v36 = vmax.f32 %v7138_v14, %v3644_v51 }
 0x1ce   : > { %v7641_v30 = vmax.f32 %v6934_v54, %v3649_v33  ;;  %v3820_v3 = vmax.f32 %v3776_v57, %v7617_v1  ;;  %v1495_v11 = vrot.slane %v1325_v44, 2  ;;  %v2490_v49 = vrot.slane %v1325_v44, 4 }
 0x1cf   : > { %v5132_v43 = vmul.f32 -1.442695, %v7633_v37  ;;  %v3371_v8 = vrot.slane %v1325_v44, 6  ;;  %v1440_v38 = vrot.slane %v7622_v6, 2  ;;  %v10066_v18 = vrot.slane %v7395_v58, 2 }
 0x1d0   : > { %v3852_v42 = vmax.f32 %v3820_v3, %v7620_v40  ;;  %v1445_v48 = vrot.slane %v7635_v52, 2  ;;  %v2435_v62 = vrot.slane %v7622_v6, 4  ;;  %v10067_v9 = vrot.slane %v7395_v58, 4 }
 0x1d1   : > { %v1496_v13 = vsel %vm1436_vm7, %v10066_v18, %v1495_v11  ;;  %5479 = vpow2.f32 %v5132_v43  ;;  %v10068_v33 = vrot.slane %v7395_v58, 6  ;;  %v10069_v3 = vrot.slane %v7301_v61, 2 }
 0x1d2   : > { %v1648_v56 = vmax.f32 %v7395_v58, %v1496_v13  ;;  %v2491_v24 = vsel %vm2431_vm14, %v10067_v9, %v2490_v49  ;;  %v3884_v57 = vmax.f32 %v3852_v42, %v7630_v0  ;;  %v10070_v18 = vrot.slane %v7408_v32, 2 }
 0x1d3   : > { %v7659_v12 = vsel %vm2740_vm6, %v10068_v33, %v3371_v8  ;;  %v2643_v51 = vmax.f32 %v7395_v58, %v2491_v24  ;;  %v1441_v11 = vsel %vm1436_vm7, %v10069_v3, %v1440_v38  ;;  %v10071_v8 = vrot.slane %v7301_v61, 4 }
 0x1d4   : > { %v1804_v43 = vrot.slane %v1648_v56, 7  ;;  %v1446_v49 = vsel %vm1436_vm7, %v10070_v18, %v1445_v48  ;;  %v1615_v13 = vmax.f32 %v7301_v61, %v1441_v11  ;;  %v3916_v9 = vmax.f32 %v3884_v57, %v7638_v36 }
 0x1d5   : > { %v2436_v42 = vsel %vm2431_vm14, %v10071_v8, %v2435_v62  ;;  %v2799_v24 = vrot.slane %v2643_v51, 6  ;;  %v1618_v33 = vmax.f32 %v7408_v32, %v1446_v49  ;;  %v2440_v44 = vrot.slane %v7635_v52, 4 }
 0x1d6   : > { %v1805_v38 = vsel %vm1745_vm10, %v7429_v19, %v1804_v43  ;;  %v1959_v56 = vmax.f32 %v7273_v27, %v7406_v60  ;;  %v1749_v48 = vrot.slane %v1615_v13, 7  ;;  %v2610_v3 = vmax.f32 %v7301_v61, %v2436_v42 }
 0x1d7   : > { %v3948_v11 = vmax.f32 %v3916_v9, %v7641_v30  ;;  %v7685_v62 = vmax.f32 %v7395_v58, %v1805_v38  ;;  %v2800_v57 = vsel %vm2740_vm6, %v7472_v39, %v2799_v24  ;;  %v1754_v51 = vrot.slane %v1618_v33, 7  ;;  %v5480_v18 = vpop.eup %5479 }
 0x1d8   : > { %v1750_v49 = vsel %vm1745_vm10, %v7496_v47, %v1749_v48  ;;  %v10072_v19 = vrot.slane %v7408_v32, 4  ;;  %v2744_v43 = vrot.slane %v2610_v3, 6  ;;  %v3316_v13 = vrot.slane %v7622_v6, 6 }
 0x1d9   : > { %v3980_v8 = vmax.f32 %v3948_v11, %v7040_v28  ;;  %v7696_v42 = vadd.f32 1.0, %v5480_v18  ;;  %v1991_v9 = vmax.f32 %v1959_v56, %v7685_v62  ;;  %v7700_v39 = vmax.f32 %v7685_v62, %v2800_v57 }
 0x1da   : > { %v2441_v27 = vsel %vm2431_vm14, %v10072_v19, %v2440_v44  ;;  %v1755_v24 = vsel %vm1745_vm10, %v7514_v10, %v1754_v51  ;;  %v1901_v47 = vmax.f32 %v7301_v61, %v1750_v49  ;;  %v2745_v44 = vsel %vm2740_vm6, %v7539_v5, %v2744_v43  ;;  %v5650_v51 = vld [vmem:[#allocation2 + $0x78] sm:$0xff] }
 0x1db   : > { %10073 = vst [vmem:[#allocation76_spill] sm:$0xff] %v7700_v39  ;;  %v2613_v33 = vmax.f32 %v7408_v32, %v2441_v27  ;;  %v7710_v6 = vmax.f32 %v6580_v50, %v6631_v45  ;;  %v7713_v38 = vmax.f32 %v7027_v46, %v2760_v22  ;;  %5236 = vmatmul.msk.f32.vlgmr.msrb.gmra.mxu1 %vm1156_vm1, %v3980_v8  ;;  %5481 = vrcp.f32 %v7696_v42 }
 0x1dc   : > { %v1015_v10 = vand.u32 2147483648, %v7696_v42  ;;  %5155 = vmatmul.msk.f32.gmra.mxu2 %vm1156_vm1, %v1991_v9  ;;  %v1013_v56 = vand.u32 2147483647, %v7696_v42  ;;  %v10076_v5 = vrot.slane %v7301_v61, 6  ;;  %v3321_v50 = vrot.slane %v7635_v52, 6 }
 0x1dd   : > { %10074 = vst [vmem:[#allocation77_spill] sm:$0xff] %v7710_v6  ;;  %v2749_v48 = vrot.slane %v2613_v33, 6  ;;  %v1903_v45 = vmax.f32 %v7408_v32, %v1755_v24  ;;  %v2896_v46 = vmax.f32 %v1901_v47, %v2745_v44  ;;  %v10077_v22 = vrot.slane %v6953_v41, 6  ;;  %v5651_v44 = vld [vmem:[#allocation2 + $0xb0] sm:$0xff] }
 0x1de   : > { %10075 = vst [vmem:[#allocation78_spill] sm:$0xff] %v7713_v38  ;;  %v3317_v3 = vsel %vm2740_vm6, %v10076_v5, %v3316_v13  ;;  %v10078_v11 = vrot.slane %v7557_v59, 6  ;;  %v3331_v18 = vrot.slane %v5650_v51, 6  ;;  %v10079_v19 = vrot.slane %v7408_v32, 6 }
 0x1df   : > { %v2750_v49 = vsel %vm2740_vm6, %v7549_v20, %v2749_v48  ;;  %v10080_v52 = vrot.slane %v6400_v53, 6  ;;  %v10081_v41 = vrot.slane %v6421_v2, 6  ;;  %v10082_v13 = vrot.slane %v6431_v15, 6  ;;  %v495_v53 = vpop.f32.mrf.mxu0 }
 0x1e0   : > { %v3327_v57 = vsel %vm2740_vm6, %v10078_v11, %v10077_v22  ;;  %v3322_v27 = vsel %vm2740_vm6, %v10079_v19, %v3321_v50  ;;  %v1016_v9 = vor.u32 1.1754944e-38, %v1015_v10  ;;  %v10083_v24 = vrot.slane %v7575_v25, 6  ;;  %v10089_v19 = vld [vmem:[#allocation29_spill] sm:$0xff] }
 0x1e1   : > { %v3337_v43 = vsel %vm2740_vm6, %v3334_v29, %v10080_v52  ;;  %v3342_v8 = vsel %vm2740_vm6, %v10082_v13, %v10081_v41  ;;  %v3491_v47 = vmax.f32 %v7301_v61, %v3317_v3  ;;  %v3494_v33 = vmax.f32 %v7408_v32, %v3322_v27  ;;  %v5482_v10 = vpop.eup %5481  ;;  %v10085_v61 = vld [vmem:[#allocation25_spill] sm:$0xff]  ;;  %v7782_v13 = vld [vmem:[#allocation2 + $0x190] sm:$0xff] }
 0x1e2   : > { %v3332_v20 = vsel %vm2740_vm6, %v10083_v24, %v3331_v18  ;;  %vm1009_vm4 = vweird.f32 %v7696_v42  ;;  %v3497_v29 = vmax.f32 %v7557_v59, %v3327_v57  ;;  %v3503_v15 = vmax.f32 %v7578_v35, %v3337_v43  ;;  %v10090_v24 = vld [vmem:[#allocation42_spill] sm:$0xff] }
 0x1e3   : > { %v3500_v2 = vmax.f32 %v7575_v25, %v3332_v20  ;;  %v3506_v48 = vmax.f32 %v5651_v44, %v3342_v8  ;;  %v7754_v5 = vmax.f32 %v1903_v45, %v2750_v49  ;;  %v3625_v50 = vrot.slane %v3491_v47, 5 }
 0x1e4   : > { %v3630_v22 = vrot.slane %v3494_v33, 5  ;;  %v10086_v3 = vmax.f32 %v6489_v4, %v10085_v61  ;;  %v1005_v11 = vmul.f32 %v5482_v10, %v7696_v42  ;;  %vm7760_vm5 = vcmp.eq.f32.partialorder %v1013_v56, 8.507059e+37 }
 0x1e5   : > { %10084 = vst [vmem:[#allocation79_spill] sm:$0xff] %v7754_v5  ;;  %v3635_v59 = vrot.slane %v3497_v29, 5  ;;  %v3640_v25 = vrot.slane %v3500_v2, 5  ;;  %v7765_v35 = vadd.f32 %v7372_v21, %v495_v53  ;;  %v3626_v45 = vsel %vm3621_vm3, %v7593_v26, %v3625_v50  ;;  %v1326_v2 = vld [vmem:[#allocation2 + $0x180] sm:$0xff] }
 0x1e6   : > { %v3655_v32 = vrot.slane %v10086_v3, 5  ;;  %v3631_v57 = vsel %vm3621_vm3, %v7595_v17, %v3630_v22  ;;  %v3645_v18 = vrot.slane %v3503_v15, 5  ;;  %v3650_v4 = vrot.slane %v3506_v48, 5  ;;  %v1327_v17 = vld [vmem:[#allocation2 + $0x188] sm:$0xff] }
 0x1e7   : > { %v1006_v49 = vsub.f32 1.0, %v1005_v11  ;;  %vm1010_vm8 = vweird.f32 %v5482_v10  ;;  %v3636_v56 = vsel %vm3621_vm3, %v7597_v55, %v3635_v59  ;;  %v3641_v52 = vsel %vm3621_vm3, %v7601_v63, %v3640_v25  ;;  %v10091_v63 = vld [vmem:[#allocation34_spill] sm:$0xff] }
 0x1e8   : > { %v3656_v27 = vsel %vm3621_vm3, %v10089_v19, %v3655_v32  ;;  %v3651_v43 = vsel %vm3621_vm3, %v6944_v16, %v3650_v4  ;;  %v3777_v26 = vmax.f32 %v2896_v46, %v3626_v45  ;;  %v7780_v41 = vmax.f32 %v7754_v5, %v3631_v57  ;;  %v10092_v16 = vld [vmem:[#allocation35_spill] sm:$0xff]  ;;  %vm1011_vm9 = vmor %vm1009_vm4, %vm1010_vm8 }
 0x1e9   : > { %v1007_v8 = vmul.f32 %v5482_v10, %v1006_v49  ;;  %v3646_v55 = vsel %vm3621_vm3, %v7607_v34, %v3645_v18  ;;  %v7787_v20 = vmax.f32 %v10090_v24, %v3636_v56  ;;  %v7790_v47 = vmax.f32 %v7713_v38, %v3641_v52  ;;  %v498_v18 = vpop.f32.mrf.mxu0  ;;  %v10109_v38 = vld [vmem:[#allocation47_spill] sm:$0xff] }
 0x1ea   : > { %v7793_v33 = vmax.f32 %v10091_v63, %v3646_v55  ;;  %v7796_v46 = vmax.f32 %v10092_v16, %v3651_v43  ;;  %v3821_v53 = vmax.f32 %v3777_v26, %v7780_v41  ;;  %v5133_v29 = vmul.f32 -1.442695, %v7765_v35  ;;  %v10108_v63 = vld [vmem:[#allocation46_spill] sm:$0xff] }
 0x1eb   : > { %v1008_v15 = vadd.f32 %v5482_v10, %v1007_v8  ;;  %v7801_v34 = vmax.f32 %v7710_v6, %v3656_v27  ;;  %v1497_v44 = vrot.slane %v1327_v17, 2  ;;  %v1498_v48 = vrot.slane %v7782_v13, 2 }
 0x1ec   : > { %v3853_v50 = vmax.f32 %v3821_v53, %v7787_v20  ;;  %5483 = vpow2.f32 %v5133_v29  ;;  %v2492_v22 = vrot.slane %v1327_v17, 4  ;;  %v2493_v61 = vrot.slane %v7782_v13, 4 }
 0x1ed   : > { %v1012_v3 = vsel %vm1011_vm9, %v5482_v10, %v1008_v15  ;;  %v1499_v32 = vsel %vm1436_vm7, %v1497_v44, %v1498_v48  ;;  %v1649_v11 = vmax.f32 %v1326_v2, %v1497_v44  ;;  %v3373_v59 = vrot.slane %v1327_v17, 6 }
 0x1ee   : > { %v1017_v25 = vsel %vm7760_vm5, %v1016_v9, %v1012_v3  ;;  %v3885_v45 = vmax.f32 %v3853_v50, %v7790_v47  ;;  %v1650_v57 = vmax.f32 %v1327_v17, %v1499_v32  ;;  %v2494_v42 = vsel %vm2431_vm14, %v2492_v22, %v2493_v61 }
 0x1ef   : > { %v7815_v4 = vmul.f32 %v1017_v25, %v7633_v37  ;;  %v1806_v49 = vrot.slane %v1649_v11, 7  ;;  %v2644_v56 = vmax.f32 %v1326_v2, %v2492_v22  ;;  %v2645_v19 = vmax.f32 %v1327_v17, %v2494_v42  ;;  %v10094_v22 = vld [vmem:[#allocation69_spill] sm:$0xff]  ;;  %v1329_v25 = vld [vmem:[#allocation2 + $0x198] sm:$0xff] }
 0x1f0   : > { %v3917_v10 = vmax.f32 %v3885_v45, %v7793_v33  ;;  %v7818_v27 = vrot.slane %v1650_v57, 7  ;;  %v3374_v52 = vrot.slane %v7782_v13, 6  ;;  %v3525_v51 = vmax.f32 %v1326_v2, %v3373_v59 }
 0x1f1   : > { %10093 = vst [vmem:[#allocation25_spill] sm:$0xff] %v7815_v4  ;;  %v2801_v9 = vrot.slane %v2644_v56, 6  ;;  %v7823_v43 = vrot.slane %v2645_v19, 6  ;;  %v3822_v37 = vmax.f32 %v7617_v1, %v7620_v40  ;;  %v10095_v1 = vld [vmem:[#allocation61_spill] sm:$0xff]  ;;  %v7842_v11 = vadd.f32 %v7372_v21, %v498_v18  ;;  %v10097_v56 = vld [vmem:[#allocation31_spill] sm:$0xff]  ;;  %v10098_v19 = vld [vmem:[#allocation28_spill] sm:$0xff] }
 0x1f2   : > { %1270 = vst.msk [vmem:[#allocation2 + $0x1e8] sm:$0xff] %vm1156_vm1, %v7815_v4  ;;  %v5484_v26 = vpop.eup %5483  ;;  %v3949_v8 = vmax.f32 %v3917_v10, %v7796_v46  ;;  %v1808_v55 = vsel %vm1745_vm10, %v1806_v49, %v7818_v27  ;;  %v3375_v53 = vsel %vm2740_vm6, %v3373_v59, %v3374_v52  ;;  %v1960_v3 = vmax.f32 %v10095_v1, %v10094_v22 }
 0x1f3   : > { %v7831_v29 = vadd.f32 1.0, %v5484_v26  ;;  %v7833_v2 = vmax.f32 %v1327_v17, %v1808_v55  ;;  %v2803_v15 = vsel %vm2740_vm6, %v2801_v9, %v7823_v43  ;;  %v3526_v44 = vmax.f32 %v1327_v17, %v3375_v53  ;;  %v501_v55 = vpop.f32.mrf.mxu0 }
 0x1f4   : > { %v3981_v50 = vmax.f32 %v3949_v8, %v7801_v34  ;;  %v3854_v32 = vmax.f32 %v3822_v37, %v7630_v0  ;;  %v3682_v59 = vrot.slane %v3525_v51, 5  ;;  %v3823_v45 = vmax.f32 %v7780_v41, %v7787_v20 }
 0x1f5   : > { %5485 = vrcp.f32 %v7831_v29  ;;  %v1992_v17 = vmax.f32 %v1960_v3, %v7833_v2  ;;  %v7850_v57 = vmax.f32 %v7833_v2, %v2803_v15  ;;  %v7852_v42 = vrot.slane %v3526_v44, 5  ;;  %v10099_v44 = vld [vmem:[#allocation24_spill] sm:$0xff] }
 0x1f6   : > { %5237 = vmatmul.msk.f32.gmra.mxu1 %vm1156_vm1, %v3981_v50  ;;  %v3886_v49 = vmax.f32 %v3854_v32, %v7638_v36  ;;  %v1028_v18 = vand.u32 2147483647, %v7831_v29  ;;  %v7858_v10 = vmax.f32 %v10098_v19, %v10097_v56  ;;  %v5134_v51 = vmul.f32 -1.442695, %v7842_v11  ;;  %v10100_v50 = vld [vmem:[#allocation38_spill] sm:$0xff] }
 0x1f7   : > { %10096 = vst [vmem:[#allocation29_spill] sm:$0xff] %v7850_v57  ;;  %v1500_v41 = vrot.slane %v1329_v25, 2  ;;  %v1030_v9 = vand.u32 2147483648, %v7831_v29  ;;  %5156 = vmatmul.msk.f32.gmra.mxu2 %vm1156_vm1, %v1992_v17  ;;  %v7865_v37 = vsel %vm3621_vm3, %v3682_v59, %v7852_v42  ;;  %v2495_v8 = vrot.slane %v1329_v25, 4 }
 0x1f8   : > { %v3918_v26 = vmax.f32 %v3886_v49, %v7641_v30  ;;  %5487 = vpow2.f32 %v5134_v51  ;;  %v3376_v15 = vrot.slane %v1329_v25, 6  ;;  %v10101_v3 = vmax.f32 %v10099_v44, %v10100_v50 }
 0x1f9   : > { %v1501_v53 = vsel %vm1436_vm7, %v1498_v48, %v1500_v41  ;;  %v2496_v4 = vsel %vm2431_vm14, %v2493_v61, %v2495_v8  ;;  %v3855_v59 = vmax.f32 %v3823_v45, %v7790_v47  ;;  %v10102_v48 = vld [vmem:[#allocation30_spill] sm:$0xff]  ;;  %v7883_v41 = vadd.f32 %v7372_v21, %v501_v55  ;;  %v7889_v45 = vld [vmem:[#allocation2 + $0x1a8] sm:$0xff]  ;;  %v10103_v8 = vld [vmem:[#allocation39_spill] sm:$0xff] }
 0x1fa   : > { %v3660_v32 = vrot.slane %v10101_v3, 5  ;;  %v3950_v56 = vmax.f32 %v3918_v26, %v7040_v28  ;;  %v1651_v17 = vmax.f32 %v7782_v13, %v1501_v53  ;;  %v2646_v49 = vmax.f32 %v7782_v13, %v2496_v4  ;;  %v7891_v4 = vld [vmem:[#allocation2 + $0x1b0] sm:$0xff] }
 0x1fb   : > { %v5486_v19 = vpop.eup %5485  ;;  %v7878_v51 = vsel %vm2740_vm6, %v3374_v52, %v3376_v15  ;;  %v1961_v61 = vmax.f32 %v7406_v60, %v7685_v62  ;;  %v3887_v55 = vmax.f32 %v3855_v59, %v7793_v33  ;;  %v5135_v3 = vmul.f32 -1.442695, %v7883_v41 }
 0x1fc   : > { %v3661_v25 = vsel %vm3621_vm3, %v10102_v48, %v3660_v32  ;;  %v1020_v26 = vmul.f32 %v5486_v19, %v7831_v29  ;;  %v3982_v53 = vmax.f32 %v3950_v56, %v7858_v10  ;;  %v1809_v44 = vrot.slane %v1651_v17, 7  ;;  %v1330_v32 = vld [vmem:[#allocation2 + $0x1a0] sm:$0xff] }
 0x1fd   : > { %vm1025_vm11 = vweird.f32 %v5486_v19  ;;  %v2804_v52 = vrot.slane %v2646_v49, 6  ;;  %v1502_v56 = vrot.slane %v7889_v45, 2  ;;  %v7907_v59 = vmax.f32 %v10103_v8, %v3661_v25 }
 0x1fe   : > { %v1021_v15 = vsub.f32 1.0, %v1020_v26  ;;  %5238 = vmatmul.msk.f32.gmra.mxu1 %vm1156_vm1, %v3982_v53  ;;  %v1810_v50 = vsel %vm1745_vm10, %v7818_v27, %v1809_v44  ;;  %v5488_v17 = vpop.eup %5487  ;;  %v9878_v26 = vrot.slane %v7891_v4, 2  ;;  %v3919_v27 = vmax.f32 %v3887_v55, %v7796_v46 }
 0x1ff   : > { %v7902_v48 = vmax.f32 %v7782_v13, %v1810_v50  ;;  %v2805_v49 = vsel %vm2740_vm6, %v7823_v43, %v2804_v52  ;;  %v7910_v6 = vadd.f32 1.0, %v5488_v17  ;;  %5489 = vpow2.f32 %v5135_v3 }
 0x200   : > { %v1022_v53 = vmul.f32 %v5486_v19, %v1021_v15  ;;  %v1504_v43 = vsel %vm1436_vm7, %v1502_v56, %v9878_v26  ;;  %v1652_v52 = vmax.f32 %v1330_v32, %v1502_v56  ;;  %vm1024_vm12 = vweird.f32 %v7831_v29 }
 0x201   : > { %v1993_v44 = vmax.f32 %v1961_v61, %v7902_v48  ;;  %v7915_v16 = vmax.f32 %v7902_v48, %v2805_v49  ;;  %5491 = vrcp.f32 %v7910_v6  ;;  %v3951_v15 = vmax.f32 %v3919_v27, %v7801_v34  ;;  %vm1026_vm13 = vmor %vm1024_vm12, %vm1025_vm11 }
 0x202   : > { %v1023_v25 = vadd.f32 %v5486_v19, %v1022_v53  ;;  %vm1029_vm15 = vcmp.eq.f32.partialorder %v1028_v18, 8.507059e+37  ;;  %v1031_v55 = vor.u32 1.1754944e-38, %v1030_v9  ;;  %v1043_v61 = vand.u32 2147483647, %v7910_v6 }
 0x203   : > { %10104 = vst [vmem:[#allocation69_spill] sm:$0xff] %v7915_v16  ;;  %5157 = vmatmul.msk.f32.gmra.mxu2 %vm1156_vm1, %v1993_v44  ;;  %v1653_v50 = vmax.f32 %v7889_v45, %v1504_v43  ;;  %v1045_v56 = vand.u32 2147483648, %v7910_v6  ;;  %v3983_v17 = vmax.f32 %v3951_v15, %v7907_v59  ;;  %v2497_v29 = vrot.slane %v7889_v45, 4 }
 0x204   : > { %v1027_v3 = vsel %vm1026_vm13, %v5486_v19, %v1023_v25  ;;  %v1811_v53 = vrot.slane %v1652_v52, 7  ;;  %v2498_v18 = vrot.slane %v7891_v4, 4  ;;  %v3378_v19 = vrot.slane %v7889_v45, 6 }
 0x205   : > { %v1032_v49 = vsel %vm1029_vm15, %v1031_v55, %v1027_v3  ;;  %v7930_v27 = vrot.slane %v1653_v50, 7  ;;  %v5490_v9 = vpop.eup %5489  ;;  %v2647_v44 = vmax.f32 %v1330_v32, %v2497_v29  ;;  %v3379_v43 = vrot.slane %v7891_v4, 6 }
 0x206   : > { %v7934_v26 = vmul.f32 %v1032_v49, %v7765_v35  ;;  %5239 = vmatmul.msk.f32.gmra.mxu1 %vm1156_vm1, %v3983_v17  ;;  %vm1039_vm2 = vweird.f32 %v7910_v6  ;;  %v7940_v25 = vadd.f32 1.0, %v5490_v9  ;;  %v2499_v15 = vsel %vm2431_vm14, %v2497_v29, %v2498_v18  ;;  %v504_v49 = vpop.f32.mrf.mxu0 }
 0x207   : > { %v1813_v52 = vsel %vm1745_vm10, %v1811_v53, %v7930_v27  ;;  %v5492_v55 = vpop.eup %5491  ;;  %v1962_v50 = vmax.f32 %v10094_v22, %v7833_v2  ;;  %v2648_v3 = vmax.f32 %v7889_v45, %v2499_v15  ;;  %v3380_v17 = vsel %vm2740_vm6, %v3378_v19, %v3379_v43 }
 0x208   : > { %10105 = vst [vmem:[#allocation61_spill] sm:$0xff] %v7934_v26  ;;  %v7948_v35 = vmax.f32 %v7889_v45, %v1813_v52  ;;  %v1035_v9 = vmul.f32 %v5492_v55, %v7910_v6  ;;  %vm7955_vm4 = vcmp.eq.f32.partialorder %v1043_v61, 8.507059e+37  ;;  %v1046_v29 = vor.u32 1.1754944e-38, %v1045_v56 }
 0x209   : > { %1271 = vst.msk [vmem:[#allocation2 + $0x1f0] sm:$0xff] %vm1156_vm1, %v7934_v26  ;;  %5493 = vrcp.f32 %v7940_v25  ;;  %v2806_v26 = vrot.slane %v2647_v44, 6  ;;  %v2807_v8 = vrot.slane %v2648_v3, 6  ;;  %v7963_v5 = vmax.f32 %v10109_v38, %v10108_v63  ;;  %v1333_v3 = vld [vmem:[#allocation2 + $0x1b8] sm:$0xff] }
 0x20a   : > { %v1994_v52 = vmax.f32 %v1962_v50, %v7948_v35  ;;  %v1036_v15 = vsub.f32 1.0, %v1035_v9  ;;  %vm1040_vm5 = vweird.f32 %v5492_v55  ;;  %v3528_v24 = vmax.f32 %v1330_v32, %v3378_v19 }
 0x20b   : > { %v3529_v54 = vmax.f32 %v7889_v45, %v3380_v17  ;;  %v1058_v61 = vand.u32 2147483647, %v7940_v25  ;;  %v2808_v56 = vsel %vm2740_vm6, %v2806_v26, %v2807_v8  ;;  %v3824_v50 = vmax.f32 %v7620_v40, %v7630_v0  ;;  %vm1041_vm9 = vmor %vm1039_vm2, %vm1040_vm5 }
 0x20c   : > { %5158 = vmatmul.msk.f32.gmra.mxu2 %vm1156_vm1, %v1994_v52  ;;  %v7972_v44 = vadd.f32 %v7372_v21, %v504_v49  ;;  %v1037_v63 = vmul.f32 %v5492_v55, %v1036_v15  ;;  %v7975_v9 = vmax.f32 %v7948_v35, %v2808_v56  ;;  %v3687_v32 = vrot.slane %v3528_v24, 5 }
 0x20d   : > { %v7977_v19 = vrot.slane %v3529_v54, 5  ;;  %vm1054_vm8 = vweird.f32 %v7940_v25  ;;  %v1060_v45 = vand.u32 2147483648, %v7940_v25  ;;  %v3856_v26 = vmax.f32 %v3824_v50, %v7638_v36 }
 0x20e   : > { %10110 = vst [vmem:[#allocation31_spill] sm:$0xff] %v7975_v9  ;;  %v5136_v17 = vmul.f32 -1.442695, %v7972_v44  ;;  %v1505_v40 = vrot.slane %v1333_v3, 2  ;;  %v1038_v49 = vadd.f32 %v5492_v55, %v1037_v63  ;;  %v2500_v56 = vrot.slane %v1333_v3, 4 }
 0x20f   : > { %v5494_v52 = vpop.eup %5493  ;;  %v7985_v15 = vsel %vm3621_vm3, %v3687_v32, %v7977_v19  ;;  %v3381_v38 = vrot.slane %v1333_v3, 6  ;;  %vm7991_vm11 = vcmp.eq.f32.partialorder %v1058_v61, 8.507059e+37  ;;  %v3888_v50 = vmax.f32 %v3856_v26, %v7641_v30  ;;  %v507_v26 = vpop.f32.mrf.mxu0 }
 0x210   : > { %10111 = vst [vmem:[#allocation24_spill] sm:$0xff] %v7985_v15  ;;  %v1050_v54 = vmul.f32 %v5494_v52, %v7940_v25  ;;  %5495 = vpow2.f32 %v5136_v17  ;;  %v1042_v63 = vsel %vm1041_vm9, %v5492_v55, %v1038_v49  ;;  %v10114_v14 = vrot.slane %v7891_v4, 2 }
 0x211   : > { %v2501_v3 = vsel %vm2431_vm14, %v2498_v18, %v2500_v56  ;;  %v8001_v23 = vsel %vm2740_vm6, %v3379_v43, %v3381_v38  ;;  %v1047_v6 = vsel %vm7955_vm4, %v1046_v29, %v1042_v63  ;;  %v3920_v7 = vmax.f32 %v3888_v50, %v7040_v28  ;;  %v10116_v18 = vld [vmem:[#allocation40_spill] sm:$0xff]  ;;  %v10117_v38 = vld [vmem:[#allocation49_spill] sm:$0xff] }
 0x212   : > { %v1506_v32 = vsel %vm1436_vm7, %v10114_v14, %v1505_v40  ;;  %v1051_v61 = vsub.f32 1.0, %v1050_v54  ;;  %v8008_v55 = vmul.f32 %v1047_v6, %v7842_v11  ;;  %v2649_v17 = vmax.f32 %v7891_v4, %v2501_v3  ;;  %v10119_v54 = vld [vmem:[#allocation45_spill] sm:$0xff] }
 0x213   : > { %v1654_v31 = vmax.f32 %v7891_v4, %v1506_v32  ;;  %v10118_v43 = vmax.f32 %v10116_v18, %v10117_v38  ;;  %vm1055_vm12 = vweird.f32 %v5494_v52  ;;  %v3952_v29 = vmax.f32 %v3920_v7, %v7858_v10  ;;  %v8041_v18 = vld [vmem:[#allocation2 + $0x1d0] sm:$0xff] }
 0x214   : > { %10115 = vst [vmem:[#allocation38_spill] sm:$0xff] %v8008_v55  ;;  %v1052_v53 = vmul.f32 %v5494_v52, %v1051_v61  ;;  %v1061_v56 = vor.u32 1.1754944e-38, %v1060_v45  ;;  %v2809_v11 = vrot.slane %v2649_v17, 6  ;;  %v8022_v63 = vadd.f32 %v7372_v21, %v507_v26  ;;  %vm1056_vm13 = vmor %vm1054_vm8, %vm1055_vm12  ;;  %v8039_v17 = vld [vmem:[#allocation2 + $0x1c8] sm:$0xff] }
 0x215   : > { %v3665_v40 = vrot.slane %v10118_v43, 5  ;;  %v1814_v49 = vrot.slane %v1654_v31, 7  ;;  %1272 = vst.msk [vmem:[#allocation2 + $0x208] sm:$0xff] %vm1156_vm1, %v8008_v55  ;;  %v3984_v6 = vmax.f32 %v3952_v29, %v7963_v5  ;;  %v1963_v31 = vmax.f32 %v7685_v62, %v7902_v48 }
 0x216   : > { %v5496_v32 = vpop.eup %5495  ;;  %v1053_v3 = vadd.f32 %v5494_v52, %v1052_v53  ;;  %v2810_v21 = vsel %vm2740_vm6, %v2807_v8, %v2809_v11  ;;  %v3825_v26 = vmax.f32 %v7787_v20, %v7790_v47  ;;  %v5137_v62 = vmul.f32 -1.442695, %v8022_v63  ;;  %v1334_v8 = vld [vmem:[#allocation2 + $0x1c0] sm:$0xff] }
 0x217   : > { %v3666_v50 = vsel %vm3621_vm3, %v10119_v54, %v3665_v40  ;;  %v1815_v61 = vsel %vm1745_vm10, %v7930_v27, %v1814_v49  ;;  %v8031_v7 = vadd.f32 1.0, %v5496_v32  ;;  %5240 = vmatmul.msk.f32.gmra.mxu1 %vm1156_vm1, %v3984_v6  ;;  %v1507_v25 = vrot.slane %v8039_v17, 2  ;;  %v10122_v49 = vld [vmem:[#allocation52_spill] sm:$0xff] }
 0x218   : > { %v8034_v45 = vmax.f32 %v7891_v4, %v1815_v61  ;;  %v1057_v27 = vsel %vm1056_vm13, %v5494_v52, %v1053_v3  ;;  %v9893_v38 = vrot.slane %v8041_v18, 2  ;;  %v3857_v20 = vmax.f32 %v3825_v26, %v7793_v33 }
 0x219   : > { %v1062_v43 = vsel %vm7991_vm11, %v1061_v56, %v1057_v27  ;;  %5497 = vrcp.f32 %v8031_v7  ;;  %v1655_v56 = vmax.f32 %v1334_v8, %v1507_v25  ;;  %v2502_v32 = vrot.slane %v8039_v17, 4 }
 0x21a   : > { %v8052_v40 = vmul.f32 %v1062_v43, %v7883_v41  ;;  %v1995_v52 = vmax.f32 %v1963_v31, %v8034_v45  ;;  %v8056_v53 = vmax.f32 %v8034_v45, %v2810_v21  ;;  %v3889_v29 = vmax.f32 %v3857_v20, %v7796_v46 }
 0x21b   : > { %5499 = vpow2.f32 %v5137_v62  ;;  %v1509_v24 = vsel %vm1436_vm7, %v1507_v25, %v9893_v38  ;;  %v8066_v41 = vmax.f32 %v10122_v49, %v3666_v50  ;;  %v9892_v3 = vrot.slane %v8041_v18, 4  ;;  %v10130_v49 = vld [vmem:[#allocation48_spill] sm:$0xff] }
 0x21c   : > { %10120 = vst [vmem:[#allocation30_spill] sm:$0xff] %v8052_v40  ;;  %5159 = vmatmul.msk.f32.gmra.mxu2 %vm1156_vm1, %v1995_v52  ;;  %v1656_v11 = vmax.f32 %v8039_v17, %v1509_v24  ;;  %v3921_v54 = vmax.f32 %v3889_v29, %v7801_v34  ;;  %v3383_v6 = vrot.slane %v8039_v17, 6  ;;  %v1073_v61 = vand.u32 2147483647, %v8031_v7 }
 0x21d   : > { %10121 = vst [vmem:[#allocation46_spill] sm:$0xff] %v8056_v53  ;;  %v1816_v31 = vrot.slane %v1655_v56, 7  ;;  %v9895_v26 = vrot.slane %v8041_v18, 6  ;;  %v2504_v62 = vsel %vm2431_vm14, %v2502_v32, %v9892_v3  ;;  %v2650_v25 = vmax.f32 %v1334_v8, %v2502_v32  ;;  %v510_v56 = vpop.f32.mrf.mxu0  ;;  %v10141_v53 = vld [vmem:[#allocation67_spill] sm:$0xff] }
 0x21e   : > { %1273 = vst.msk [vmem:[#allocation2 + $0x210] sm:$0xff] %vm1156_vm1, %v8052_v40  ;;  %v8074_v21 = vrot.slane %v1656_v11, 7  ;;  %v3953_v27 = vmax.f32 %v3921_v54, %v7907_v59  ;;  %v3531_v43 = vmax.f32 %v1334_v8, %v3383_v6  ;;  %v1075_v52 = vand.u32 2147483648, %v8031_v7 }
 0x21f   : > { %v5498_v50 = vpop.eup %5497  ;;  %v2651_v24 = vmax.f32 %v8039_v17, %v2504_v62  ;;  %v1964_v32 = vmax.f32 %v7833_v2, %v7948_v35  ;;  %v3385_v8 = vsel %vm2740_vm6, %v3383_v6, %v9895_v26  ;;  %v3826_v40 = vmax.f32 %v7630_v0, %v7638_v36  ;;  %v5652_v2 = vld [vmem:[%s9791_s2] ss:$0 sm:$0xff] }
 0x220   : > { %v1065_v20 = vmul.f32 %v5498_v50, %v8031_v7  ;;  %v1818_v29 = vsel %vm1745_vm10, %v1816_v31, %v8074_v21  ;;  %v3985_v14 = vmax.f32 %v3953_v27, %v8066_v41  ;;  %v3532_v62 = vmax.f32 %v8039_v17, %v3385_v8 }
 0x221   : > { %v5500_v11 = vpop.eup %5499  ;;  %v8088_v54 = vmax.f32 %v8039_v17, %v1818_v29  ;;  %v8097_v31 = vrot.slane %v2651_v24, 6  ;;  %v2811_v29 = vrot.slane %v2650_v25, 6  ;;  %v8107_v6 = vadd.f32 %v5652_v2, %v510_v56  ;;  %v1337_v17 = vld [vmem:[#allocation2 + $0x1d8] sm:$0xff] }
 0x222   : > { %v1066_v3 = vsub.f32 1.0, %v1065_v20  ;;  %v8095_v38 = vadd.f32 1.0, %v5500_v11  ;;  %5241 = vmatmul.msk.f32.gmra.mxu1 %vm1156_vm1, %v3985_v14  ;;  %vm1069_vm15 = vweird.f32 %v8031_v7  ;;  %vm1070_vm2 = vweird.f32 %v5498_v50 }
 0x223   : > { %v1996_v27 = vmax.f32 %v1964_v32, %v8088_v54  ;;  %v2813_v14 = vsel %vm2740_vm6, %v2811_v29, %v8097_v31  ;;  %v3692_v25 = vrot.slane %v3531_v43, 5  ;;  %v8114_v0 = vrot.slane %v3532_v62, 5  ;;  %vm1071_vm5 = vmor %vm1069_vm15, %vm1070_vm2  ;;  %v10127_v29 = vld [vmem:[#allocation53_spill] sm:$0xff] }
 0x224   : > { %v1067_v20 = vmul.f32 %v5498_v50, %v1066_v3  ;;  %5501 = vrcp.f32 %v8095_v38  ;;  %v3858_v24 = vmax.f32 %v3826_v40, %v7641_v30  ;;  %vm1074_vm4 = vcmp.eq.f32.partialorder %v1073_v61, 8.507059e+37  ;;  %v10126_v40 = vld [vmem:[#allocation55_spill] sm:$0xff] }
 0x225   : > { %5160 = vmatmul.msk.f32.gmra.mxu2 %vm1156_vm1, %v1996_v27  ;;  %10123 = vst [vmem:[#allocation40_spill] sm:$0xff] %v8114_v0  ;;  %v8118_v3 = vmax.f32 %v8088_v54, %v2813_v14  ;;  %v5138_v7 = vmul.f32 -1.442695, %v8107_v6  ;;  %v1076_v56 = vor.u32 1.1754944e-38, %v1075_v52  ;;  %v8123_v32 = vsel %vm3621_vm3, %v3692_v25, %v8114_v0 }
 0x226   : > { %v1068_v11 = vadd.f32 %v5498_v50, %v1067_v20  ;;  %10125 = vst [vmem:[#allocation45_spill] sm:$0xff] %v8123_v32  ;;  %v3890_v8 = vmax.f32 %v3858_v24, %v7040_v28  ;;  %v1510_v43 = vrot.slane %v1337_v17, 2  ;;  %v1088_v27 = vand.u32 2147483647, %v8095_v38 }
 0x227   : > { %10124 = vst [vmem:[#allocation49_spill] sm:$0xff] %v8118_v3  ;;  %v8129_v61 = vmax.f32 %v10127_v29, %v10126_v40  ;;  %5503 = vpow2.f32 %v5138_v7  ;;  %v10128_v52 = vrot.slane %v8041_v18, 2  ;;  %v2505_v25 = vrot.slane %v1337_v17, 4  ;;  %v10131_v3 = vld [vmem:[#allocation56_spill] sm:$0xff] }
 0x228   : > { %v1072_v62 = vsel %vm1071_vm5, %v5498_v50, %v1068_v11  ;;  %v3922_v14 = vmax.f32 %v3890_v8, %v7858_v10  ;;  %v3386_v11 = vrot.slane %v1337_v17, 6  ;;  %v10132_v40 = vmax.f32 %v10130_v49, %v10131_v3  ;;  %v10136_v3 = vld [vmem:[#allocation54_spill] sm:$0xff] }
 0x229   : > { %v1077_v20 = vsel %vm1074_vm4, %v1076_v56, %v1072_v62  ;;  %v1511_v26 = vsel %vm1436_vm7, %v10128_v52, %v1510_v43  ;;  %v1090_v56 = vand.u32 2147483648, %v8095_v38  ;;  %v10133_v43 = vrot.slane %v8041_v18, 4  ;;  %v513_v52 = vpop.f32.mrf.mxu0 }
 0x22a   : > { %v5502_v55 = vpop.eup %5501  ;;  %v8136_v24 = vmul.f32 %v1077_v20, %v7972_v44  ;;  %v1657_v50 = vmax.f32 %v8041_v18, %v1511_v26  ;;  %v3670_v29 = vrot.slane %v10132_v40, 5  ;;  %v3954_v8 = vmax.f32 %v3922_v14, %v7963_v5 }
 0x22b   : > { %v1080_v7 = vmul.f32 %v5502_v55, %v8095_v38  ;;  %v2506_v62 = vsel %vm2431_vm14, %v10133_v43, %v2505_v25  ;;  %v10134_v49 = vrot.slane %v8041_v18, 6  ;;  %v1965_v25 = vmax.f32 %v7902_v48, %v8034_v45 }
 0x22c   : > { %10129 = vst [vmem:[#allocation55_spill] sm:$0xff] %v8136_v24  ;;  %v1819_v44 = vrot.slane %v1657_v50, 7  ;;  %v2652_v26 = vmax.f32 %v8041_v18, %v2506_v62  ;;  %v3671_v20 = vsel %vm3621_vm3, %v10136_v3, %v3670_v29  ;;  %v3986_v40 = vmax.f32 %v3954_v8, %v8129_v61  ;;  %v8175_v8 = vld [vmem:[#allocation2 + $0x1e8] sm:$0xff]  ;;  %v1368_v3 = vld [vmem:[#allocation6 + $0x10] sm:$0xff] }
 0x22d   : > { %1274 = vst.msk [vmem:[#allocation2 + $0x228] sm:$0xff] %vm1156_vm1, %v8136_v24  ;;  %v8154_v17 = vsel %vm2740_vm6, %v10134_v49, %v3386_v11  ;;  %v1081_v14 = vsub.f32 1.0, %v1080_v7  ;;  %v5504_v50 = vpop.eup %5503  ;;  %v3827_v11 = vmax.f32 %v7790_v47, %v7793_v33  ;;  %v8167_v49 = vadd.f32 %v5652_v2, %v513_v52  ;;  %v8181_v2 = vld [vmem:[#allocation2 + $0x1f0] sm:$0xff] }
 0x22e   : > { %10135 = vst [vmem:[#allocation48_spill] sm:$0xff] %v8154_v17  ;;  %v1820_v62 = vsel %vm1745_vm10, %v8074_v21, %v1819_v44  ;;  %v2814_v24 = vrot.slane %v2652_v26, 6  ;;  %vm1085_vm8 = vweird.f32 %v5502_v55  ;;  %5242 = vmatmul.msk.f32.gmra.mxu1 %vm1156_vm1, %v3986_v40  ;;  %v8170_v7 = vadd.f32 1.0, %v5504_v50  ;;  %v1369_v26 = vld [vmem:[#allocation6 + $0x18] sm:$0xff] }
 0x22f   : > { %v1082_v29 = vmul.f32 %v5502_v55, %v1081_v14  ;;  %v8173_v48 = vmax.f32 %v8041_v18, %v1820_v62  ;;  %v3859_v44 = vmax.f32 %v3827_v11, %v7796_v46  ;;  %v5139_v47 = vmul.f32 -1.442695, %v8167_v49  ;;  %v10137_v14 = vld [vmem:[#allocation62_spill] sm:$0xff]  ;;  %2330 = vmatpush.msrb.mxu2 %v1369_v26 }
 0x230   : > { %v2815_v21 = vsel %vm2740_vm6, %v8097_v31, %v2814_v24  ;;  %v1512_v52 = vrot.slane %v8175_v8, 2  ;;  %v8186_v40 = vmax.f32 %v10095_v1, %v10137_v14  ;;  %vm1084_vm9 = vweird.f32 %v8095_v38  ;;  %v1338_v31 = vld [vmem:[#allocation2 + $0x1e0] sm:$0xff]  ;;  %v3071_v24 = vld [vmem:[#allocation6 + $0x58] sm:$0xff]  ;;  %v1367_v1 = vld [vmem:[#allocation6 + $0x8] sm:$0xff] }
 0x231   : > { %v1083_v50 = vadd.f32 %v5502_v55, %v1082_v29  ;;  %5505 = vrcp.f32 %v8170_v7  ;;  %vm1086_vm11 = vmor %vm1084_vm9, %vm1085_vm8  ;;  %v1091_v62 = vor.u32 1.1754944e-38, %v1090_v56  ;;  %v1997_v11 = vmax.f32 %v1965_v25, %v8173_v48  ;;  %3180 = vmatpush.msrb.mxu3 %v3071_v24  ;;  %2331 = vmatpush.msrb.mxu2 %v1368_v3  ;;  %v10140_v14 = vld [vmem:[#allocation60_spill] sm:$0xff] }
 0x232   : > { %10138 = vst [vmem:[#allocation56_spill] sm:$0xff] %v8186_v40  ;;  %v8193_v43 = vmax.f32 %v8173_v48, %v2815_v21  ;;  %v3891_v32 = vmax.f32 %v3859_v44, %v7801_v34  ;;  %vm1089_vm12 = vcmp.eq.f32.partialorder %v1088_v27, 8.507059e+37  ;;  %5507 = vpow2.f32 %v5139_v47  ;;  %v1366_v44 = vld [vmem:[#allocation6] sm:$0xff] }
 0x233   : > { %v1087_v29 = vsel %vm1086_vm11, %v5502_v55, %v1083_v50  ;;  %v1513_v38 = vrot.slane %v8181_v2, 2  ;;  %5161 = vmatmul.msk.f32.gmra.mxu2 %vm1156_vm1, %v1997_v11  ;;  %v8199_v56 = vmax.f32 %v10140_v14, %v3671_v20  ;;  %v1658_v21 = vmax.f32 %v1338_v31, %v1512_v52 }
 0x234   : > { %10139 = vst [vmem:[#allocation54_spill] sm:$0xff] %v8193_v43  ;;  %v1092_v26 = vsel %vm1089_vm12, %v1091_v62, %v1087_v29  ;;  %v3923_v25 = vmax.f32 %v3891_v32, %v7907_v59  ;;  %v8202_v43 = vld [vmem:[#allocation2 + $0x1f8] sm:$0xff]  ;;  %v8206_v55 = vmax.f32 %v7406_v60, %v10141_v53  ;;  %v2507_v3 = vrot.slane %v8175_v8, 4  ;;  %2332 = vmatpush.msrb.mxu2 %v1367_v1 }
 0x235   : > { %v8209_v27 = vmul.f32 %v1092_v26, %v8022_v63  ;;  %v1514_v47 = vsel %vm1436_vm7, %v1512_v52, %v1513_v38  ;;  %v1103_v20 = vand.u32 2147483647, %v8170_v7  ;;  %v2508_v24 = vrot.slane %v8181_v2, 4 }
 0x236   : > { %10142 = vst [vmem:[#allocation62_spill] sm:$0xff] %v8206_v55  ;;  %v3955_v32 = vmax.f32 %v3923_v25, %v8066_v41  ;;  %v1659_v50 = vmax.f32 %v8175_v8, %v1514_v47  ;;  %v2653_v60 = vmax.f32 %v1338_v31, %v2507_v3  ;;  %v3388_v63 = vrot.slane %v8175_v8, 6  ;;  %2333 = vmatpush.msrb.mxu2 %v1366_v44 }
 0x237   : > { %10143 = vst [vmem:[#allocation67_spill] sm:$0xff] %v8209_v27  ;;  %v5506_v62 = vpop.eup %5505  ;;  %v3389_v53 = vrot.slane %v8181_v2, 6  ;;  %v1515_v52 = vrot.slane %v8202_v43, 2  ;;  %v1821_v29 = vrot.slane %v1658_v21, 7  ;;  %v1105_v47 = vand.u32 2147483648, %v8170_v7 }
 0x238   : > { %1275 = vst.msk [vmem:[#allocation2 + $0x230] sm:$0xff] %vm1156_vm1, %v8209_v27  ;;  %v1095_v11 = vmul.f32 %v5506_v62, %v8170_v7  ;;  %v3987_v1 = vmax.f32 %v3955_v32, %v8199_v56  ;;  %v1822_v26 = vrot.slane %v1659_v50, 7  ;;  %v5508_v25 = vpop.eup %5507  ;;  %v2509_v14 = vsel %vm2431_vm14, %v2507_v3, %v2508_v24 }
 0x239   : > { %v3390_v27 = vsel %vm2740_vm6, %v3388_v63, %v3389_v53  ;;  %v3534_v0 = vmax.f32 %v1338_v31, %v3388_v63  ;;  %v8228_v15 = vadd.f32 1.0, %v5508_v25  ;;  %v2654_v17 = vmax.f32 %v8175_v8, %v2509_v14 }
 0x23a   : > { %v1096_v9 = vsub.f32 1.0, %v1095_v11  ;;  %5243 = vmatmul.msk.f32.gmra.mxu1 %vm1156_vm1, %v3987_v1  ;;  %v1823_v44 = vsel %vm1745_vm10, %v1821_v29, %v1822_v26  ;;  %v1966_v32 = vmax.f32 %v7948_v35, %v8088_v54  ;;  %v3535_v3 = vmax.f32 %v8175_v8, %v3390_v27 }
 0x23b   : > { %v8233_v21 = vmax.f32 %v8175_v8, %v1823_v44  ;;  %v1516_v50 = vsel %vm1436_vm7, %v1513_v38, %v1515_v52  ;;  %vm1100_vm13 = vweird.f32 %v5506_v62  ;;  %5509 = vrcp.f32 %v8228_v15 }
 0x23c   : > { %v1097_v31 = vmul.f32 %v5506_v62, %v1096_v9  ;;  %v2816_v63 = vrot.slane %v2653_v60, 6  ;;  %v2817_v1 = vrot.slane %v2654_v17, 6  ;;  %v3697_v29 = vrot.slane %v3534_v0, 5 }
 0x23d   : > { %v1998_v11 = vmax.f32 %v1966_v32, %v8233_v21  ;;  %v8241_v14 = vrot.slane %v3535_v3, 5  ;;  %vm1099_vm15 = vweird.f32 %v8170_v7  ;;  %vm1104_vm2 = vcmp.eq.f32.partialorder %v1103_v20, 8.507059e+37 }
 0x23e   : > { %v1098_v25 = vadd.f32 %v5506_v62, %v1097_v31  ;;  %v1660_v35 = vmax.f32 %v8181_v2, %v1516_v50  ;;  %vm1101_vm4 = vmor %vm1099_vm15, %vm1100_vm13  ;;  %v1106_v8 = vor.u32 1.1754944e-38, %v1105_v47  ;;  %v2818_v9 = vsel %vm2740_vm6, %v2816_v63, %v2817_v1  ;;  %v8266_v31 = vld [vmem:[#allocation2 + $0x208] sm:$0xff] }
 0x23f   : > { %5162 = vmatmul.msk.f32.gmra.mxu2 %vm1156_vm1, %v1998_v11  ;;  %v8249_v38 = vsel %vm3621_vm3, %v3697_v29, %v8241_v14  ;;  %v2510_v0 = vrot.slane %v8202_v43, 4  ;;  %v8253_v27 = vmax.f32 %v8233_v21, %v2818_v9  ;;  %v3391_v20 = vrot.slane %v8202_v43, 6  ;;  %v10145_v29 = vld [vmem:[#allocation57_spill] sm:$0xff]  ;;  %v8285_v9 = vld [vmem:[#allocation2 + $0x210] sm:$0xff] }
 0x240   : > { %v1102_v17 = vsel %vm1101_vm4, %v5506_v62, %v1098_v25  ;;  %v1824_v7 = vrot.slane %v1660_v35, 7  ;;  %vm1114_vm5 = vweird.f32 %v8228_v15  ;;  %v1118_v52 = vand.u32 2147483647, %v8228_v15  ;;  %v10146_v25 = vld [vmem:[#allocation65_spill] sm:$0xff] }
 0x241   : > { %v1107_v60 = vsel %vm1104_vm2, %v1106_v8, %v1102_v17  ;;  %v2511_v47 = vsel %vm2431_vm14, %v2508_v24, %v2510_v0  ;;  %v5510_v44 = vpop.eup %5509  ;;  %v3828_v50 = vmax.f32 %v7638_v36, %v7641_v30  ;;  %v1967_v24 = vmax.f32 %v8034_v45, %v8173_v48  ;;  %v1342_v17 = vld [vmem:[#allocation2 + $0x200] sm:$0xff] }
 0x242   : > { %v8260_v32 = vmul.f32 %v1107_v60, %v8107_v6  ;;  %v1825_v3 = vsel %vm1745_vm10, %v1822_v26, %v1824_v7  ;;  %v2655_v62 = vmax.f32 %v8181_v2, %v2511_v47  ;;  %v1110_v43 = vmul.f32 %v5510_v44, %v8228_v15 }
 0x243   : > { %v8270_v63 = vmax.f32 %v8181_v2, %v1825_v3  ;;  %v8275_v6 = vsel %vm2740_vm6, %v3389_v53, %v3391_v20  ;;  %v3860_v11 = vmax.f32 %v3828_v50, %v7040_v28  ;;  %v10147_v35 = vmax.f32 %v10145_v29, %v10146_v25  ;;  %v10150_v3 = vld [vmem:[#allocation63_spill] sm:$0xff]  ;;  %v3070_v50 = vld [vmem:[#allocation6 + $0x50] sm:$0xff]  ;;  %v10151_v29 = vld [vmem:[#allocation12_spill] sm:$0xff] }
 0x244   : > { %10144 = vst [vmem:[#allocation80_spill] sm:$0xff] %v8260_v32  ;;  %v2819_v26 = vrot.slane %v2655_v62, 6  ;;  %v1111_v0 = vsub.f32 1.0, %v1110_v43  ;;  %v1120_v45 = vand.u32 2147483648, %v8228_v15  ;;  %v1517_v7 = vrot.slane %v8266_v31, 2  ;;  %v10152_v25 = vld [vmem:[#allocation64_spill] sm:$0xff]  ;;  %3181 = vmatpush.msrb.mxu3 %v3070_v50 }
 0x245   : > { %1276 = vst.msk [vmem:[#allocation2 + $0x248] sm:$0xff] %vm1156_vm1, %v8260_v32  ;;  %v3675_v8 = vrot.slane %v10147_v35, 5  ;;  %v1999_v53 = vmax.f32 %v1967_v24, %v8270_v63  ;;  %vm8290_vm8 = vcmp.eq.f32.partialorder %v1118_v52, 8.507059e+37  ;;  %v3892_v47 = vmax.f32 %v3860_v11, %v7858_v10 }
 0x246   : > { %v2820_v60 = vsel %vm2740_vm6, %v2817_v1, %v2819_v26  ;;  %v1112_v43 = vmul.f32 %v5510_v44, %v1111_v0  ;;  %vm1115_vm9 = vweird.f32 %v5510_v44  ;;  %v1518_v52 = vrot.slane %v8285_v9, 2 }
 0x247   : > { %v3676_v62 = vsel %vm3621_vm3, %v10150_v3, %v3675_v8  ;;  %5163 = vmatmul.msk.f32.vlgmr.msra.gmra.mxu3 %vm1156_vm1, %v1999_v53  ;;  %v8300_v24 = vmax.f32 %v8270_v63, %v2820_v60  ;;  %5172 = vmatmul.msk.f32.vlgmr.msrb.gmra.mxu2 %vm1156_vm1, %v10151_v29  ;;  %v8307_v1 = vmax.f32 %v8186_v40, %v10152_v25  ;;  %v2512_v53 = vrot.slane %v8266_v31, 4  ;;  %vm1116_vm11 = vmor %vm1114_vm5, %vm1115_vm9 }
 0x248   : > { %v3924_v26 = vmax.f32 %v3892_v47, %v7963_v5  ;;  %v3829_v11 = vmax.f32 %v7793_v33, %v7796_v46  ;;  %v1661_v35 = vmax.f32 %v1342_v17, %v1517_v7  ;;  %v1113_v8 = vadd.f32 %v5510_v44, %v1112_v43 }
 0x249   : > { %v1519_v0 = vsel %vm1436_vm7, %v1517_v7, %v1518_v52  ;;  %v2513_v60 = vrot.slane %v8285_v9, 4  ;;  %v1121_v3 = vor.u32 1.1754944e-38, %v1120_v45  ;;  %v2656_v43 = vmax.f32 %v1342_v17, %v2512_v53  ;;  %v10153_v45 = vld [vmem:[#allocation70_spill] sm:$0xff] }
 0x24a   : > { %v3956_v29 = vmax.f32 %v3924_v26, %v8129_v61  ;;  %v3861_v47 = vmax.f32 %v3829_v11, %v7801_v34  ;;  %v1662_v25 = vmax.f32 %v8266_v31, %v1519_v0  ;;  %v1117_v33 = vsel %vm1116_vm11, %v5510_v44, %v1113_v8  ;;  %v8333_v8 = vld [vmem:[#allocation2 + $0x218] sm:$0xff] }
 0x24b   : > { %v2514_v50 = vsel %vm2431_vm14, %v2512_v53, %v2513_v60  ;;  %v9908_v7 = vrot.slane %v8266_v31, 6  ;;  %v1122_v36 = vsel %vm8290_vm8, %v1121_v3, %v1117_v33  ;;  %v1826_v15 = vrot.slane %v1661_v35, 7 }
 0x24c   : > { %v3988_v32 = vmax.f32 %v3956_v29, %v8307_v1  ;;  %v1827_v40 = vrot.slane %v1662_v25, 7  ;;  %v8327_v26 = vmax.f32 %v10094_v22, %v10153_v45  ;;  %v8330_v11 = vmul.f32 %v1122_v36, %v8167_v49 }
 0x24d   : > { %v2657_v44 = vmax.f32 %v8266_v31, %v2514_v50  ;;  %v3893_v20 = vmax.f32 %v3861_v47, %v7907_v59  ;;  %v1968_v35 = vmax.f32 %v8088_v54, %v8233_v21  ;;  %v8342_v22 = vmax.f32 %v1342_v17, %v9908_v7  ;;  %v8361_v50 = vld [vmem:[#allocation2 + $0x228] sm:$0xff] }
 0x24e   : > { %10154 = vst [vmem:[#allocation57_spill] sm:$0xff] %v8327_v26  ;;  %5244 = vmatmul.msk.f32.gmra.mxu1 %vm1156_vm1, %v3988_v32  ;;  %v1828_v0 = vsel %vm1745_vm10, %v1826_v15, %v1827_v40  ;;  %v2821_v36 = vrot.slane %v2656_v43, 6  ;;  %v10156_v32 = vld [vmem:[#allocation13_spill] sm:$0xff]  ;;  %v3830_v3 = vmax.f32 %v7641_v30, %v7040_v28  ;;  %v8354_v54 = vmax.f32 %v8206_v55, %v3676_v62  ;;  %v8363_v43 = vld [vmem:[#allocation2 + $0x230] sm:$0xff] }
 0x24f   : > { %10155 = vst [vmem:[#allocation65_spill] sm:$0xff] %v8330_v11  ;;  %v8347_v49 = vmax.f32 %v8266_v31, %v1828_v0  ;;  %v2822_v53 = vrot.slane %v2657_v44, 6  ;;  %5173 = vmatmul.msk.f32.gmra.mxu2 %vm1156_vm1, %v10156_v32  ;;  %v3925_v17 = vmax.f32 %v3893_v20, %v8066_v41  ;;  %v1520_v29 = vrot.slane %v8333_v8, 2  ;;  %v10157_v44 = vld [vmem:[#allocation72_spill] sm:$0xff] }
 0x250   : > { %1277 = vst.msk [vmem:[#allocation2 + $0x250] sm:$0xff] %vm1156_vm1, %v8330_v11  ;;  %v3862_v33 = vmax.f32 %v3830_v3, %v7858_v10  ;;  %v2515_v45 = vrot.slane %v8333_v8, 4  ;;  %v8374_v20 = vmax.f32 %v8327_v26, %v10157_v44  ;;  %v8381_v3 = vld [vmem:[#allocation2 + $0x220] sm:$0xff]  ;;  %v10160_v11 = vld [vmem:[#allocation14_spill] sm:$0xff] }
 0x251   : > { %v2000_v47 = vmax.f32 %v1968_v35, %v8347_v49  ;;  %v2823_v25 = vsel %vm2740_vm6, %v2821_v36, %v2822_v53  ;;  %v3957_v15 = vmax.f32 %v3925_v17, %v8199_v56  ;;  %v1521_v62 = vsel %vm1436_vm7, %v1518_v52, %v1520_v29 }
 0x252   : > { %v8367_v30 = vmax.f32 %v8347_v49, %v2823_v25  ;;  %v3894_v0 = vmax.f32 %v3862_v33, %v7963_v5  ;;  %v1663_v35 = vmax.f32 %v8285_v9, %v1521_v62  ;;  %v10158_v36 = vmax.f32 %v7395_v58, %v7659_v12  ;;  %v10159_v62 = vld [vmem:[#allocation71_spill] sm:$0xff] }
 0x253   : > { %5164 = vmatmul.msk.f32.gmra.mxu3 %vm1156_vm1, %v2000_v47  ;;  %v3989_v52 = vmax.f32 %v3957_v15, %v8354_v54  ;;  %v2516_v17 = vsel %vm2431_vm14, %v2513_v60, %v2515_v45  ;;  %v1522_v29 = vrot.slane %v8361_v50, 2  ;;  %v1523_v47 = vrot.slane %v8363_v43, 2  ;;  %v3069_v15 = vld [vmem:[#allocation6 + $0x48] sm:$0xff] }
 0x254   : > { %v3680_v32 = vrot.slane %v10158_v36, 5  ;;  %v3926_v25 = vmax.f32 %v3894_v0, %v8129_v61  ;;  %v1829_v44 = vrot.slane %v1663_v35, 7  ;;  %v2658_v33 = vmax.f32 %v8285_v9, %v2516_v17  ;;  %3182 = vmatpush.msrb.mxu3 %v3069_v15 }
 0x255   : > { %v1524_v58 = vsel %vm1436_vm7, %v1522_v29, %v1523_v47  ;;  %v1664_v12 = vmax.f32 %v8381_v3, %v1522_v29 }
 0x256   : > { %v3681_v7 = vsel %vm3621_vm3, %v10159_v62, %v3680_v32  ;;  %5245 = vmatmul.msk.f32.gmra.mxu1 %vm1156_vm1, %v3989_v52  ;;  %v3958_v60 = vmax.f32 %v3926_v25, %v8307_v1  ;;  %v1830_v45 = vsel %vm1745_vm10, %v1827_v40, %v1829_v44  ;;  %v2824_v36 = vrot.slane %v2658_v33, 6 }
 0x257   : > { %5174 = vmatmul.msk.f32.gmra.mxu2 %vm1156_vm1, %v10160_v11  ;;  %v1665_v0 = vmax.f32 %v8361_v50, %v1524_v58  ;;  %v8400_v35 = vmax.f32 %v8285_v9, %v1830_v45  ;;  %v1969_v32 = vmax.f32 %v8173_v48, %v8270_v63  ;;  %v3831_v52 = vmax.f32 %v7796_v46, %v7801_v34  ;;  %v8415_v58 = vld [vmem:[#allocation2 + $0x238] sm:$0xff] }
 0x258   : > { %v1831_v17 = vrot.slane %v1664_v12, 7  ;;  %v3990_v29 = vmax.f32 %v3958_v60, %v8374_v20  ;;  %v2825_v40 = vsel %vm2740_vm6, %v2822_v53, %v2824_v36  ;;  %v2517_v11 = vrot.slane %v8361_v50, 4 }
 0x259   : > { %v1832_v25 = vrot.slane %v1665_v0, 7  ;;  %v2001_v44 = vmax.f32 %v1969_v32, %v8400_v35  ;;  %v8411_v33 = vmax.f32 %v8400_v35, %v2825_v40  ;;  %v3863_v62 = vmax.f32 %v3831_v52, %v7907_v59 }
 0x25a   : > { %v2518_v48 = vrot.slane %v8363_v43, 4  ;;  %v2659_v12 = vmax.f32 %v8381_v3, %v2517_v11  ;;  %v3832_v45 = vmax.f32 %v7040_v28, %v7858_v10  ;;  %v1525_v0 = vrot.slane %v8415_v58, 2 }
 0x25b   : > { %v1833_v46 = vsel %vm1745_vm10, %v1831_v17, %v1832_v25  ;;  %5165 = vmatmul.msk.f32.gmra.mxu3 %vm1156_vm1, %v2001_v44  ;;  %v3895_v53 = vmax.f32 %v3863_v62, %v8066_v41  ;;  %v8431_v32 = vmax.f32 %v7700_v39, %v3681_v7  ;;  %v1970_v17 = vmax.f32 %v8233_v21, %v8347_v49  ;;  %v10161_v62 = vld [vmem:[#allocation15_spill] sm:$0xff]  ;;  %v8449_v39 = vld [vmem:[#allocation2 + $0x250] sm:$0xff] }
 0x25c   : > { %v8422_v15 = vmax.f32 %v8361_v50, %v1833_v46  ;;  %v2519_v60 = vsel %vm2431_vm14, %v2517_v11, %v2518_v48  ;;  %v3864_v40 = vmax.f32 %v3832_v45, %v7963_v5  ;;  %v8437_v11 = vld [vmem:[#allocation2 + $0x248] sm:$0xff]  ;;  %v2826_v44 = vrot.slane %v2659_v12, 6 }
 0x25d   : > { %v2660_v36 = vmax.f32 %v8361_v50, %v2519_v60  ;;  %v3927_v52 = vmax.f32 %v3895_v53, %v8199_v56  ;;  %v1526_v46 = vsel %vm1436_vm7, %v1523_v47, %v1525_v0  ;;  %v10162_v21 = vmax.f32 %v7782_v13, %v7878_v51  ;;  %v8454_v0 = vld [vmem:[#allocation2 + $0x240] sm:$0xff] }
 0x25e   : > { %5246 = vmatmul.msk.f32.gmra.mxu1 %vm1156_vm1, %v3990_v29  ;;  %v2520_v29 = vrot.slane %v8415_v58, 4  ;;  %v2002_v7 = vmax.f32 %v1970_v17, %v8422_v15  ;;  %v3896_v53 = vmax.f32 %v3864_v40, %v8129_v61  ;;  %v1666_v60 = vmax.f32 %v8363_v43, %v1526_v46 }
 0x25f   : > { %v2827_v28 = vrot.slane %v2660_v36, 6  ;;  %5175 = vmatmul.msk.f32.gmra.mxu2 %vm1156_vm1, %v10161_v62  ;;  %v3685_v45 = vrot.slane %v10162_v21, 5  ;;  %v3959_v12 = vmax.f32 %v3927_v52, %v8354_v54  ;;  %v1527_v17 = vrot.slane %v8437_v11, 2 }
 0x260   : > { %v2521_v47 = vsel %vm2431_vm14, %v2518_v48, %v2520_v29  ;;  %v3928_v62 = vmax.f32 %v3896_v53, %v8307_v1  ;;  %v1834_v46 = vrot.slane %v1666_v60, 7 }
 0x261   : > { %v2828_v36 = vsel %vm2740_vm6, %v2826_v44, %v2827_v28  ;;  %v2661_v13 = vmax.f32 %v8363_v43, %v2521_v47  ;;  %v3991_v51 = vmax.f32 %v3959_v12, %v8431_v32  ;;  %v3686_v52 = vsel %vm3621_vm3, %v7852_v42, %v3685_v45  ;;  %v8477_v12 = vld [vmem:[#allocation2 + $0x258] sm:$0xff] }
 0x262   : > { %v8458_v40 = vmax.f32 %v8422_v15, %v2828_v36  ;;  %v1528_v44 = vrot.slane %v8449_v39, 2  ;;  %v3960_v48 = vmax.f32 %v3928_v62, %v8374_v20  ;;  %v1835_v29 = vsel %vm1745_vm10, %v1832_v25, %v1834_v46  ;;  %v10164_v62 = vld [vmem:[#allocation16_spill] sm:$0xff]  ;;  %v8489_v46 = vpop.f32.mrf.mxu1 }
 0x263   : > { %5166 = vmatmul.msk.f32.gmra.mxu3 %vm1156_vm1, %v2002_v7  ;;  %v2829_v21 = vrot.slane %v2661_v13, 6  ;;  %v1667_v36 = vmax.f32 %v8454_v0, %v1527_v17  ;;  %v8471_v53 = vmax.f32 %v8363_v43, %v1835_v29  ;;  %v3068_v7 = vld [vmem:[#allocation6 + $0x40] sm:$0xff]  ;;  %v8481_v25 = vmax.f32 %v7850_v57, %v7865_v37  ;;  %10165 = vst [vmem:[#allocation12_spill] sm:$0xff] %v8489_v46 }
 0x264   : > { %v1529_v60 = vsel %vm1436_vm7, %v1527_v17, %v1528_v44  ;;  %v2522_v17 = vrot.slane %v8437_v11, 4  ;;  %3183 = vmatpush.msrb.mxu3 %v3068_v7  ;;  %v2523_v29 = vrot.slane %v8449_v39, 4  ;;  %v10166_v37 = vmax.f32 %v7891_v4, %v8001_v23 }
 0x265   : > { %v2830_v42 = vsel %vm2740_vm6, %v2827_v28, %v2829_v21  ;;  %v1668_v45 = vmax.f32 %v8437_v11, %v1529_v60  ;;  %v1971_v28 = vmax.f32 %v8270_v63, %v8400_v35  ;;  %v1836_v13 = vrot.slane %v1667_v36, 7 }
 0x266   : > { %5247 = vmatmul.msk.f32.gmra.mxu1 %vm1156_vm1, %v3991_v51  ;;  %v8484_v47 = vmax.f32 %v8471_v53, %v2830_v42  ;;  %v3690_v21 = vrot.slane %v10166_v37, 5  ;;  %v3833_v60 = vmax.f32 %v7801_v34, %v7907_v59  ;;  %v2662_v42 = vmax.f32 %v8454_v0, %v2522_v17 }
 0x267   : > { %5176 = vmatmul.msk.f32.gmra.mxu2 %vm1156_vm1, %v10164_v62  ;;  %v1837_v51 = vrot.slane %v1668_v45, 7  ;;  %v1530_v7 = vrot.slane %v8477_v12, 2  ;;  %v2003_v62 = vmax.f32 %v1971_v28, %v8471_v53  ;;  %v2524_v63 = vsel %vm2431_vm14, %v2522_v17, %v2523_v29 }
 0x268   : > { %10163 = vst [vmem:[#allocation63_spill] sm:$0xff] %v8484_v47  ;;  %v3834_v36 = vmax.f32 %v7858_v10, %v7963_v5  ;;  %v3992_v45 = vmax.f32 %v3960_v48, %v8481_v25  ;;  %v8508_v23 = vmax.f32 %v7915_v16, %v3686_v52  ;;  %v3865_v34 = vmax.f32 %v3833_v60, %v8066_v41  ;;  %v8521_v60 = vld [vmem:[#allocation2 + $0x268] sm:$0xff] }
 0x269   : > { %v1838_v46 = vsel %vm1745_vm10, %v1836_v13, %v1837_v51  ;;  %v2663_v4 = vmax.f32 %v8437_v11, %v2524_v63  ;;  %v1531_v17 = vsel %vm1436_vm7, %v1528_v44, %v1530_v7  ;;  %v2525_v10 = vrot.slane %v8477_v12, 4  ;;  %v8532_v7 = vld [vmem:[#allocation2 + $0x270] sm:$0xff] }
 0x26a   : > { %v8514_v28 = vmax.f32 %v8437_v11, %v1838_v46  ;;  %v3866_v13 = vmax.f32 %v3834_v36, %v8129_v61  ;;  %v3897_v48 = vmax.f32 %v3865_v34, %v8199_v56  ;;  %v2831_v37 = vrot.slane %v2662_v42, 6  ;;  %v10167_v34 = vld [vmem:[#allocation17_spill] sm:$0xff] }
 0x26b   : > { %5167 = vmatmul.msk.f32.gmra.mxu3 %vm1156_vm1, %v2003_v62  ;;  %v2832_v52 = vrot.slane %v2663_v4, 6  ;;  %v1669_v16 = vmax.f32 %v8449_v39, %v1531_v17  ;;  %v1972_v46 = vmax.f32 %v8347_v49, %v8422_v15  ;;  %v2526_v63 = vsel %vm2431_vm14, %v2523_v29, %v2525_v10  ;;  %v8539_v4 = vld [vmem:[#allocation2 + $0x260] sm:$0xff] }
 0x26c   : > { %v3898_v62 = vmax.f32 %v3866_v13, %v8307_v1  ;;  %v8530_v44 = vsel %vm3621_vm3, %v7977_v19, %v3690_v21  ;;  %v3929_v42 = vmax.f32 %v3897_v48, %v8354_v54  ;;  %v2664_v49 = vmax.f32 %v8449_v39, %v2526_v63  ;;  %10168 = vst [vmem:[#allocation64_spill] sm:$0xff] %v8539_v4  ;;  %v8541_v13 = vpop.f32.mrf.mxu1 }
 0x26d   : > { %v2833_v36 = vsel %vm2740_vm6, %v2831_v37, %v2832_v52  ;;  %10169 = vst [vmem:[#allocation70_spill] sm:$0xff] %v8541_v13  ;;  %v2004_v29 = vmax.f32 %v1972_v46, %v8514_v28  ;;  %v1532_v17 = vrot.slane %v8521_v60, 2  ;;  %v2527_v13 = vrot.slane %v8521_v60, 4 }
 0x26e   : > { %5248 = vmatmul.msk.f32.gmra.mxu1 %vm1156_vm1, %v3992_v45  ;;  %v1839_v45 = vrot.slane %v1669_v16, 7  ;;  %v8545_v19 = vmax.f32 %v8514_v28, %v2833_v36  ;;  %v3930_v21 = vmax.f32 %v3898_v62, %v8374_v20  ;;  %v2834_v48 = vrot.slane %v2664_v49, 6 }
 0x26f   : > { %5177 = vmatmul.msk.f32.gmra.mxu2 %vm1156_vm1, %v10167_v34  ;;  %v1533_v16 = vrot.slane %v8532_v7, 2  ;;  %v3961_v63 = vmax.f32 %v3929_v42, %v8431_v32  ;;  %v1670_v46 = vmax.f32 %v8539_v4, %v1532_v17  ;;  %v8566_v42 = vld [vmem:[#allocation2 + $0x278] sm:$0xff] }
 0x270   : > { %10170 = vst [vmem:[#allocation13_spill] sm:$0xff] %v8545_v19  ;;  %v1840_v10 = vsel %vm1745_vm10, %v1837_v51, %v1839_v45  ;;  %v2835_v36 = vsel %vm2740_vm6, %v2832_v52, %v2834_v48  ;;  %v2528_v51 = vrot.slane %v8532_v7, 4  ;;  %v10172_v48 = vld [vmem:[#allocation48_spill] sm:$0xff] }
 0x271   : > { %v8554_v34 = vmax.f32 %v8449_v39, %v1840_v10  ;;  %v1534_v62 = vsel %vm1436_vm7, %v1532_v17, %v1533_v16  ;;  %v3993_v45 = vmax.f32 %v3961_v63, %v8508_v23  ;;  %v1841_v37 = vrot.slane %v1670_v46, 7 }
 0x272   : > { %v1671_v10 = vmax.f32 %v8521_v60, %v1534_v62  ;;  %v2529_v52 = vsel %vm2431_vm14, %v2527_v13, %v2528_v51  ;;  %v2665_v17 = vmax.f32 %v8539_v4, %v2527_v13  ;;  %v10173_v57 = vmax.f32 %v8041_v18, %v10172_v48  ;;  %v10176_v62 = vld [vmem:[#allocation24_spill] sm:$0xff]  ;;  %v10178_v4 = vld [vmem:[#allocation18_spill] sm:$0xff] }
 0x273   : > { %5168 = vmatmul.msk.f32.gmra.mxu3 %vm1156_vm1, %v2004_v29  ;;  %v8564_v49 = vmax.f32 %v8554_v34, %v2835_v36  ;;  %v10174_v63 = vrot.slane %v8285_v9, 6  ;;  %v10175_v29 = vrot.slane %v8266_v31, 6  ;;  %v2666_v55 = vmax.f32 %v8521_v60, %v2529_v52 }
 0x274   : > { %v3695_v26 = vrot.slane %v10173_v57, 5  ;;  %v3836_v46 = vmax.f32 %v7963_v5, %v8129_v61  ;;  %v1842_v57 = vrot.slane %v1671_v10, 7  ;;  %v2836_v18 = vrot.slane %v2665_v17, 6  ;;  %v8599_v10 = vpop.f32.mrf.mxu1 }
 0x275   : > { %10171 = vst [vmem:[#allocation72_spill] sm:$0xff] %v8564_v49  ;;  %v3395_v36 = vsel %vm2740_vm6, %v10175_v29, %v10174_v63  ;;  %v10177_v49 = vld [vmem:[#allocation31_spill] sm:$0xff]  ;;  %v1535_v48 = vrot.slane %v8566_v42, 2  ;;  %v1973_v63 = vmax.f32 %v8400_v35, %v8471_v53  ;;  %v2837_v52 = vrot.slane %v2666_v55, 6 }
 0x276   : > { %5249 = vmatmul.msk.f32.gmra.mxu1 %vm1156_vm1, %v3993_v45  ;;  %v8585_v13 = vmax.f32 %v10177_v49, %v10176_v62  ;;  %v3835_v45 = vmax.f32 %v7907_v59, %v8066_v41  ;;  %v3868_v5 = vmax.f32 %v3836_v46, %v8307_v1  ;;  %v3962_v29 = vmax.f32 %v3930_v21, %v8481_v25  ;;  %v10181_v46 = vld [vmem:[#allocation40_spill] sm:$0xff] }
 0x277   : > { %5178 = vmatmul.msk.f32.gmra.mxu2 %vm1156_vm1, %v10178_v4  ;;  %v1843_v62 = vsel %vm1745_vm10, %v1841_v37, %v1842_v57  ;;  %v1536_v49 = vsel %vm1436_vm7, %v1533_v16, %v1535_v48  ;;  %v2530_v4 = vrot.slane %v8566_v42, 4  ;;  %10179 = vst [vmem:[#allocation71_spill] sm:$0xff] %v8599_v10  ;;  %v2005_v17 = vmax.f32 %v1973_v63, %v8554_v34 }
 0x278   : > { %v1938_v35 = vmax.f32 %v8521_v60, %v1843_v62  ;;  %v2838_v47 = vsel %vm2740_vm6, %v2836_v18, %v2837_v52  ;;  %v3900_v59 = vmax.f32 %v3868_v5, %v8374_v20  ;;  %v10180_v55 = vmax.f32 %v8181_v2, %v8275_v6  ;;  %v8617_v5 = vpop.f32.mrf.mxu2 }
 0x279   : > { %v1672_v37 = vmax.f32 %v8532_v7, %v1536_v49  ;;  %v2531_v16 = vsel %vm2431_vm14, %v2528_v51, %v2530_v4  ;;  %v3696_v48 = vsel %vm3621_vm3, %v10181_v46, %v3695_v26  ;;  %v3994_v10 = vmax.f32 %v3962_v29, %v8585_v13  ;;  %10183 = vst [vmem:[#allocation15_spill] sm:$0xff] %v8617_v5  ;;  %v10185_v4 = vld [vmem:[#allocation19_spill] sm:$0xff] }
 0x27a   : > { %v3700_v21 = vrot.slane %v10180_v55, 5  ;;  %v3867_v63 = vmax.f32 %v3835_v45, %v8199_v56  ;;  %v8615_v18 = vmax.f32 %v1938_v35, %v2838_v47  ;;  %v2667_v2 = vmax.f32 %v8532_v7, %v2531_v16  ;;  %v10184_v47 = vld [vmem:[#allocation46_spill] sm:$0xff] }
 0x27b   : > { %5169 = vmatmul.msk.f32.gmra.mxu3 %vm1156_vm1, %v2005_v17  ;;  %v3538_v6 = vmax.f32 %v8266_v31, %v3395_v36  ;;  %v1844_v49 = vrot.slane %v1672_v37, 7  ;;  %v1974_v26 = vmax.f32 %v8422_v15, %v8514_v28  ;;  %v3838_v45 = vmax.f32 %v8129_v61, %v8307_v1 }
 0x27c   : > { %10182 = vst [vmem:[#allocation14_spill] sm:$0xff] %v8615_v18  ;;  %v3899_v51 = vmax.f32 %v3867_v63, %v8354_v54  ;;  %v2839_v29 = vrot.slane %v2667_v2, 6  ;;  %v8629_v62 = vmax.f32 %v10184_v47, %v8530_v44  ;;  %v8636_v36 = vsel %vm3621_vm3, %v8241_v14, %v3700_v21  ;;  %v8645_v16 = vpop.f32.mrf.mxu1  ;;  %v10189_v63 = vld [vmem:[#allocation20_spill] sm:$0xff]  ;;  %v10191_v2 = vld [vmem:[#allocation49_spill] sm:$0xff] }
 0x27d   : > { %v1845_v31 = vsel %vm1745_vm10, %v1842_v57, %v1844_v49  ;;  %v3870_v61 = vmax.f32 %v3838_v45, %v8374_v20  ;;  %v3703_v17 = vrot.slane %v3538_v6, 5  ;;  %v2006_v55 = vmax.f32 %v1974_v26, %v1938_v35  ;;  %10187 = vst [vmem:[#allocation17_spill] sm:$0xff] %v8645_v16  ;;  %v10193_v45 = vld [vmem:[#allocation75_spill] sm:$0xff] }
 0x27e   : > { %5250 = vmatmul.msk.f32.gmra.mxu1 %vm1156_vm1, %v3994_v10  ;;  %v3931_v10 = vmax.f32 %v3899_v51, %v8431_v32  ;;  %v1939_v15 = vmax.f32 %v8532_v7, %v1845_v31  ;;  %v2840_v28 = vsel %vm2740_vm6, %v2837_v52, %v2839_v29  ;;  %v3702_v57 = vrot.slane %v8342_v22, 5  ;;  %v10190_v22 = vld [vmem:[#allocation45_spill] sm:$0xff]  ;;  %v10192_v29 = vld [vmem:[#allocation43_spill] sm:$0xff] }
 0x27f   : > { %5179 = vmatmul.msk.f32.gmra.mxu2 %vm1156_vm1, %v10185_v4  ;;  %v1975_v52 = vmax.f32 %v8471_v53, %v8554_v34  ;;  %v8662_v6 = vmax.f32 %v10191_v2, %v10190_v22  ;;  %v3932_v49 = vmax.f32 %v3900_v59, %v8481_v25  ;;  %v3396_v51 = vrot.slane %v8333_v8, 6  ;;  %v10195_v59 = vld [vmem:[#allocation44_spill] sm:$0xff]  ;;  %v10199_v22 = vld [vmem:[#allocation50_spill] sm:$0xff] }
 0x280   : > { %v3963_v44 = vmax.f32 %v3931_v10, %v8508_v23  ;;  %v8643_v37 = vmax.f32 %v1939_v15, %v2840_v28  ;;  %v8653_v21 = vpop.f32.mrf.mxu2  ;;  %v3704_v46 = vsel %vm3621_vm3, %v3702_v57, %v3703_v17  ;;  %v3837_v26 = vmax.f32 %v8066_v41, %v8199_v56 }
 0x281   : > { %10188 = vst [vmem:[#allocation48_spill] sm:$0xff] %v8653_v21  ;;  %v3964_v53 = vmax.f32 %v3932_v49, %v8585_v13  ;;  %v2007_v34 = vmax.f32 %v1975_v52, %v1939_v15  ;;  %v2939_v4 = vmax.f32 %v10193_v45, %v10192_v29  ;;  %v10201_v45 = vld [vmem:[#allocation36_spill] sm:$0xff] }
 0x282   : > { %10186 = vst [vmem:[#allocation16_spill] sm:$0xff] %v8643_v37  ;;  %v3995_v14 = vmax.f32 %v3963_v44, %v8629_v62  ;;  %v3869_v10 = vmax.f32 %v3837_v26, %v8354_v54  ;;  %v10196_v44 = vrot.slane %v8285_v9, 6 }
 0x283   : > { %5170 = vmatmul.msk.f32.gmra.mxu3 %vm1156_vm1, %v2006_v55  ;;  %v3996_v31 = vmax.f32 %v3964_v53, %v8662_v6  ;;  %v2971_v15 = vmax.f32 %v2939_v4, %v10195_v59  ;;  %v10197_v55 = vld [vmem:[#allocation21_spill] sm:$0xff] }
 0x284   : > { %v8674_v28 = vpop.f32.mrf.mxu1  ;;  %v3901_v8 = vmax.f32 %v3869_v10, %v8431_v32  ;;  %v3397_v41 = vsel %vm2740_vm6, %v10196_v44, %v3396_v51  ;;  %v10202_v51 = vld [vmem:[#allocation42_spill] sm:$0xff]  ;;  %v3398_v44 = vrot.slane %v8361_v50, 6 }
 0x285   : > { %10194 = vst [vmem:[#allocation24_spill] sm:$0xff] %v8674_v28  ;;  %v3539_v57 = vmax.f32 %v8285_v9, %v3397_v41  ;;  %v3003_v49 = vmax.f32 %v2971_v15, %v10199_v22  ;;  %v10204_v15 = vld [vmem:[#allocation78_spill] sm:$0xff]  ;;  %v10242_v28 = vld [vmem:[#allocation56_spill] sm:$0xff] }
 0x286   : > { %5251 = vmatmul.msk.f32.gmra.mxu1 %vm1156_vm1, %v3995_v14  ;;  %v10198_v14 = vld [vmem:[#allocation54_spill] sm:$0xff] }
 0x287   : > { %5180 = vmatmul.msk.f32.gmra.mxu2 %vm1156_vm1, %v10189_v63  ;;  %v8686_v52 = vmax.f32 %v10198_v14, %v3696_v48  ;;  %v3933_v63 = vmax.f32 %v3901_v8, %v8508_v23  ;;  %v3035_v4 = vmax.f32 %v3003_v49, %v10201_v45  ;;  %v3902_v8 = vmax.f32 %v3870_v61, %v8481_v25  ;;  %v10205_v49 = vld [vmem:[#allocation22_spill] sm:$0xff] }
 0x288   : > { %v8690_v53 = vpop.f32.mrf.mxu2 }
 0x289   : > { %10200 = vst [vmem:[#allocation18_spill] sm:$0xff] %v8690_v53  ;;  %v3965_v26 = vmax.f32 %v3933_v63, %v8629_v62  ;;  %v8710_v63 = vmax.f32 %v8253_v27, %v8249_v38  ;;  %v3934_v61 = vmax.f32 %v3902_v8, %v8585_v13  ;;  %v3839_v38 = vmax.f32 %v8199_v56, %v8354_v54 }
 0x28a   : > { %v8731_v8 = vmax.f32 %v8367_v30, %v3704_v46 }
 0x28b   : > { %5171 = vmatmul.msk.f32.gmra.mxu3 %vm1156_vm1, %v2007_v34  ;;  %v3705_v34 = vrot.slane %v3539_v57, 5  ;;  %v3997_v48 = vmax.f32 %v3965_v26, %v8686_v52  ;;  %v3842_v57 = vmax.f32 %v8374_v20, %v8481_v25  ;;  %v10207_v26 = vld [vmem:[#allocation34_spill] sm:$0xff]  ;;  %v3871_v56 = vmax.f32 %v3839_v38, %v8431_v32 }
 0x28d   : > { %v8698_v9 = vsel %vm3621_vm3, %v3703_v17, %v3705_v34  ;;  %v3540_v17 = vmax.f32 %v8381_v3, %v3398_v44  ;;  %v8715_v34 = vpop.f32.mrf.mxu1 }
 0x28e   : > { %5252 = vmatmul.msk.f32.gmra.mxu1 %vm1156_vm1, %v3996_v31  ;;  %v10203_v31 = vld [vmem:[#allocation79_spill] sm:$0xff]  ;;  %10206 = vst [vmem:[#allocation40_spill] sm:$0xff] %v8715_v34 }
 0x28f   : > { %5181 = vmatmul.msk.f32.gmra.mxu2 %vm1156_vm1, %v10197_v55  ;;  %v2940_v10 = vmax.f32 %v10203_v31, %v10202_v51  ;;  %v3399_v55 = vrot.slane %v8363_v43, 6  ;;  %v3707_v21 = vrot.slane %v3540_v17, 5  ;;  %v3903_v17 = vmax.f32 %v3871_v56, %v8508_v23 }
 0x290   : > { %v8728_v53 = vpop.f32.mrf.mxu2 }
 0x291   : > { %v2972_v41 = vmax.f32 %v2940_v10, %v10204_v15  ;;  %v3400_v31 = vsel %vm2740_vm6, %v3398_v44, %v3399_v55  ;;  %v3874_v10 = vmax.f32 %v3842_v57, %v8585_v13  ;;  %10209 = vst [vmem:[#allocation46_spill] sm:$0xff] %v8728_v53 }
 0x292   : > { %v3541_v3 = vmax.f32 %v8361_v50, %v3400_v31  ;;  %v2941_v50 = vmax.f32 %v10192_v29, %v10195_v59  ;;  %v8755_v29 = vmax.f32 %v8300_v24, %v8636_v36  ;;  %v10213_v36 = vmax.f32 %v8307_v1, %v8374_v20 }
 0x293   : > { %5204 = vmatmul.msk.f32.vlgmr.msrb.gmra.mxu3 %vm1156_vm1, %v3035_v4  ;;  %v3004_v4 = vmax.f32 %v2972_v41, %v10207_v26  ;;  %v3906_v41 = vmax.f32 %v3874_v10, %v8662_v6  ;;  %v10210_v10 = vld [vmem:[#allocation23_spill] sm:$0xff] }
 0x294   : > { %v8734_v44 = vrot.slane %v3541_v3, 5 }
 0x296   : > { %5253 = vmatmul.msk.f32.gmra.mxu1 %vm1156_vm1, %v3997_v48  ;;  %v3966_v48 = vmax.f32 %v3934_v61, %v8662_v6  ;;  %v3938_v61 = vmax.f32 %v3906_v41, %v8710_v63  ;;  %v3709_v46 = vsel %vm3621_vm3, %v3707_v21, %v8734_v44  ;;  %v3935_v21 = vmax.f32 %v3903_v17, %v8629_v62 }
 0x297   : > { %5182 = vmatmul.msk.f32.gmra.mxu2 %vm1156_vm1, %v10205_v49  ;;  %v10208_v49 = vld [vmem:[#allocation35_spill] sm:$0xff]  ;;  %v8748_v31 = vmax.f32 %v8458_v40, %v3709_v46  ;;  %v2942_v17 = vmax.f32 %v10202_v51, %v10204_v15  ;;  %v10216_v51 = vld [vmem:[#allocation77_spill] sm:$0xff] }
 0x298   : > { %v3036_v35 = vmax.f32 %v3004_v4, %v10208_v49  ;;  %v3998_v57 = vmax.f32 %v3966_v48, %v8710_v63  ;;  %v2973_v4 = vmax.f32 %v2941_v50, %v10199_v22  ;;  %v8762_v48 = vpop.f32.mrf.mxu1  ;;  %v3967_v41 = vmax.f32 %v3935_v21, %v8686_v52  ;;  %v8772_v46 = vpop.f32.mrf.mxu2  ;;  %v10215_v21 = vld [vmem:[#allocation26_spill] sm:$0xff] }
 0x299   : > { %10211 = vst [vmem:[#allocation19_spill] sm:$0xff] %v8762_v48 }
 0x29a   : > { %v3005_v38 = vmax.f32 %v2973_v4, %v10201_v45  ;;  %v3999_v50 = vmax.f32 %v3967_v41, %v8755_v29  ;;  %10214 = vst [vmem:[#allocation20_spill] sm:$0xff] %v8772_v46  ;;  %v10219_v46 = vld [vmem:[#allocation27_spill] sm:$0xff] }
 0x29b   : > { %5205 = vmatmul.msk.f32.gmra.mxu3 %vm1156_vm1, %v3036_v35  ;;  %v3970_v35 = vmax.f32 %v3938_v61, %v8731_v8  ;;  %v3872_v61 = vmax.f32 %v10213_v36, %v8481_v25 }
 0x29d   : > { %v8760_v3 = vmax.f32 %v3970_v35, %v8748_v31  ;;  %v3904_v4 = vmax.f32 %v3872_v61, %v8585_v13  ;;  %v2974_v35 = vmax.f32 %v2942_v17, %v10207_v26  ;;  %v3404_v61 = vrot.slane %v8449_v39, 6 }
 0x29e   : > { %5254 = vmatmul.msk.f32.gmra.mxu1 %vm1156_vm1, %v3998_v57  ;;  %v10212_v57 = vld [vmem:[#allocation37_spill] sm:$0xff]  ;;  %v3844_v17 = vmax.f32 %v8481_v25, %v8585_v13 }
 0x29f   : > { %5183 = vmatmul.msk.f32.gmra.mxu2 %vm1156_vm1, %v10210_v10  ;;  %v3037_v56 = vmax.f32 %v3005_v38, %v10212_v57  ;;  %v3403_v10 = vrot.slane %v8437_v11, 6  ;;  %v3401_v38 = vrot.slane %v8415_v58, 6  ;;  %v3936_v1 = vmax.f32 %v3904_v4, %v8662_v6 }
 0x2a0   : > { %v3006_v20 = vmax.f32 %v2974_v35, %v10208_v49  ;;  %v2943_v35 = vmax.f32 %v10195_v59, %v10199_v22  ;;  %v3406_v59 = vrot.slane %v8477_v12, 6 }
 0x2a1   : > { %v3968_v41 = vmax.f32 %v3936_v1, %v8710_v63  ;;  %v3543_v36 = vmax.f32 %v8454_v0, %v3403_v10  ;;  %v3405_v0 = vsel %vm2740_vm6, %v3403_v10, %v3404_v61  ;;  %v3876_v1 = vmax.f32 %v3844_v17, %v8662_v6 }
 0x2a3   : > { %5206 = vmatmul.msk.f32.gmra.mxu3 %vm1156_vm1, %v3037_v56  ;;  %v3038_v56 = vmax.f32 %v3006_v20, %v10216_v51  ;;  %v4000_v58 = vmax.f32 %v3968_v41, %v8731_v8  ;;  %v8807_v20 = vpop.f32.mrf.mxu2  ;;  %v2975_v41 = vmax.f32 %v2943_v35, %v10201_v45  ;;  %v3908_v10 = vmax.f32 %v3876_v1, %v8710_v63 }
 0x2a4   : > { %10218 = vst [vmem:[#allocation49_spill] sm:$0xff] %v8807_v20 }
 0x2a6   : > { %5255 = vmatmul.msk.f32.gmra.mxu1 %vm1156_vm1, %v3999_v50  ;;  %v3841_v50 = vmax.f32 %v8354_v54, %v8431_v32  ;;  %v3402_v54 = vsel %vm2740_vm6, %v3399_v55, %v3401_v38  ;;  %v8818_v38 = vmax.f32 %v8411_v33, %v8698_v9 }
 0x2a7   : > { %5184 = vmatmul.msk.f32.gmra.mxu2 %vm1156_vm1, %v10215_v21  ;;  %v8793_v21 = vpop.f32.mrf.mxu1  ;;  %v3542_v55 = vmax.f32 %v8363_v43, %v3402_v54 }
 0x2a8   : > { %10217 = vst [vmem:[#allocation45_spill] sm:$0xff] %v8793_v21  ;;  %v3873_v4 = vmax.f32 %v3841_v50, %v8508_v23  ;;  %v3712_v50 = vrot.slane %v3543_v36, 5  ;;  %v10220_v36 = vld [vmem:[#allocation28_spill] sm:$0xff] }
 0x2a9   : > { %v3710_v43 = vrot.slane %v3542_v55, 5 }
 0x2aa   : > { %v3905_v25 = vmax.f32 %v3873_v4, %v8629_v62 }
 0x2ab   : > { %5207 = vmatmul.msk.f32.gmra.mxu3 %vm1156_vm1, %v3038_v56  ;;  %v3544_v56 = vmax.f32 %v8437_v11, %v3405_v0  ;;  %v3940_v11 = vmax.f32 %v3908_v10, %v8731_v8  ;;  %v3407_v0 = vsel %vm2740_vm6, %v3404_v61, %v3406_v59 }
 0x2ac   : > { %v3937_v17 = vmax.f32 %v3905_v25, %v8686_v52  ;;  %v2944_v25 = vmax.f32 %v10204_v15, %v10207_v26  ;;  %v10222_v15 = vld [vmem:[#allocation32_spill] sm:$0xff] }
 0x2ad   : > { %v3713_v4 = vrot.slane %v3544_v56, 5  ;;  %v3972_v9 = vmax.f32 %v3940_v11, %v8748_v31  ;;  %v3845_v56 = vmax.f32 %v8508_v23, %v8629_v62 }
 0x2ae   : > { %5256 = vmatmul.msk.f32.gmra.mxu1 %vm1156_vm1, %v4000_v58  ;;  %v3007_v58 = vmax.f32 %v2975_v41, %v10212_v57  ;;  %v3969_v12 = vmax.f32 %v3937_v17, %v8755_v29  ;;  %v3545_v41 = vmax.f32 %v8449_v39, %v3407_v0  ;;  %v2976_v61 = vmax.f32 %v2944_v25, %v10208_v49  ;;  %v10226_v25 = vld [vmem:[#allocation39_spill] sm:$0xff] }
 0x2af   : > { %5185 = vmatmul.msk.f32.gmra.mxu2 %vm1156_vm1, %v10219_v46  ;;  %v3714_v46 = vsel %vm3621_vm3, %v3712_v50, %v3713_v4  ;;  %v3408_v50 = vrot.slane %v8521_v60, 6  ;;  %v8842_v10 = vpop.f32.mrf.mxu1  ;;  %v3877_v17 = vmax.f32 %v3845_v56, %v8686_v52  ;;  %v3711_v39 = vsel %vm3621_vm3, %v8734_v44, %v3710_v43 }
 0x2b0   : > { %v3039_v35 = vmax.f32 %v3007_v58, %v10220_v36  ;;  %v8827_v54 = vmax.f32 %v8545_v19, %v3714_v46  ;;  %v4001_v1 = vmax.f32 %v3969_v12, %v8818_v38  ;;  %10221 = vst [vmem:[#allocation43_spill] sm:$0xff] %v8842_v10  ;;  %v3715_v59 = vrot.slane %v3545_v41, 5  ;;  %v8851_v58 = vpop.f32.mrf.mxu2  ;;  %v10224_v12 = vld [vmem:[#allocation63_spill] sm:$0xff] }
 0x2b1   : > { %10223 = vst [vmem:[#allocation75_spill] sm:$0xff] %v8851_v58  ;;  %v3008_v11 = vmax.f32 %v2976_v61, %v10216_v51  ;;  %v3909_v46 = vmax.f32 %v3877_v17, %v8755_v29  ;;  %v3843_v56 = vmax.f32 %v8431_v32, %v8508_v23  ;;  %v3409_v61 = vrot.slane %v8532_v7, 6 }
 0x2b2   : > { %v8840_v55 = vmax.f32 %v3972_v9, %v8827_v54  ;;  %v10225_v9 = vld [vmem:[#allocation64_spill] sm:$0xff]  ;;  %v2949_v10 = vmax.f32 %v10212_v57, %v10220_v36 }
 0x2b3   : > { %5208 = vmatmul.msk.f32.gmra.mxu3 %vm1156_vm1, %v3039_v35  ;;  %v8855_v35 = vmax.f32 %v10224_v12, %v3711_v39  ;;  %v3546_v0 = vmax.f32 %v10225_v9, %v3408_v50  ;;  %v3040_v41 = vmax.f32 %v3008_v11, %v10226_v25  ;;  %v3941_v43 = vmax.f32 %v3909_v46, %v8818_v38 }
 0x2b4   : > { %v3846_v39 = vmax.f32 %v8585_v13, %v8662_v6  ;;  %v3875_v17 = vmax.f32 %v3843_v56, %v8629_v62  ;;  %v3410_v23 = vsel %vm2740_vm6, %v3408_v50, %v3409_v61 }
 0x2b5   : > { %v3717_v32 = vrot.slane %v3546_v0, 5 }
 0x2b6   : > { %5257 = vmatmul.msk.f32.gmra.mxu1 %vm1156_vm1, %v4001_v1  ;;  %v3716_v1 = vsel %vm3621_vm3, %v3713_v4, %v3715_v59  ;;  %v2945_v4 = vmax.f32 %v10199_v22, %v10201_v45  ;;  %v3973_v59 = vmax.f32 %v3941_v43, %v8855_v35  ;;  %v3878_v11 = vmax.f32 %v3846_v39, %v8710_v63 }
 0x2b7   : > { %5186 = vmatmul.msk.f32.gmra.mxu2 %vm1156_vm1, %v10222_v15  ;;  %v10227_v15 = vld [vmem:[#allocation72_spill] sm:$0xff]  ;;  %v3907_v46 = vmax.f32 %v3875_v17, %v8686_v52  ;;  %v3411_v22 = vrot.slane %v8566_v42, 6  ;;  %v8889_v0 = vpop.f32.mrf.mxu1 }
 0x2b8   : > { %v8864_v44 = vmax.f32 %v10227_v15, %v3716_v1  ;;  %v2977_v13 = vmax.f32 %v2945_v4, %v10212_v57  ;;  %v3547_v1 = vmax.f32 %v8521_v60, %v3410_v23  ;;  %v3910_v50 = vmax.f32 %v3878_v11, %v8731_v8  ;;  %v8895_v4 = vpop.f32.mrf.mxu2  ;;  %v10230_v60 = vld [vmem:[#allocation47_spill] sm:$0xff] }
 0x2b9   : > { %10229 = vst [vmem:[#allocation44_spill] sm:$0xff] %v8895_v4 }
 0x2ba   : > { %v8882_v9 = vmax.f32 %v3973_v59, %v8864_v44  ;;  %v3009_v56 = vmax.f32 %v2977_v13, %v10220_v36  ;;  %v3718_v43 = vrot.slane %v3547_v1, 5  ;;  %v3942_v39 = vmax.f32 %v3910_v50, %v8748_v31 }
 0x2bb   : > { %5209 = vmatmul.msk.f32.gmra.mxu3 %vm1156_vm1, %v3040_v41  ;;  %v10228_v41 = vld [vmem:[#allocation33_spill] sm:$0xff]  ;;  %v2946_v1 = vmax.f32 %v10207_v26, %v10208_v49  ;;  %v3847_v50 = vmax.f32 %v8629_v62, %v8686_v52 }
 0x2bc   : > { %v3041_v42 = vmax.f32 %v3009_v56, %v10230_v60  ;;  %v3719_v59 = vsel %vm3621_vm3, %v3717_v32, %v3718_v43  ;;  %v3974_v11 = vmax.f32 %v3942_v39, %v8827_v54  ;;  %v10231_v56 = vld [vmem:[#allocation41_spill] sm:$0xff] }
 0x2bd   : > { %v8900_v23 = vmax.f32 %v8615_v18, %v3719_v59 }
 0x2be   : > { %5258 = vmatmul.msk.f32.gmra.mxu1 %vm1156_vm1, %v8760_v3  ;;  %v3939_v3 = vmax.f32 %v3907_v46, %v8755_v29  ;;  %v3412_v46 = vsel %vm2740_vm6, %v3409_v61, %v3411_v22  ;;  %v3879_v22 = vmax.f32 %v3847_v50, %v8755_v29 }
 0x2bf   : > { %5187 = vmatmul.msk.f32.gmra.mxu2 %vm1156_vm1, %v10228_v41  ;;  %v3548_v41 = vmax.f32 %v8532_v7, %v3412_v46  ;;  %v8912_v32 = vmax.f32 %v3974_v11, %v8900_v23  ;;  %v8922_v62 = vpop.f32.mrf.mxu1  ;;  %v8929_v46 = vld [vmem:[#allocation2 + $0x288] sm:$0xff] }
 0x2c0   : > { %v3971_v17 = vmax.f32 %v3939_v3, %v8818_v38  ;;  %v2978_v3 = vmax.f32 %v2946_v1, %v10216_v51  ;;  %v3911_v39 = vmax.f32 %v3879_v22, %v8818_v38  ;;  %v1537_v50 = vrot.slane %v8929_v46, 2 }
 0x2c1   : > { %v3720_v61 = vrot.slane %v3548_v41, 5  ;;  %v3413_v20 = vrot.slane %v8929_v46, 6 }
 0x2c2   : > { %v4003_v13 = vmax.f32 %v3971_v17, %v8855_v35  ;;  %v3010_v26 = vmax.f32 %v2978_v3, %v10226_v25  ;;  %v10232_v17 = vld [vmem:[#allocation52_spill] sm:$0xff]  ;;  %v3943_v11 = vmax.f32 %v3911_v39, %v8855_v35  ;;  %v8933_v1 = vpop.f32.mrf.mxu2 }
 0x2c3   : > { %5210 = vmatmul.msk.f32.gmra.mxu3 %vm1156_vm1, %v3041_v42  ;;  %v3721_v7 = vsel %vm3621_vm3, %v3718_v43, %v3720_v61  ;;  %10233 = vst [vmem:[#allocation21_spill] sm:$0xff] %v8933_v1  ;;  %v2947_v43 = vmax.f32 %v10201_v45, %v10212_v57  ;;  %v3848_v61 = vmax.f32 %v8662_v6, %v8710_v63  ;;  %v10235_v45 = vld [vmem:[#allocation51_spill] sm:$0xff] }
 0x2c4   : > { %v3042_v42 = vmax.f32 %v3010_v26, %v10232_v17  ;;  %v8926_v59 = vmax.f32 %v8643_v37, %v3721_v7  ;;  %v3975_v41 = vmax.f32 %v3943_v11, %v8864_v44  ;;  %v2948_v6 = vmax.f32 %v10208_v49, %v10216_v51 }
 0x2c5   : > { %v3880_v7 = vmax.f32 %v3848_v61, %v8731_v8  ;;  %v2532_v11 = vrot.slane %v8929_v46, 4 }
 0x2c6   : > { %5259 = vmatmul.msk.f32.gmra.mxu1 %vm1156_vm1, %v4003_v13  ;;  %v8931_v13 = vld [vmem:[#allocation2 + $0x290] sm:$0xff]  ;;  %v8949_v26 = vmax.f32 %v3975_v41, %v8926_v59 }
 0x2c7   : > { %5188 = vmatmul.msk.f32.gmra.mxu2 %vm1156_vm1, %v10231_v56  ;;  %v1538_v3 = vrot.slane %v8931_v13, 2  ;;  %v2979_v56 = vmax.f32 %v2947_v43, %v10220_v36  ;;  %v2533_v43 = vrot.slane %v8931_v13, 4  ;;  %v3912_v41 = vmax.f32 %v3880_v7, %v8748_v31  ;;  %v8966_v4 = vpop.f32.mrf.mxu1 }
 0x2c8   : > { %v3414_v53 = vrot.slane %v8931_v13, 6 }
 0x2c9   : > { %v3011_v39 = vmax.f32 %v2979_v56, %v10230_v60  ;;  %v8964_v61 = vmax.f32 %v3912_v41, %v8827_v54  ;;  %v1361_v56 = vld [vmem:[#allocation2 + $0x298] sm:$0xff]  ;;  %v2534_v7 = vsel %vm2431_vm14, %v2532_v11, %v2533_v43  ;;  %v3849_v41 = vmax.f32 %v8686_v52, %v8755_v29 }
 0x2ca   : > { %v8945_v22 = vpop.f32.mrf.mxu3  ;;  %v2669_v18 = vmax.f32 %v8929_v46, %v2534_v7  ;;  %v9001_v7 = vld [vmem:[#allocation2 + $0x2b0] sm:$0xff] }
 0x2cb   : > { %5211 = vmatmul.msk.f32.gmra.mxu3 %vm1156_vm1, %v3042_v42  ;;  %10234 = vst [vmem:[#allocation54_spill] sm:$0xff] %v8945_v22  ;;  %v1358_v42 = vld [vmem:[#allocation2 + $0x280] sm:$0xff]  ;;  %v10236_v22 = vld [vmem:[#allocation53_spill] sm:$0xff]  ;;  %v3881_v37 = vmax.f32 %v3849_v41, %v8818_v38 }
 0x2cc   : > { %v3043_v1 = vmax.f32 %v3011_v39, %v10236_v22  ;;  %v1673_v49 = vmax.f32 %v1358_v42, %v1537_v50  ;;  %v2668_v39 = vmax.f32 %v1358_v42, %v2532_v11  ;;  %v3549_v57 = vmax.f32 %v1358_v42, %v3413_v20 }
 0x2cd   : > { %v3913_v15 = vmax.f32 %v3881_v37, %v8855_v35  ;;  %v2842_v37 = vrot.slane %v2669_v18, 6 }
 0x2ce   : > { %5260 = vmatmul.msk.f32.gmra.mxu1 %vm1156_vm1, %v8840_v55  ;;  %v1539_v55 = vsel %vm1436_vm7, %v1537_v50, %v1538_v3  ;;  %v1846_v21 = vrot.slane %v1673_v49, 7  ;;  %v2841_v19 = vrot.slane %v2668_v39, 6  ;;  %v3722_v39 = vrot.slane %v3549_v57, 5  ;;  %v1362_v57 = vld [vmem:[#allocation2 + $0x2a0] sm:$0xff] }
 0x2cf   : > { %5189 = vmatmul.msk.f32.gmra.mxu2 %vm1156_vm1, %v10235_v45  ;;  %v2980_v45 = vmax.f32 %v2948_v6, %v10226_v25  ;;  %v1674_v58 = vmax.f32 %v8929_v46, %v1539_v55  ;;  %v1540_v6 = vrot.slane %v1361_v56, 2  ;;  %v10238_v55 = vld [vmem:[#allocation58_spill] sm:$0xff]  ;;  %v8997_v49 = vmax.f32 %v3913_v15, %v8864_v44  ;;  %v9009_v42 = vpop.f32.mrf.mxu1 }
 0x2d1   : > { %v3012_v5 = vmax.f32 %v2980_v45, %v10232_v17  ;;  %v1847_v52 = vrot.slane %v1674_v58, 7  ;;  %v1541_v48 = vsel %vm1436_vm7, %v1538_v3, %v1540_v6  ;;  %v2981_v45 = vmax.f32 %v2949_v10, %v10230_v60  ;;  %v8999_v58 = vld [vmem:[#allocation2 + $0x2a8] sm:$0xff] }
 0x2d2   : > { %v3416_v6 = vrot.slane %v1361_v56, 6  ;;  %v1542_v18 = vrot.slane %v8999_v58, 2 }
 0x2d3   : > { %5212 = vmatmul.msk.f32.gmra.mxu3 %vm1156_vm1, %v3043_v1  ;;  %v8979_v1 = vpop.f32.mrf.mxu2  ;;  %v1848_v3 = vsel %vm1745_vm10, %v1846_v21, %v1847_v52  ;;  %v3013_v15 = vmax.f32 %v2981_v45, %v10236_v22 }
 0x2d6   : > { %5261 = vmatmul.msk.f32.gmra.mxu1 %vm1156_vm1, %v8882_v9  ;;  %v8981_v50 = vpop.f32.mrf.mxu3  ;;  %v3415_v9 = vsel %vm2740_vm6, %v3413_v20, %v3414_v53  ;;  %v3417_v20 = vsel %vm2740_vm6, %v3414_v53, %v3416_v6  ;;  %v9040_v53 = vld [vmem:[#allocation2 + $0x2b8] sm:$0xff] }
 0x2d7   : > { %10237 = vst [vmem:[#allocation50_spill] sm:$0xff] %v8981_v50  ;;  %5190 = vmatmul.msk.f32.gmra.mxu2 %vm1156_vm1, %v10238_v55  ;;  %v2535_v50 = vrot.slane %v1361_v56, 4  ;;  %v10239_v55 = vld [vmem:[#allocation60_spill] sm:$0xff]  ;;  %v3550_v11 = vmax.f32 %v8929_v46, %v3415_v9  ;;  %v1940_v56 = vmax.f32 %v8929_v46, %v1848_v3  ;;  %v3045_v46 = vmax.f32 %v3013_v15, %v10242_v28 }
 0x2d8   : > { %v3044_v34 = vmax.f32 %v3012_v5, %v10239_v55  ;;  %v1675_v5 = vmax.f32 %v8931_v13, %v1541_v48  ;;  %v1543_v48 = vrot.slane %v9001_v7, 2  ;;  %v2540_v16 = vrot.slane %v9040_v53, 4 }
 0x2d9   : > { %v2536_v10 = vsel %vm2431_vm14, %v2533_v43, %v2535_v50  ;;  %v10241_v43 = vld [vmem:[#allocation59_spill] sm:$0xff]  ;;  %v3723_v41 = vrot.slane %v3550_v11, 5 }
 0x2da   : > { %v1849_v9 = vrot.slane %v1675_v5, 7  ;;  %v2670_v45 = vmax.f32 %v8931_v13, %v2536_v10  ;;  %v1544_v11 = vsel %vm1436_vm7, %v1542_v18, %v1543_v48 }
 0x2db   : > { %5213 = vmatmul.msk.f32.gmra.mxu3 %vm1156_vm1, %v3044_v34  ;;  %v2950_v34 = vmax.f32 %v10216_v51, %v10226_v25  ;;  %v9025_v50 = vpop.f32.mrf.mxu2  ;;  %v2843_v51 = vsel %vm2740_vm6, %v2841_v19, %v2842_v37  ;;  %v3551_v19 = vmax.f32 %v8931_v13, %v3417_v20 }
 0x2dc   : > { %v9036_v3 = vmax.f32 %v1940_v56, %v2843_v51  ;;  %v1850_v10 = vsel %vm1745_vm10, %v1847_v52, %v1849_v9  ;;  %v2844_v15 = vrot.slane %v2670_v45, 6  ;;  %v3418_v56 = vrot.slane %v8999_v58, 6  ;;  %v10245_v9 = vld [vmem:[#allocation66_spill] sm:$0xff] }
 0x2dd   : > { %v3851_v52 = vmax.f32 %v8755_v29, %v8818_v38  ;;  %v3725_v45 = vrot.slane %v3551_v19, 5 }
 0x2de   : > { %5262 = vmatmul.msk.f32.gmra.mxu1 %vm1156_vm1, %v8912_v32  ;;  %v9018_v21 = vpop.f32.mrf.mxu3  ;;  %v3850_v32 = vmax.f32 %v8710_v63, %v8731_v8  ;;  %v2537_v63 = vrot.slane %v8999_v58, 4  ;;  %v2538_v8 = vrot.slane %v9001_v7, 4  ;;  %10243 = vst [vmem:[#allocation42_spill] sm:$0xff] %v9036_v3  ;;  %v2845_v29 = vsel %vm2740_vm6, %v2842_v37, %v2844_v15 }
 0x2df   : > { %10240 = vst [vmem:[#allocation36_spill] sm:$0xff] %v9018_v21  ;;  %5191 = vmatmul.msk.f32.gmra.mxu2 %vm1156_vm1, %v10241_v43  ;;  %v2982_v21 = vmax.f32 %v2950_v34, %v10232_v17  ;;  %v1676_v34 = vmax.f32 %v1362_v57, %v1542_v18  ;;  %v3883_v12 = vmax.f32 %v3851_v52, %v8855_v35 }
 0x2e0   : > { %v3882_v43 = vmax.f32 %v3850_v32, %v8748_v31  ;;  %v3724_v31 = vsel %vm3621_vm3, %v3722_v39, %v3723_v41  ;;  %v1677_v32 = vmax.f32 %v8999_v58, %v1544_v11  ;;  %v3419_v39 = vrot.slane %v9001_v7, 6 }
 0x2e1   : > { %v3014_v6 = vmax.f32 %v2982_v21, %v10239_v55  ;;  %v1545_v21 = vrot.slane %v9040_v53, 2  ;;  %v9059_v18 = vmax.f32 %v9036_v3, %v3724_v31  ;;  %v1941_v11 = vmax.f32 %v8931_v13, %v1850_v10 }
 0x2e2   : > { %v3914_v5 = vmax.f32 %v3882_v43, %v8827_v54  ;;  %v2539_v54 = vsel %vm2431_vm14, %v2537_v63, %v2538_v8  ;;  %v9065_v43 = vpop.f32.mrf.mxu1  ;;  %v1851_v38 = vrot.slane %v1676_v34, 7  ;;  %v1852_v31 = vrot.slane %v1677_v32, 7 }
 0x2e3   : > { %5214 = vmatmul.msk.f32.gmra.mxu3 %vm1156_vm1, %v3045_v46  ;;  %v2672_v3 = vmax.f32 %v8999_v58, %v2539_v54  ;;  %v1546_v19 = vsel %vm1436_vm7, %v1543_v48, %v1545_v21  ;;  %v10247_v35 = vmax.f32 %v8964_v61, %v8900_v23  ;;  %v3726_v37 = vsel %vm3621_vm3, %v3723_v41, %v3725_v45 }
 0x2e4   : > { %v9049_v20 = vmax.f32 %v3914_v5, %v8900_v23  ;;  %v2671_v5 = vmax.f32 %v1362_v57, %v2537_v63  ;;  %v2951_v63 = vmax.f32 %v10220_v36, %v10230_v60  ;;  %v9086_v10 = vmax.f32 %v1941_v11, %v2845_v29 }
 0x2e5   : > { %v4008_v13 = vmax.f32 %v10247_v35, %v9059_v18  ;;  %v3552_v48 = vmax.f32 %v1362_v57, %v3418_v56  ;;  %v1678_v23 = vmax.f32 %v9001_v7, %v1546_v19  ;;  %v2541_v36 = vsel %vm2431_vm14, %v2538_v8, %v2540_v16  ;;  %v10248_v57 = vld [vmem:[#allocation68_spill] sm:$0xff] }
 0x2e6   : > { %5263 = vmatmul.msk.f32.gmra.mxu1 %vm1156_vm1, %v8949_v26  ;;  %v9061_v51 = vpop.f32.mrf.mxu3  ;;  %v10246_v26 = vld [vmem:[#allocation62_spill] sm:$0xff]  ;;  %v2846_v15 = vrot.slane %v2671_v5, 6  ;;  %v2983_v61 = vmax.f32 %v2951_v63, %v10236_v22  ;;  %v3421_v41 = vrot.slane %v9040_v53, 6  ;;  %v2673_v16 = vmax.f32 %v9001_v7, %v2541_v36  ;;  %v10249_v53 = vld [vmem:[#allocation57_spill] sm:$0xff] }
 0x2e7   : > { %10244 = vst [vmem:[#allocation79_spill] sm:$0xff] %v9061_v51  ;;  %5192 = vmatmul.msk.f32.gmra.mxu2 %vm1156_vm1, %v10245_v9  ;;  %v3046_v46 = vmax.f32 %v3014_v6, %v10246_v26  ;;  %v9072_v51 = vpop.f32.mrf.mxu2  ;;  %v3420_v9 = vsel %vm2740_vm6, %v3418_v56, %v3419_v39  ;;  %v3915_v6 = vmax.f32 %v3883_v12, %v8864_v44  ;;  %v2847_v44 = vrot.slane %v2672_v3, 6 }
 0x2e8   : > { %v1853_v12 = vsel %vm1745_vm10, %v1851_v38, %v1852_v31  ;;  %v3553_v32 = vmax.f32 %v8999_v58, %v3420_v9  ;;  %v3817_v56 = vmax.f32 %v9086_v10, %v3726_v37  ;;  %v3015_v3 = vmax.f32 %v2983_v61, %v10242_v28 }
 0x2e9   : > { %v3947_v34 = vmax.f32 %v3915_v6, %v8926_v59  ;;  %v1942_v21 = vmax.f32 %v8999_v58, %v1853_v12  ;;  %v3727_v52 = vrot.slane %v3552_v48, 5  ;;  %v2848_v45 = vsel %vm2740_vm6, %v2846_v15, %v2847_v44 }
 0x2ea   : > { %v1854_v11 = vrot.slane %v1678_v23, 7  ;;  %v9105_v8 = vpop.f32.mrf.mxu1  ;;  %v3047_v5 = vmax.f32 %v3015_v3, %v10249_v53  ;;  %v3422_v29 = vsel %vm2740_vm6, %v3419_v39, %v3421_v41  ;;  %v10250_v9 = vmax.f32 %v8997_v49, %v8926_v59  ;;  %v10251_v59 = vld [vmem:[#allocation73_spill] sm:$0xff]  ;;  %v10252_v23 = vld [vmem:[#allocation76_spill] sm:$0xff] }
 0x2eb   : > { %5215 = vmatmul.msk.f32.gmra.mxu3 %vm1156_vm1, %v3046_v46  ;;  %v3728_v46 = vrot.slane %v3553_v32, 5  ;;  %v2937_v58 = vmax.f32 %v1942_v21, %v2848_v45  ;;  %v2952_v6 = vmax.f32 %v10226_v25, %v10232_v17  ;;  %v2849_v37 = vrot.slane %v2673_v16, 6  ;;  %v10253_v21 = vld [vmem:[#allocation74_spill] sm:$0xff]  ;;  %v10254_v16 = vld [vmem:[#allocation29_spill] sm:$0xff] }
 0x2ec   : > { %v4009_v19 = vmax.f32 %v10250_v9, %v3817_v56  ;;  %v3554_v63 = vmax.f32 %v9001_v7, %v3422_v29  ;;  %v3978_v25 = vmax.f32 %v9049_v20, %v9059_v18  ;;  %v2953_v3 = vmax.f32 %v10230_v60, %v10236_v22 }
 0x2ed   : > { %v3729_v35 = vsel %vm3621_vm3, %v3727_v52, %v3728_v46  ;;  %v2984_v39 = vmax.f32 %v2952_v6, %v10239_v55  ;;  %v2850_v12 = vsel %vm2740_vm6, %v2847_v44, %v2849_v37  ;;  %v3979_v45 = vmax.f32 %v3947_v34, %v3817_v56  ;;  %v10256_v6 = vld [vmem:[#allocation69_spill] sm:$0xff] }
 0x2ee   : > { %5264 = vmatmul.msk.f32.gmra.mxu1 %vm1156_vm1, %v4008_v13  ;;  %v9096_v54 = vpop.f32.mrf.mxu3  ;;  %v1855_v13 = vsel %vm1745_vm10, %v1852_v31, %v1854_v11  ;;  %v3818_v49 = vmax.f32 %v2937_v58, %v3729_v35  ;;  %v3730_v32 = vrot.slane %v3554_v63, 5  ;;  %v10255_v58 = vld [vmem:[#allocation25_spill] sm:$0xff] }
 0x2ef   : > { %5193 = vmatmul.msk.f32.gmra.mxu2 %vm1156_vm1, %v10248_v57  ;;  %v9109_v38 = vpop.f32.mrf.mxu2  ;;  %v3016_v48 = vmax.f32 %v2984_v39, %v10246_v26  ;;  %v1943_v31 = vmax.f32 %v9001_v7, %v1855_v13  ;;  %v2985_v7 = vmax.f32 %v2953_v3, %v10242_v28  ;;  %v2126_v13 = vpop.f32.mrf.mxu0  ;;  %v10257_v39 = vld [vmem:[#allocation61_spill] sm:$0xff]  ;;  %v9185_v3 = vld [vmem:[%s9793_s4] ss:$0 sm:$0xff] }
 0x2f0   : > { %v4010_v41 = vmax.f32 %v3978_v25, %v3818_v49  ;;  %v3731_v20 = vsel %vm3621_vm3, %v3728_v46, %v3730_v32  ;;  %v2954_v46 = vmax.f32 %v10232_v17, %v10239_v55  ;;  %v2955_v17 = vmax.f32 %v10236_v22, %v10242_v28  ;;  %v10258_v25 = vld [vmem:[#allocation31_spill] sm:$0xff] }
 0x2f1   : > { %v3048_v61 = vmax.f32 %v3016_v48, %v10252_v23  ;;  %v2938_v57 = vmax.f32 %v1943_v31, %v2850_v12  ;;  %v3017_v11 = vmax.f32 %v2985_v7, %v10249_v53  ;;  %v2956_v31 = vmax.f32 %v10239_v55, %v10246_v26 }
 0x2f2   : > { %v9132_v36 = vpop.f32.mrf.mxu1  ;;  %v2986_v9 = vmax.f32 %v2954_v46, %v10246_v26  ;;  %v2987_v37 = vmax.f32 %v2955_v17, %v10249_v53  ;;  %v2336_v22 = vadd.f32 %v8979_v1, %v2126_v13 }
 0x2f3   : > { %5216 = vmatmul.msk.f32.gmra.mxu3 %vm1156_vm1, %v3047_v5  ;;  %v3819_v52 = vmax.f32 %v2938_v57, %v3731_v20  ;;  %v3049_v5 = vmax.f32 %v3017_v11, %v10254_v16  ;;  %v2988_v12 = vmax.f32 %v2956_v31, %v10252_v23  ;;  %v10261_v31 = vld [vmem:[#allocation55_spill] sm:$0xff] }
 0x2f4   : > { %v3018_v56 = vmax.f32 %v2986_v9, %v10252_v23 }
 0x2f5   : > { %v4011_v60 = vmax.f32 %v3979_v45, %v3819_v52  ;;  %v3020_v20 = vmax.f32 %v2988_v12, %v10256_v6  ;;  %v2957_v52 = vmax.f32 %v10242_v28, %v10249_v53 }
 0x2f6   : > { %5265 = vmatmul.msk.f32.gmra.mxu1 %vm1156_vm1, %v4009_v19  ;;  %v9122_v15 = vpop.f32.mrf.mxu3  ;;  %v3050_v35 = vmax.f32 %v3018_v56, %v10256_v6 }
 0x2f7   : > { %5194 = vmatmul.msk.f32.gmra.mxu2 %vm1156_vm1, %v10251_v59  ;;  %v9138_v18 = vpop.f32.mrf.mxu2  ;;  %v3019_v59 = vmax.f32 %v2987_v37, %v10254_v16  ;;  %v3052_v55 = vmax.f32 %v3020_v20, %v10184_v47 }
 0x2f9   : > { %v3051_v48 = vmax.f32 %v3019_v59, %v10258_v25 }
 0x2fa   : > { %v9151_v29 = vpop.f32.mrf.mxu1 }
 0x2fb   : > { %5217 = vmatmul.msk.f32.gmra.mxu3 %vm1156_vm1, %v3048_v61  ;;  %v10259_v61 = vld [vmem:[#allocation38_spill] sm:$0xff] }
 0x2fe   : > { %5266 = vmatmul.msk.f32.gmra.mxu1 %vm1156_vm1, %v4010_v41  ;;  %v9142_v44 = vpop.f32.mrf.mxu3  ;;  %v2129_v41 = vpop.f32.mrf.mxu0 }
 0x2ff   : > { %5195 = vmatmul.msk.f32.gmra.mxu2 %vm1156_vm1, %v10253_v21  ;;  %v9159_v34 = vpop.f32.mrf.mxu2  ;;  %v2339_v45 = vadd.f32 %v9025_v50, %v2129_v41  ;;  %v2958_v50 = vmax.f32 %v10246_v26, %v10252_v23 }
 0x301   : > { %v2990_v59 = vmax.f32 %v2958_v50, %v10256_v6 }
 0x303   : > { %5218 = vmatmul.msk.f32.gmra.mxu3 %vm1156_vm1, %v3049_v5  ;;  %v2989_v5 = vmax.f32 %v2957_v52, %v10254_v16  ;;  %v3022_v12 = vmax.f32 %v2990_v59, %v10184_v47 }
 0x305   : > { %v3021_v9 = vmax.f32 %v2989_v5, %v10258_v25  ;;  %v10262_v5 = vld [vmem:[#allocation67_spill] sm:$0xff] }
 0x306   : > { %5267 = vmatmul.msk.f32.gmra.mxu1 %vm1156_vm1, %v4011_v60  ;;  %v9155_v19 = vpop.f32.mrf.mxu3 }
 0x307   : > { %5196 = vmatmul.msk.f32.gmra.mxu2 %vm1156_vm1, %v10255_v58  ;;  %v9172_v49 = vpop.f32.mrf.mxu2  ;;  %v2132_v58 = vpop.f32.mrf.mxu0 }
 0x308   : > { %v2342_v13 = vadd.f32 %v9072_v51, %v2132_v58  ;;  %v3054_v51 = vmax.f32 %v3022_v12, %v10198_v14 }
 0x30b   : > { %5219 = vmatmul.msk.f32.gmra.mxu3 %vm1156_vm1, %v3050_v35  ;;  %v3053_v35 = vmax.f32 %v3021_v9, %v10191_v2 }
 0x30e   : > { %v9167_v63 = vpop.f32.mrf.mxu3 }
 0x30f   : > { %5197 = vmatmul.msk.f32.gmra.mxu2 %vm1156_vm1, %v10257_v39  ;;  %v9190_v1 = vpop.f32.mrf.mxu2 }
 0x313   : > { %5220 = vmatmul.msk.f32.gmra.mxu3 %vm1156_vm1, %v3051_v48 }
 0x316   : > { %v3185_v32 = vpop.f32.mrf.mxu3 }
 0x317   : > { %5198 = vmatmul.msk.f32.gmra.mxu2 %vm1156_vm1, %v10259_v61  ;;  %v3281_v57 = vadd.f32 %v3185_v32, %v2336_v22  ;;  %v9213_v37 = vpop.f32.mrf.mxu2  ;;  %v2135_v32 = vpop.f32.mrf.mxu0 }
 0x318   : > { %v9222_v61 = vpop.f32.mrf.mxu1 }
 0x319   : > { %v4226_v7 = vadd.f32 %v8889_v0, %v3281_v57  ;;  %v10260_v0 = vld [vmem:[#allocation30_spill] sm:$0xff]  ;;  %v2959_v57 = vmax.f32 %v10249_v53, %v10254_v16 }
 0x31b   : > { %v9193_v21 = vadd.f32 %v9185_v3, %v4226_v7  ;;  %5221 = vmatmul.msk.f32.gmra.mxu3 %vm1156_vm1, %v3052_v55  ;;  %v2345_v7 = vadd.f32 %v9109_v38, %v2135_v32 }
 0x31d   : > { %v5268_v11 = vmul.f32 -1.442695, %v9193_v21 }
 0x31e   : > { %v3188_v60 = vpop.f32.mrf.mxu3 }
 0x31f   : > { %5199 = vmatmul.msk.f32.gmra.mxu2 %vm1156_vm1, %v10260_v0  ;;  %5511 = vpow2.f32 %v5268_v11  ;;  %v3282_v46 = vadd.f32 %v3188_v60, %v2339_v45  ;;  %v9237_v60 = vpop.f32.mrf.mxu2 }
 0x321   : > { %v4227_v56 = vadd.f32 %v8922_v62, %v3282_v46 }
 0x323   : > { %v9207_v28 = vadd.f32 %v9185_v3, %v4227_v56  ;;  %5222 = vmatmul.msk.f32.gmra.mxu3 %vm1156_vm1, %v3053_v35  ;;  %v2960_v35 = vmax.f32 %v10252_v23, %v10256_v6 }
 0x325   : > { %v5512_v17 = vpop.eup %5511  ;;  %v5269_v39 = vmul.f32 -1.442695, %v9207_v28 }
 0x326   : > { %v4390_v62 = vadd.f32 1.0, %v5512_v17  ;;  %v3191_v48 = vpop.f32.mrf.mxu3 }
 0x327   : > { %5200 = vmatmul.msk.f32.gmra.mxu2 %vm1156_vm1, %v10261_v31  ;;  %5513 = vpow2.f32 %v5269_v39  ;;  %v3283_v22 = vadd.f32 %v3191_v48, %v2342_v13  ;;  %v2992_v39 = vmax.f32 %v2960_v35, %v10184_v47  ;;  %v2138_v48 = vpop.f32.mrf.mxu0  ;;  %v9250_v31 = vpop.f32.mrf.mxu1 }
 0x328   : > { %5515 = vrcp.f32 %v4390_v62  ;;  %v4433_v56 = vand.u32 2147483648, %v4390_v62  ;;  %v4431_v17 = vand.u32 2147483647, %v4390_v62  ;;  %vm4427_vm10 = vweird.f32 %v4390_v62 }
 0x329   : > { %v4228_v26 = vadd.f32 %v8966_v4, %v3283_v22  ;;  %v2991_v4 = vmax.f32 %v2959_v57, %v10258_v25  ;;  %v2348_v23 = vadd.f32 %v9138_v18, %v2138_v48  ;;  %v10263_v57 = vld [vmem:[#allocation80_spill] sm:$0xff] }
 0x32a   : > { %vm4432_vm6 = vcmp.eq.f32.partialorder %v4431_v17, 8.507059e+37 }
 0x32b   : > { %v9225_v41 = vadd.f32 %v9185_v3, %v4228_v26  ;;  %5223 = vmatmul.msk.f32.gmra.mxu3 %vm1156_vm1, %v3054_v51  ;;  %v3023_v53 = vmax.f32 %v2991_v4, %v10191_v2  ;;  %v4434_v26 = vor.u32 1.1754944e-38, %v4433_v56  ;;  %v9262_v4 = vpop.f32.mrf.mxu2 }
 0x32d   : > { %v5514_v20 = vpop.eup %5513  ;;  %v5270_v55 = vmul.f32 -1.442695, %v9225_v41  ;;  %v3055_v58 = vmax.f32 %v3023_v53, %v8253_v27 }
 0x32e   : > { %v5516_v52 = vpop.eup %5515  ;;  %v9233_v45 = vadd.f32 1.0, %v5514_v20  ;;  %v3194_v11 = vpop.f32.mrf.mxu3  ;;  %v3024_v20 = vmax.f32 %v2992_v39, %v10198_v14 }
 0x32f   : > { %5201 = vmatmul.msk.f32.gmra.mxu2 %vm1156_vm1, %v10262_v5  ;;  %v4423_v0 = vmul.f32 %v5516_v52, %v4390_v62  ;;  %5517 = vpow2.f32 %v5270_v55  ;;  %v3284_v46 = vadd.f32 %v3194_v11, %v2345_v7  ;;  %vm4428_vm7 = vweird.f32 %v5516_v52  ;;  %v9287_v48 = vpop.f32.mrf.mxu1 }
 0x330   : > { %5519 = vrcp.f32 %v9233_v45  ;;  %vm4429_vm14 = vmor %vm4427_vm10, %vm4428_vm7  ;;  %vm4442_vm12 = vweird.f32 %v9233_v45 }
 0x331   : > { %v4424_v38 = vsub.f32 1.0, %v4423_v0  ;;  %v4229_v9 = vadd.f32 %v9009_v42, %v3284_v46  ;;  %v3056_v0 = vmax.f32 %v3024_v20, %v8300_v24  ;;  %v4448_v46 = vand.u32 2147483648, %v9233_v45 }
 0x333   : > { %v4425_v50 = vmul.f32 %v5516_v52, %v4424_v38  ;;  %v9246_v13 = vadd.f32 %v9185_v3, %v4229_v9  ;;  %5224 = vmatmul.msk.f32.gmra.mxu3 %vm1156_vm1, %v3055_v58 }
 0x335   : > { %v5518_v59 = vpop.eup %5517  ;;  %v4426_v42 = vadd.f32 %v5516_v52, %v4425_v50  ;;  %v5271_v22 = vmul.f32 -1.442695, %v9246_v13  ;;  %v4449_v50 = vor.u32 1.1754944e-38, %v4448_v46 }
 0x336   : > { %v5520_v12 = vpop.eup %5519  ;;  %v9254_v51 = vadd.f32 1.0, %v5518_v59  ;;  %v3197_v32 = vpop.f32.mrf.mxu3  ;;  %v10264_v59 = vld [vmem:[#allocation65_spill] sm:$0xff] }
 0x337   : > { %5202 = vmatmul.msk.f32.gmra.mxu2 %vm1156_vm1, %v10263_v57  ;;  %v4430_v7 = vsel %vm4429_vm14, %v5516_v52, %v4426_v42  ;;  %v4438_v62 = vmul.f32 %v5520_v12, %v9233_v45  ;;  %5521 = vpow2.f32 %v5271_v22  ;;  %v3285_v5 = vadd.f32 %v3197_v32, %v2348_v23  ;;  %v10265_v23 = vld [vmem:[#allocation12_spill] sm:$0xff] }
 0x338   : > { %v4435_v55 = vsel %vm4432_vm6, %v4434_v26, %v4430_v7  ;;  %5523 = vrcp.f32 %v9254_v51  ;;  %v2961_v52 = vmax.f32 %v10254_v16, %v10258_v25  ;;  %vm4443_vm3 = vweird.f32 %v5520_v12 }
 0x339   : > { %v4902_v18 = vmul.f32 %v4435_v55, %v9193_v21  ;;  %v4439_v11 = vsub.f32 1.0, %v4438_v62  ;;  %v4446_v21 = vand.u32 2147483647, %v9233_v45  ;;  %v4230_v38 = vadd.f32 %v9065_v43, %v3285_v5  ;;  %vm4444_vm13 = vmor %vm4442_vm12, %vm4443_vm3  ;;  %v9299_v55 = vpop.f32.mrf.mxu2 }
 0x33a   : > { %v2993_v9 = vmax.f32 %v2961_v52, %v10191_v2  ;;  %v2351_v26 = vadd.f32 %v9159_v34, %v10265_v23  ;;  %v4463_v62 = vand.u32 2147483648, %v9254_v51  ;;  %v4461_v34 = vand.u32 2147483647, %v9254_v51  ;;  %v10266_v52 = vld [vmem:[#allocation70_spill] sm:$0xff] }
 0x33b   : > { %4934 = vst.msk [vmem:[%s9270_s11] sm:$0xff] %vm306_vm0, %v4902_v18  ;;  %v4440_v53 = vmul.f32 %v5520_v12, %v4439_v11  ;;  %5225 = vmatmul.msk.f32.gmra.mxu3 %vm1156_vm1, %v3056_v0  ;;  %v9280_v16 = vadd.f32 %v9185_v3, %v4230_v38  ;;  %vm4447_vm15 = vcmp.eq.f32.partialorder %v4446_v21, 8.507059e+37  ;;  %vm4457_vm4 = vweird.f32 %v9254_v51 }
 0x33c   : > { %v3025_v43 = vmax.f32 %v2993_v9, %v8253_v27  ;;  %v4464_v21 = vor.u32 1.1754944e-38, %v4463_v62  ;;  %vm4462_vm8 = vcmp.eq.f32.partialorder %v4461_v34, 8.507059e+37  ;;  %v2963_v23 = vmax.f32 %v10258_v25, %v10191_v2  ;;  %v10267_v25 = vld [vmem:[#allocation71_spill] sm:$0xff] }
 0x33d   : > { %v5522_v58 = vpop.eup %5521  ;;  %v4441_v56 = vadd.f32 %v5520_v12, %v4440_v53  ;;  %v5272_v22 = vmul.f32 -1.442695, %v9280_v16  ;;  %v2354_v53 = vadd.f32 %v9172_v49, %v10266_v52  ;;  %v9318_v49 = vpop.f32.mrf.mxu1  ;;  %v2357_v62 = vadd.f32 %v9190_v1, %v10267_v25 }
 0x33e   : > { %v5524_v35 = vpop.eup %5523  ;;  %v9282_v17 = vadd.f32 1.0, %v5522_v58  ;;  %v3200_v39 = vpop.f32.mrf.mxu3  ;;  %v3057_v7 = vmax.f32 %v3025_v43, %v8367_v30 }
 0x33f   : > { %5203 = vmatmul.msk.f32.gmra.mxu2 %vm1156_vm1, %v10264_v59  ;;  %v4445_v42 = vsel %vm4444_vm13, %v5520_v12, %v4441_v56  ;;  %v4453_v45 = vmul.f32 %v5524_v35, %v9254_v51  ;;  %v3286_v12 = vadd.f32 %v3200_v39, %v2351_v26  ;;  %vm4458_vm2 = vweird.f32 %v5524_v35 }
 0x340   : > { %v4450_v32 = vsel %vm4447_vm15, %v4449_v50, %v4445_v42  ;;  %5525 = vrcp.f32 %v9282_v17  ;;  %vm4459_vm5 = vmor %vm4457_vm4, %vm4458_vm2  ;;  %vm4472_vm11 = vweird.f32 %v9282_v17 }
 0x341   : > { %v4903_v57 = vmul.f32 %v4450_v32, %v9207_v28  ;;  %v4454_v20 = vsub.f32 1.0, %v4453_v45  ;;  %5527 = vpow2.f32 %v5272_v22  ;;  %v2962_v28 = vmax.f32 %v10256_v6, %v10184_v47  ;;  %v9331_v32 = vpop.f32.mrf.mxu2 }
 0x342   : > { %v4231_v11 = vadd.f32 %v9105_v8, %v3286_v12  ;;  %v4476_v45 = vand.u32 2147483647, %v9282_v17  ;;  %v4478_v22 = vand.u32 2147483648, %v9282_v17 }
 0x343   : > { %4935 = vst.msk [vmem:[%s9270_s11 + $0x8] sm:$0xff] %vm306_vm0, %v4903_v57  ;;  %v4455_v18 = vmul.f32 %v5524_v35, %v4454_v20  ;;  %5226 = vmatmul.msk.f32.gmra.mxu3 %vm1156_vm1, %v3057_v7  ;;  %v2994_v0 = vmax.f32 %v2962_v28, %v10198_v14  ;;  %v2995_v7 = vmax.f32 %v2963_v23, %v8253_v27 }
 0x344   : > { %v9311_v38 = vadd.f32 %v9185_v3, %v4231_v11  ;;  %v4479_v12 = vor.u32 1.1754944e-38, %v4478_v22  ;;  %vm4477_vm10 = vcmp.eq.f32.partialorder %v4476_v45, 8.507059e+37 }
 0x345   : > { %v4456_v5 = vadd.f32 %v5524_v35, %v4455_v18  ;;  %v3026_v51 = vmax.f32 %v2994_v0, %v8300_v24  ;;  %v3027_v28 = vmax.f32 %v2995_v7, %v8367_v30 }
 0x346   : > { %v5526_v46 = vpop.eup %5525  ;;  %v3203_v6 = vpop.f32.mrf.mxu3  ;;  %v5273_v39 = vmul.f32 -1.442695, %v9311_v38 }
 0x347   : > { %v5528_v9 = vpop.eup %5527  ;;  %v4460_v58 = vsel %vm4459_vm5, %v5524_v35, %v4456_v5  ;;  %v4468_v8 = vmul.f32 %v5526_v46, %v9282_v17  ;;  %v3287_v42 = vadd.f32 %v3203_v6, %v2354_v53  ;;  %v3058_v35 = vmax.f32 %v3026_v51, %v8411_v33 }
 0x348   : > { %v4465_v56 = vsel %vm4462_vm8, %v4464_v21, %v4460_v58  ;;  %v9315_v50 = vadd.f32 1.0, %v5528_v9  ;;  %vm4473_vm9 = vweird.f32 %v5526_v46  ;;  %v3059_v1 = vmax.f32 %v3027_v28, %v8458_v40  ;;  %v9348_v58 = vpop.f32.mrf.mxu1 }
 0x349   : > { %v4904_v59 = vmul.f32 %v4465_v56, %v9225_v41  ;;  %v4469_v43 = vsub.f32 1.0, %v4468_v8  ;;  %v4232_v41 = vadd.f32 %v9132_v36, %v3287_v42  ;;  %vm4474_vm7 = vmor %vm4472_vm11, %vm4473_vm9  ;;  %v2964_v9 = vmax.f32 %v10184_v47, %v10198_v14  ;;  %v10268_v47 = vld [vmem:[#allocation17_spill] sm:$0xff] }
 0x34a   : > { %5529 = vrcp.f32 %v9315_v50  ;;  %v4491_v56 = vand.u32 2147483647, %v9315_v50  ;;  %vm4487_vm6 = vweird.f32 %v9315_v50 }
 0x34b   : > { %4936 = vst.msk [vmem:[%s9270_s11 + $0x10] sm:$0xff] %vm306_vm0, %v4904_v59  ;;  %v4470_v26 = vmul.f32 %v5526_v46, %v4469_v43  ;;  %5531 = vpow2.f32 %v5273_v39  ;;  %5227 = vmatmul.msk.f32.gmra.mxu3 %vm1156_vm1, %v3058_v35  ;;  %v9335_v20 = vadd.f32 %v9185_v3, %v4232_v41  ;;  %v2996_v6 = vmax.f32 %v2964_v9, %v8300_v24  ;;  %v9361_v43 = vpop.f32.mrf.mxu2 }
 0x34c   : > { %v2360_v39 = vadd.f32 %v9213_v37, %v10268_v47  ;;  %vm4492_vm12 = vcmp.eq.f32.partialorder %v4491_v56, 8.507059e+37  ;;  %v10269_v37 = vld [vmem:[#allocation63_spill] sm:$0xff]  ;;  %v10271_v56 = vld [vmem:[#allocation13_spill] sm:$0xff] }
 0x34d   : > { %v4471_v57 = vadd.f32 %v5526_v46, %v4470_v26  ;;  %v5274_v36 = vmul.f32 -1.442695, %v9335_v20  ;;  %v3028_v22 = vmax.f32 %v2996_v6, %v8411_v33 }
 0x34e   : > { %v3206_v34 = vpop.f32.mrf.mxu3 }
 0x34f   : > { %v4475_v18 = vsel %vm4474_vm7, %v5526_v46, %v4471_v57  ;;  %v3288_v5 = vadd.f32 %v3206_v34, %v2357_v62  ;;  %5533 = vpow2.f32 %v5274_v36  ;;  %v3060_v7 = vmax.f32 %v3028_v22, %v10269_v37 }
 0x350   : > { %v5530_v11 = vpop.eup %5529  ;;  %v4480_v17 = vsel %vm4477_vm10, %v4479_v12, %v4475_v18  ;;  %v2965_v18 = vmax.f32 %v10191_v2, %v8253_v27  ;;  %v9375_v34 = vpop.f32.mrf.mxu1 }
 0x351   : > { %v5532_v0 = vpop.eup %5531  ;;  %v4905_v52 = vmul.f32 %v4480_v17, %v9246_v13  ;;  %v4483_v53 = vmul.f32 %v5530_v11, %v9315_v50  ;;  %v4233_v46 = vadd.f32 %v9151_v29, %v3288_v5  ;;  %v4493_v13 = vand.u32 2147483648, %v9315_v50  ;;  %v10270_v17 = vld [vmem:[#allocation24_spill] sm:$0xff] }
 0x352   : > { %v4395_v21 = vadd.f32 1.0, %v5532_v0  ;;  %vm4488_vm14 = vweird.f32 %v5530_v11  ;;  %v2363_v5 = vadd.f32 %v9237_v60, %v10270_v17  ;;  %v10273_v17 = vld [vmem:[#allocation72_spill] sm:$0xff] }
 0x353   : > { %4937 = vst.msk [vmem:[%s9270_s11 + $0x18] sm:$0xff] %vm306_vm0, %v4905_v52  ;;  %v4484_v8 = vsub.f32 1.0, %v4483_v53  ;;  %5228 = vmatmul.msk.f32.gmra.mxu3 %vm1156_vm1, %v3059_v1  ;;  %v9357_v29 = vadd.f32 %v9185_v3, %v4233_v46  ;;  %vm4489_vm3 = vmor %vm4487_vm6, %vm4488_vm14  ;;  %v4494_v23 = vor.u32 1.1754944e-38, %v4493_v13  ;;  %v9389_v6 = vpop.f32.mrf.mxu2 }
 0x354   : > { %5535 = vrcp.f32 %v4395_v21  ;;  %v4506_v0 = vand.u32 2147483647, %v4395_v21  ;;  %vm4502_vm15 = vweird.f32 %v4395_v21 }
 0x355   : > { %v4485_v51 = vmul.f32 %v5530_v11, %v4484_v8  ;;  %v5534_v59 = vpop.eup %5533  ;;  %v5275_v35 = vmul.f32 -1.442695, %v9357_v29 }
 0x356   : > { %v3209_v45 = vpop.f32.mrf.mxu3  ;;  %v9366_v26 = vadd.f32 1.0, %v5534_v59  ;;  %vm4507_vm4 = vcmp.eq.f32.partialorder %v4506_v0, 8.507059e+37  ;;  %v2966_v59 = vmax.f32 %v10198_v14, %v8300_v24 }
 0x357   : > { %v4486_v42 = vadd.f32 %v5530_v11, %v4485_v51  ;;  %v3289_v41 = vadd.f32 %v3209_v45, %v2360_v39  ;;  %5537 = vpow2.f32 %v5275_v35 }
 0x358   : > { %5539 = vrcp.f32 %v9366_v26  ;;  %v4521_v22 = vand.u32 2147483647, %v9366_v26  ;;  %vm4517_vm8 = vweird.f32 %v9366_v26 }
 0x359   : > { %v4490_v57 = vsel %vm4489_vm3, %v5530_v11, %v4486_v42  ;;  %v4234_v36 = vadd.f32 %v9222_v61, %v3289_v41  ;;  %v2997_v11 = vmax.f32 %v2965_v18, %v8367_v30  ;;  %v2998_v41 = vmax.f32 %v2966_v59, %v8411_v33 }
 0x35a   : > { %v5536_v25 = vpop.eup %5535  ;;  %v4495_v62 = vsel %vm4492_vm12, %v4494_v23, %v4490_v57  ;;  %v4523_v23 = vand.u32 2147483648, %v9366_v26  ;;  %vm4522_vm11 = vcmp.eq.f32.partialorder %v4521_v22, 8.507059e+37 }
 0x35b   : > { %v4906_v50 = vmul.f32 %v4495_v62, %v9280_v16  ;;  %v4498_v12 = vmul.f32 %v5536_v25, %v4395_v21  ;;  %5229 = vmatmul.msk.f32.gmra.mxu3 %vm1156_vm1, %v3060_v7  ;;  %v4508_v16 = vand.u32 2147483648, %v4395_v21  ;;  %v9383_v52 = vadd.f32 %v9185_v3, %v4234_v36 }
 0x35c   : > { %vm4503_vm13 = vweird.f32 %v5536_v25  ;;  %v3029_v61 = vmax.f32 %v2997_v11, %v8458_v40 }
 0x35d   : > { %4938 = vst.msk [vmem:[%s9270_s11 + $0x20] sm:$0xff] %vm306_vm0, %v4906_v50  ;;  %v4499_v28 = vsub.f32 1.0, %v4498_v12  ;;  %v5538_v53 = vpop.eup %5537  ;;  %v5276_v8 = vmul.f32 -1.442695, %v9383_v52  ;;  %vm4504_vm2 = vmor %vm4502_vm15, %vm4503_vm13  ;;  %v4509_v39 = vor.u32 1.1754944e-38, %v4508_v16  ;;  %v9408_v50 = vpop.f32.mrf.mxu1 }
 0x35e   : > { %v3212_v2 = vpop.f32.mrf.mxu3  ;;  %v5540_v46 = vpop.eup %5539  ;;  %v9386_v9 = vadd.f32 1.0, %v5538_v53  ;;  %v3061_v47 = vmax.f32 %v3029_v61, %v10271_v56 }
 0x35f   : > { %v4500_v1 = vmul.f32 %v5536_v25, %v4499_v28  ;;  %v3290_v13 = vadd.f32 %v3212_v2, %v2363_v5  ;;  %v4513_v51 = vmul.f32 %v5540_v46, %v9366_v26  ;;  %vm4518_vm5 = vweird.f32 %v5540_v46 }
 0x360   : > { %5541 = vrcp.f32 %v9386_v9  ;;  %vm4519_vm9 = vmor %vm4517_vm8, %vm4518_vm5  ;;  %v4524_v28 = vor.u32 1.1754944e-38, %v4523_v23  ;;  %vm4532_vm10 = vweird.f32 %v9386_v9 }
 0x361   : > { %v4501_v60 = vadd.f32 %v5536_v25, %v4500_v1  ;;  %v4514_v35 = vsub.f32 1.0, %v4513_v51  ;;  %5543 = vpow2.f32 %v5276_v8  ;;  %v4235_v45 = vadd.f32 %v9250_v31, %v3290_v13  ;;  %v9422_v8 = vpop.f32.mrf.mxu2 }
 0x362   : > { %v3030_v31 = vmax.f32 %v2998_v41, %v10269_v37  ;;  %v2968_v41 = vmax.f32 %v8300_v24, %v8411_v33 }
 0x363   : > { %v4505_v42 = vsel %vm4504_vm2, %v5536_v25, %v4501_v60  ;;  %5230 = vmatmul.msk.f32.gmra.mxu3 %vm1156_vm1, %v3061_v47  ;;  %v4515_v7 = vmul.f32 %v5540_v46, %v4514_v35  ;;  %v9403_v14 = vadd.f32 %v9185_v3, %v4235_v45  ;;  %v10272_v25 = vld [vmem:[#allocation40_spill] sm:$0xff] }
 0x364   : > { %v4510_v21 = vsel %vm4507_vm4, %v4509_v39, %v4505_v42  ;;  %v2366_v62 = vadd.f32 %v9262_v4, %v10272_v25  ;;  %v3062_v5 = vmax.f32 %v3030_v31, %v10273_v17  ;;  %v2967_v4 = vmax.f32 %v8253_v27, %v8367_v30  ;;  %v10274_v39 = vld [vmem:[#allocation19_spill] sm:$0xff] }
 0x365   : > { %v4907_v57 = vmul.f32 %v4510_v21, %v9311_v38  ;;  %v4516_v12 = vadd.f32 %v5540_v46, %v4515_v7  ;;  %v5277_v18 = vmul.f32 -1.442695, %v9403_v14  ;;  %v4538_v27 = vand.u32 2147483648, %v9386_v9 }
 0x366   : > { %v3215_v38 = vpop.f32.mrf.mxu3  ;;  %v5542_v36 = vpop.eup %5541  ;;  %v2999_v61 = vmax.f32 %v2967_v4, %v8458_v40  ;;  %v3000_v24 = vmax.f32 %v2968_v41, %v10269_v37  ;;  %v10278_v41 = vld [vmem:[#allocation43_spill] sm:$0xff] }
 0x367   : > { %4939 = vst.msk [vmem:[%s9270_s11 + $0x28] sm:$0xff] %vm306_vm0, %v4907_v57  ;;  %v3291_v11 = vadd.f32 %v3215_v38, %v2366_v62  ;;  %v5544_v0 = vpop.eup %5543  ;;  %v4520_v16 = vsel %vm4519_vm9, %v5540_v46, %v4516_v12  ;;  %v4528_v53 = vmul.f32 %v5542_v36, %v9386_v9  ;;  %5545 = vpow2.f32 %v5277_v18  ;;  %v9443_v57 = vpop.f32.mrf.mxu1  ;;  %v10276_v38 = vld [vmem:[#allocation45_spill] sm:$0xff] }
 0x368   : > { %v4525_v26 = vsel %vm4522_vm11, %v4524_v28, %v4520_v16  ;;  %v9418_v1 = vadd.f32 1.0, %v5544_v0  ;;  %v3031_v46 = vmax.f32 %v2999_v61, %v10271_v56  ;;  %vm4533_vm7 = vweird.f32 %v5542_v36 }
 0x369   : > { %v4236_v2 = vadd.f32 %v9287_v48, %v3291_v11  ;;  %v4908_v13 = vmul.f32 %v4525_v26, %v9335_v20  ;;  %v4529_v60 = vsub.f32 1.0, %v4528_v53  ;;  %v4536_v48 = vand.u32 2147483647, %v9386_v9  ;;  %vm4534_vm14 = vmor %vm4532_vm10, %vm4533_vm7  ;;  %v9454_v28 = vpop.f32.mrf.mxu2 }
 0x36a   : > { %5547 = vrcp.f32 %v9418_v1  ;;  %v2369_v20 = vadd.f32 %v9299_v55, %v10274_v39  ;;  %v4539_v21 = vor.u32 1.1754944e-38, %v4538_v27  ;;  %v10275_v55 = vld [vmem:[#allocation14_spill] sm:$0xff]  ;;  %v4553_v4 = vand.u32 2147483648, %v9418_v1 }
 0x36b   : > { %5231 = vmatmul.msk.f32.gmra.mxu3 %vm1156_vm1, %v3062_v5  ;;  %4940 = vst.msk [vmem:[%s9270_s11 + $0x30] sm:$0xff] %vm306_vm0, %v4908_v13  ;;  %v4530_v51 = vmul.f32 %v5542_v36, %v4529_v60  ;;  %v9433_v47 = vadd.f32 %v9185_v3, %v4236_v2  ;;  %vm4537_vm6 = vcmp.eq.f32.partialorder %v4536_v48, 8.507059e+37  ;;  %v3063_v25 = vmax.f32 %v3031_v46, %v10275_v55 }
 0x36c   : > { %v3032_v5 = vmax.f32 %v3000_v24, %v10273_v17  ;;  %vm4547_vm12 = vweird.f32 %v9418_v1  ;;  %v10279_v24 = vld [vmem:[#allocation42_spill] sm:$0xff] }
 0x36d   : > { %v5546_v59 = vpop.eup %5545  ;;  %v4531_v42 = vadd.f32 %v5542_v36, %v4530_v51  ;;  %v5278_v35 = vmul.f32 -1.442695, %v9433_v47  ;;  %v10277_v51 = vld [vmem:[#allocation16_spill] sm:$0xff] }
 0x36e   : > { %v3218_v45 = vpop.f32.mrf.mxu3  ;;  %v9439_v22 = vadd.f32 1.0, %v5546_v59  ;;  %v3064_v48 = vmax.f32 %v3032_v5, %v10277_v51 }
 0x36f   : > { %v3292_v23 = vadd.f32 %v3218_v45, %v2369_v20  ;;  %v4535_v7 = vsel %vm4534_vm14, %v5542_v36, %v4531_v42  ;;  %5549 = vpow2.f32 %v5278_v35  ;;  %v2372_v36 = vadd.f32 %v9331_v32, %v10276_v38 }
 0x370   : > { %v5548_v9 = vpop.eup %5547  ;;  %v4540_v62 = vsel %vm4537_vm6, %v4539_v21, %v4535_v7  ;;  %5551 = vrcp.f32 %v9439_v22  ;;  %v4566_v59 = vand.u32 2147483647, %v9439_v22  ;;  %v4568_v42 = vand.u32 2147483648, %v9439_v22 }
 0x371   : > { %v4909_v31 = vmul.f32 %v4540_v62, %v9357_v29  ;;  %v4543_v12 = vmul.f32 %v5548_v9, %v9418_v1  ;;  %v4237_v18 = vadd.f32 %v9318_v49, %v3292_v23  ;;  %v4551_v29 = vand.u32 2147483647, %v9418_v1 }
 0x372   : > { %v2969_v49 = vmax.f32 %v8367_v30, %v8458_v40  ;;  %vm4548_vm3 = vweird.f32 %v5548_v9  ;;  %v4554_v30 = vor.u32 1.1754944e-38, %v4553_v4  ;;  %v9474_v40 = vpop.f32.mrf.mxu1  ;;  %v2375_v7 = vadd.f32 %v9361_v43, %v10278_v41 }
 0x373   : > { %5232 = vmatmul.msk.f32.gmra.mxu3 %vm1156_vm1, %v3063_v25  ;;  %4941 = vst.msk [vmem:[%s9270_s11 + $0x38] sm:$0xff] %vm306_vm0, %v4909_v31  ;;  %v4544_v11 = vsub.f32 1.0, %v4543_v12  ;;  %v9462_v0 = vadd.f32 %v9185_v3, %v4237_v18  ;;  %vm4549_vm13 = vmor %vm4547_vm12, %vm4548_vm3  ;;  %vm4552_vm15 = vcmp.eq.f32.partialorder %v4551_v29, 8.507059e+37  ;;  %v9489_v25 = vpop.f32.mrf.mxu2  ;;  %vm4562_vm4 = vweird.f32 %v9439_v22 }
 0x374   : > { %v3001_v60 = vmax.f32 %v2969_v49, %v10271_v56  ;;  %v4569_v31 = vor.u32 1.1754944e-38, %v4568_v42  ;;  %vm4567_vm8 = vcmp.eq.f32.partialorder %v4566_v59, 8.507059e+37  ;;  %v10281_v42 = vld [vmem:[#allocation48_spill] sm:$0xff] }
 0x375   : > { %v5550_v16 = vpop.eup %5549  ;;  %v4545_v53 = vmul.f32 %v5548_v9, %v4544_v11  ;;  %v5279_v61 = vmul.f32 -1.442695, %v9462_v0 }
 0x376   : > { %v3221_v32 = vpop.f32.mrf.mxu3  ;;  %v5552_v26 = vpop.eup %5551  ;;  %v9466_v2 = vadd.f32 1.0, %v5550_v16  ;;  %v3033_v35 = vmax.f32 %v3001_v60, %v10275_v55 }
 0x377   : > { %v3293_v13 = vadd.f32 %v3221_v32, %v2372_v36  ;;  %v4546_v27 = vadd.f32 %v5548_v9, %v4545_v53  ;;  %v4558_v46 = vmul.f32 %v5552_v26, %v9439_v22  ;;  %vm4563_vm2 = vweird.f32 %v5552_v26 }
 0x378   : > { %5553 = vrcp.f32 %v9466_v2  ;;  %vm4564_vm5 = vmor %vm4562_vm4, %vm4563_vm2  ;;  %v3065_v18 = vmax.f32 %v3033_v35, %v10279_v24  ;;  %v4583_v4 = vand.u32 2147483648, %v9466_v2  ;;  %v4581_v53 = vand.u32 2147483647, %v9466_v2 }
 0x379   : > { %v4550_v39 = vsel %vm4549_vm13, %v5548_v9, %v4546_v27  ;;  %v4559_v20 = vsub.f32 1.0, %v4558_v46  ;;  %5555 = vpow2.f32 %v5279_v61  ;;  %v4238_v56 = vadd.f32 %v9348_v58, %v3293_v13 }
 0x37a   : > { %v4555_v1 = vsel %vm4552_vm15, %v4554_v30, %v4550_v39  ;;  %v2970_v58 = vmax.f32 %v8411_v33, %v10269_v37  ;;  %v9503_v49 = vpop.f32.mrf.mxu1  ;;  %vm4577_vm11 = vweird.f32 %v9466_v2  ;;  %v4584_v27 = vor.u32 1.1754944e-38, %v4583_v4 }
 0x37b   : > { %5233 = vmatmul.msk.f32.gmra.mxu3 %vm1156_vm1, %v3064_v48  ;;  %v4910_v45 = vmul.f32 %v4555_v1, %v9383_v52  ;;  %v4560_v21 = vmul.f32 %v5552_v26, %v4559_v20  ;;  %v9483_v23 = vadd.f32 %v9185_v3, %v4238_v56  ;;  %v9515_v48 = vpop.f32.mrf.mxu2  ;;  %vm4582_vm10 = vcmp.eq.f32.partialorder %v4581_v53, 8.507059e+37 }
 0x37c   : > { %v3002_v43 = vmax.f32 %v2970_v58, %v10273_v17  ;;  %v2381_v35 = vadd.f32 %v9422_v8, %v10281_v42 }
 0x37d   : > { %4942 = vst.msk [vmem:[%s9270_s11 + $0x40] sm:$0xff] %vm306_vm0, %v4910_v45  ;;  %v4561_v9 = vadd.f32 %v5552_v26, %v4560_v21  ;;  %v5280_v52 = vmul.f32 -1.442695, %v9483_v23 }
 0x37e   : > { %v3224_v55 = vpop.f32.mrf.mxu3  ;;  %v5554_v62 = vpop.eup %5553  ;;  %v3034_v17 = vmax.f32 %v3002_v43, %v10277_v51 }
 0x37f   : > { %v3294_v12 = vadd.f32 %v3224_v55, %v2375_v7  ;;  %v5556_v33 = vpop.eup %5555  ;;  %v4565_v37 = vsel %vm4564_vm5, %v5552_v26, %v4561_v9  ;;  %v4573_v38 = vmul.f32 %v5554_v62, %v9466_v2  ;;  %5557 = vpow2.f32 %v5280_v52 }
 0x380   : > { %v4570_v36 = vsel %vm4567_vm8, %v4569_v31, %v4565_v37  ;;  %v4401_v22 = vadd.f32 1.0, %v5556_v33  ;;  %vm4578_vm9 = vweird.f32 %v5554_v62  ;;  %v3066_v39 = vmax.f32 %v3034_v17, %v9086_v10 }
 0x381   : > { %v4239_v11 = vadd.f32 %v9375_v34, %v3294_v12  ;;  %v4911_v5 = vmul.f32 %v4570_v36, %v9403_v14  ;;  %v4574_v29 = vsub.f32 1.0, %v4573_v38  ;;  %v10280_v14 = vld [vmem:[#allocation15_spill] sm:$0xff]  ;;  %vm4579_vm7 = vmor %vm4577_vm11, %vm4578_vm9 }
 0x382   : > { %5559 = vrcp.f32 %v4401_v22  ;;  %v2378_v32 = vadd.f32 %v9389_v6, %v10280_v14  ;;  %v4596_v45 = vand.u32 2147483647, %v4401_v22  ;;  %v4598_v21 = vand.u32 2147483648, %v4401_v22  ;;  %v9528_v7 = vpop.f32.mrf.mxu1 }
 0x383   : > { %5234 = vmatmul.msk.f32.gmra.mxu3 %vm1156_vm1, %v3065_v18  ;;  %4943 = vst.msk [vmem:[%s9270_s11 + $0x48] sm:$0xff] %vm306_vm0, %v4911_v5  ;;  %v4575_v16 = vmul.f32 %v5554_v62, %v4574_v29  ;;  %v9509_v34 = vadd.f32 %v9185_v3, %v4239_v11  ;;  %v9534_v12 = vpop.f32.mrf.mxu2  ;;  %v10282_v5 = vld [vmem:[#allocation18_spill] sm:$0xff] }
 0x384   : > { %vm4597_vm3 = vcmp.eq.f32.partialorder %v4596_v45, 8.507059e+37  ;;  %v4599_v31 = vor.u32 1.1754944e-38, %v4598_v21  ;;  %v2384_v29 = vadd.f32 %v9454_v28, %v10282_v5 }
 0x385   : > { %v5558_v26 = vpop.eup %5557  ;;  %v4576_v61 = vadd.f32 %v5554_v62, %v4575_v16  ;;  %v5281_v13 = vmul.f32 -1.442695, %v9509_v34 }
 0x386   : > { %v3227_v60 = vpop.f32.mrf.mxu3  ;;  %v4402_v46 = vadd.f32 1.0, %v5558_v26 }
 0x387   : > { %v3295_v51 = vadd.f32 %v3227_v60, %v2378_v32  ;;  %v4580_v30 = vsel %vm4579_vm7, %v5554_v62, %v4576_v61  ;;  %5561 = vpow2.f32 %v5281_v13 }
 0x388   : > { %v5560_v6 = vpop.eup %5559  ;;  %v4585_v20 = vsel %vm4582_vm10, %v4584_v27, %v4580_v30  ;;  %5563 = vrcp.f32 %v4402_v46  ;;  %v4611_v37 = vand.u32 2147483647, %v4402_v46  ;;  %v4613_v38 = vand.u32 2147483648, %v4402_v46 }
 0x389   : > { %v4912_v2 = vmul.f32 %v4585_v20, %v9433_v47  ;;  %v4588_v56 = vmul.f32 %v5560_v6, %v4401_v22  ;;  %v4240_v1 = vadd.f32 %v9408_v50, %v3295_v51  ;;  %vm4593_vm14 = vweird.f32 %v5560_v6 }
 0x38a   : > { %vm4607_vm13 = vweird.f32 %v4402_v46  ;;  %v4614_v53 = vor.u32 1.1754944e-38, %v4613_v38  ;;  %v9546_v32 = vpop.f32.mrf.mxu1  ;;  %vm4612_vm2 = vcmp.eq.f32.partialorder %v4611_v37, 8.507059e+37 }
 0x38b   : > { %5235 = vmatmul.msk.f32.gmra.mxu3 %vm1156_vm1, %v3066_v39  ;;  %4944 = vst.msk [vmem:[%s9270_s11 + $0x50] sm:$0xff] %vm306_vm0, %v4912_v2  ;;  %v4589_v59 = vsub.f32 1.0, %v4588_v56  ;;  %v9526_v10 = vadd.f32 %v9185_v3, %v4240_v1  ;;  %vm4592_vm1 = vweird.f32 %v4401_v22  ;;  %v9552_v30 = vpop.f32.mrf.mxu2  ;;  %v10283_v2 = vld [vmem:[#allocation46_spill] sm:$0xff] }
 0x38c   : > { %vm4594_vm6 = vmor %vm4592_vm1, %vm4593_vm14 }
 0x38d   : > { %v5562_v41 = vpop.eup %5561  ;;  %v4590_v47 = vmul.f32 %v5560_v6, %v4589_v59  ;;  %v5282_v50 = vmul.f32 -1.442695, %v9526_v10 }
 0x38e   : > { %v3230_v58 = vpop.f32.mrf.mxu3  ;;  %v5564_v9 = vpop.eup %5563  ;;  %v9530_v52 = vadd.f32 1.0, %v5562_v41 }
 0x38f   : > { %v3296_v55 = vadd.f32 %v3230_v58, %v2381_v35  ;;  %v4591_v62 = vadd.f32 %v5560_v6, %v4590_v47  ;;  %v4603_v8 = vmul.f32 %v5564_v9, %v4402_v46  ;;  %vm4608_vm12 = vweird.f32 %v5564_v9 }
 0x390   : > { %5565 = vrcp.f32 %v9530_v52  ;;  %vm4609_vm15 = vmor %vm4607_vm13, %vm4608_vm12  ;;  %v4628_v51 = vand.u32 2147483648, %v9530_v52  ;;  %vm4622_vm5 = vweird.f32 %v9530_v52 }
 0x391   : > { %v4595_v24 = vsel %vm4594_vm6, %v5560_v6, %v4591_v62  ;;  %v4604_v18 = vsub.f32 1.0, %v4603_v8  ;;  %5567 = vpow2.f32 %v5282_v50  ;;  %v4241_v43 = vadd.f32 %v9443_v57, %v3296_v55  ;;  %v10284_v55 = vld [vmem:[#allocation20_spill] sm:$0xff] }
 0x392   : > { %v4600_v33 = vsel %vm4597_vm3, %v4599_v31, %v4595_v24  ;;  %v4626_v6 = vand.u32 2147483647, %v9530_v52  ;;  %v4629_v42 = vor.u32 1.1754944e-38, %v4628_v51  ;;  %v9564_v58 = vpop.f32.mrf.mxu1  ;;  %v2390_v62 = vadd.f32 %v9515_v48, %v10284_v55 }
 0x393   : > { %v4913_v36 = vmul.f32 %v4600_v33, %v9462_v0  ;;  %v4605_v22 = vmul.f32 %v5564_v9, %v4604_v18  ;;  %v9539_v11 = vadd.f32 %v9185_v3, %v4241_v43  ;;  %v9575_v43 = vpop.f32.mrf.mxu2 }
 0x394   : > { %vm4627_vm9 = vcmp.eq.f32.partialorder %v4626_v6, 8.507059e+37 }
 0x395   : > { %4945 = vst.msk [vmem:[%s9270_s11 + $0x58] sm:$0xff] %vm306_vm0, %v4913_v36  ;;  %v4606_v4 = vadd.f32 %v5564_v9, %v4605_v22  ;;  %v5283_v17 = vmul.f32 -1.442695, %v9539_v11 }
 0x396   : > { %v3233_v57 = vpop.f32.mrf.mxu3  ;;  %v5566_v16 = vpop.eup %5565 }
 0x397   : > { %v3297_v0 = vadd.f32 %v3233_v57, %v2384_v29  ;;  %v5568_v14 = vpop.eup %5567  ;;  %v4610_v26 = vsel %vm4609_vm15, %v5564_v9, %v4606_v4  ;;  %v4618_v61 = vmul.f32 %v5566_v16, %v9530_v52  ;;  %5569 = vpow2.f32 %v5283_v17 }
 0x398   : > { %v4615_v28 = vsel %vm4612_vm2, %v4614_v53, %v4610_v26  ;;  %v4404_v13 = vadd.f32 1.0, %v5568_v14  ;;  %vm4623_vm4 = vweird.f32 %v5566_v16  ;;  %v9588_v26 = vld [vmem:[%s9793_s4] ss:$0 sm:$0xff] }
 0x399   : > { %v4242_v60 = vadd.f32 %v9474_v40, %v3297_v0  ;;  %v4914_v27 = vmul.f32 %v4615_v28, %v9483_v23  ;;  %v4619_v46 = vsub.f32 1.0, %v4618_v61  ;;  %v2387_v40 = vadd.f32 %v9489_v25, %v10283_v2  ;;  %vm4624_vm8 = vmor %vm4622_vm5, %vm4623_vm4  ;;  %v10285_v28 = vld [vmem:[#allocation49_spill] sm:$0xff] }
 0x39a   : > { %5571 = vrcp.f32 %v4404_v13  ;;  %v4641_v8 = vand.u32 2147483647, %v4404_v13  ;;  %v4643_v31 = vand.u32 2147483648, %v4404_v13  ;;  %vm4637_vm7 = vweird.f32 %v4404_v13  ;;  %v9582_v53 = vpop.f32.mrf.mxu1 }
 0x39b   : > { %4946 = vst.msk [vmem:[%s9270_s11 + $0x60] sm:$0xff] %vm306_vm0, %v4914_v27  ;;  %v4620_v39 = vmul.f32 %v5566_v16, %v4619_v46  ;;  %v9558_v20 = vadd.f32 %v9185_v3, %v4242_v60  ;;  %v9598_v6 = vpop.f32.mrf.mxu2 }
 0x39c   : > { %vm4642_vm14 = vcmp.eq.f32.partialorder %v4641_v8, 8.507059e+37  ;;  %v4644_v5 = vor.u32 1.1754944e-38, %v4643_v31 }
 0x39d   : > { %v5570_v56 = vpop.eup %5569  ;;  %v4621_v23 = vadd.f32 %v5566_v16, %v4620_v39  ;;  %v5284_v1 = vmul.f32 -1.442695, %v9558_v20 }
 0x39e   : > { %v3236_v59 = vpop.f32.mrf.mxu3  ;;  %v4405_v35 = vadd.f32 1.0, %v5570_v56 }
 0x39f   : > { %v3298_v45 = vadd.f32 %v3236_v59, %v2387_v40  ;;  %v4625_v21 = vsel %vm4624_vm8, %v5566_v16, %v4621_v23  ;;  %5573 = vpow2.f32 %v5284_v1 }
 0x3a0   : > { %v5572_v41 = vpop.eup %5571  ;;  %v4630_v47 = vsel %vm4627_vm9, %v4629_v42, %v4625_v21  ;;  %5575 = vrcp.f32 %v4405_v35  ;;  %v4656_v57 = vand.u32 2147483647, %v4405_v35  ;;  %v4658_v16 = vand.u32 2147483648, %v4405_v35 }
 0x3a1   : > { %v4915_v25 = vmul.f32 %v4630_v47, %v9509_v34  ;;  %v4633_v9 = vmul.f32 %v5572_v41, %v4404_v13  ;;  %v4243_v52 = vadd.f32 %v9503_v49, %v3298_v45  ;;  %vm4638_vm11 = vweird.f32 %v5572_v41 }
 0x3a2   : > { %vm4639_vm10 = vmor %vm4637_vm7, %vm4638_vm11  ;;  %vm4652_vm6 = vweird.f32 %v4405_v35  ;;  %v4659_v46 = vor.u32 1.1754944e-38, %v4658_v16  ;;  %vm4657_vm12 = vcmp.eq.f32.partialorder %v4656_v57, 8.507059e+37 }
 0x3a3   : > { %4947 = vst.msk [vmem:[%s9270_s11 + $0x68] sm:$0xff] %vm306_vm0, %v4915_v25  ;;  %v4634_v50 = vsub.f32 1.0, %v4633_v9  ;;  %v9573_v24 = vadd.f32 %v9185_v3, %v4243_v52 }
 0x3a5   : > { %v5574_v18 = vpop.eup %5573  ;;  %v4635_v33 = vmul.f32 %v5572_v41, %v4634_v50  ;;  %v5285_v49 = vmul.f32 -1.442695, %v9573_v24 }
 0x3a6   : > { %v3239_v34 = vpop.f32.mrf.mxu3  ;;  %v5576_v37 = vpop.eup %5575  ;;  %v9577_v38 = vadd.f32 1.0, %v5574_v18 }
 0x3a7   : > { %v3299_v36 = vadd.f32 %v3239_v34, %v2390_v62  ;;  %v4636_v22 = vadd.f32 %v5572_v41, %v4635_v33  ;;  %v4648_v48 = vmul.f32 %v5576_v37, %v4405_v35  ;;  %vm4653_vm1 = vweird.f32 %v5576_v37 }
 0x3a8   : > { %5577 = vrcp.f32 %v9577_v38  ;;  %vm4654_vm3 = vmor %vm4652_vm6, %vm4653_vm1  ;;  %v4673_v42 = vand.u32 2147483648, %v9577_v38  ;;  %v4671_v45 = vand.u32 2147483647, %v9577_v38  ;;  %vm4667_vm15 = vweird.f32 %v9577_v38 }
 0x3a9   : > { %v4640_v3 = vsel %vm4639_vm10, %v5572_v41, %v4636_v22  ;;  %v4649_v29 = vsub.f32 1.0, %v4648_v48  ;;  %5579 = vpow2.f32 %v5285_v49  ;;  %v4244_v4 = vadd.f32 %v9528_v7, %v3299_v36  ;;  %v10286_v41 = vld [vmem:[#allocation75_spill] sm:$0xff]  ;;  %v10287_v49 = vld [vmem:[#allocation44_spill] sm:$0xff] }
 0x3aa   : > { %v4645_v17 = vsel %vm4642_vm14, %v4644_v5, %v4640_v3  ;;  %v2393_v7 = vadd.f32 %v9534_v12, %v10285_v28  ;;  %v2396_v47 = vadd.f32 %v9552_v30, %v10286_v41  ;;  %v4674_v50 = vor.u32 1.1754944e-38, %v4673_v42  ;;  %v9616_v30 = vpop.f32.mrf.mxu2 }
 0x3ab   : > { %v4916_v0 = vmul.f32 %v4645_v17, %v9526_v10  ;;  %v4650_v14 = vmul.f32 %v5576_v37, %v4649_v29  ;;  %v9591_v61 = vadd.f32 %v9588_v26, %v4244_v4  ;;  %vm4672_vm4 = vcmp.eq.f32.partialorder %v4671_v45, 8.507059e+37 }
 0x3ac   : > { %v2399_v36 = vadd.f32 %v9575_v43, %v10287_v49 }
 0x3ad   : > { %4948 = vst.msk [vmem:[%s9270_s11 + $0x70] sm:$0xff] %vm306_vm0, %v4916_v0  ;;  %v4651_v13 = vadd.f32 %v5576_v37, %v4650_v14  ;;  %v5286_v60 = vmul.f32 -1.442695, %v9591_v61 }
 0x3ae   : > { %v3242_v10 = vpop.f32.mrf.mxu3  ;;  %v5578_v27 = vpop.eup %5577 }
 0x3af   : > { %v3300_v51 = vadd.f32 %v3242_v10, %v2393_v7  ;;  %v5580_v39 = vpop.eup %5579  ;;  %v4655_v2 = vsel %vm4654_vm3, %v5576_v37, %v4651_v13  ;;  %v4663_v40 = vmul.f32 %v5578_v27, %v9577_v38  ;;  %5581 = vpow2.f32 %v5286_v60 }
 0x3b0   : > { %v4660_v12 = vsel %vm4657_vm12, %v4659_v46, %v4655_v2  ;;  %v4407_v56 = vadd.f32 1.0, %v5580_v39  ;;  %vm4668_vm13 = vweird.f32 %v5578_v27 }
 0x3b1   : > { %v4245_v23 = vadd.f32 %v9546_v32, %v3300_v51  ;;  %v4917_v1 = vmul.f32 %v4660_v12, %v9539_v11  ;;  %v4664_v59 = vsub.f32 1.0, %v4663_v40  ;;  %v9612_v32 = vpop.f32.mrf.mxu1  ;;  %vm4669_vm2 = vmor %vm4667_vm15, %vm4668_vm13  ;;  %v10288_v40 = vld [vmem:[#allocation21_spill] sm:$0xff] }
 0x3b2   : > { %5583 = vrcp.f32 %v4407_v56  ;;  %v4686_v22 = vand.u32 2147483647, %v4407_v56  ;;  %v4688_v48 = vand.u32 2147483648, %v4407_v56  ;;  %vm4682_vm8 = vweird.f32 %v4407_v56  ;;  %v2407_v46 = vpop.f32.mrf.mxu2 }
 0x3b3   : > { %4949 = vst.msk [vmem:[%s9270_s11 + $0x78] sm:$0xff] %vm306_vm0, %v4917_v1  ;;  %v4665_v35 = vmul.f32 %v5578_v27, %v4664_v59  ;;  %v9608_v21 = vadd.f32 %v9588_v26, %v4245_v23  ;;  %v2402_v12 = vadd.f32 %v9598_v6, %v10288_v40 }
 0x3b4   : > { %vm4687_vm11 = vcmp.eq.f32.partialorder %v4686_v22, 8.507059e+37  ;;  %v4689_v14 = vor.u32 1.1754944e-38, %v4688_v48 }
 0x3b5   : > { %v5582_v25 = vpop.eup %5581  ;;  %v4666_v11 = vadd.f32 %v5578_v27, %v4665_v35  ;;  %v5287_v9 = vmul.f32 -1.442695, %v9608_v21 }
 0x3b6   : > { %v3245_v52 = vpop.f32.mrf.mxu3  ;;  %v4408_v55 = vadd.f32 1.0, %v5582_v25 }
 0x3b7   : > { %v3301_v62 = vadd.f32 %v3245_v52, %v2396_v47  ;;  %v4670_v8 = vsel %vm4669_vm2, %v5578_v27, %v4666_v11  ;;  %5585 = vpow2.f32 %v5287_v9 }
 0x3b8   : > { %v5584_v31 = vpop.eup %5583  ;;  %v4675_v18 = vsel %vm4672_vm4, %v4674_v50, %v4670_v8  ;;  %5587 = vrcp.f32 %v4408_v55  ;;  %v4701_v10 = vand.u32 2147483647, %v4408_v55  ;;  %v4703_v27 = vand.u32 2147483648, %v4408_v55  ;;  %v10289_v8 = vld [vmem:[#allocation54_spill] sm:$0xff] }
 0x3b9   : > { %v4918_v33 = vmul.f32 %v4675_v18, %v9558_v20  ;;  %v4678_v34 = vmul.f32 %v5584_v31, %v4407_v56  ;;  %v4246_v37 = vadd.f32 %v9564_v58, %v3301_v62  ;;  %vm4683_vm5 = vweird.f32 %v5584_v31  ;;  %v9630_v16 = vpop.f32.mrf.mxu1 }
 0x3ba   : > { %vm4684_vm9 = vmor %vm4682_vm8, %vm4683_vm5  ;;  %vm4697_vm10 = vweird.f32 %v4408_v55  ;;  %v4704_v59 = vor.u32 1.1754944e-38, %v4703_v27  ;;  %vm4702_vm1 = vcmp.eq.f32.partialorder %v4701_v10, 8.507059e+37  ;;  %v2410_v18 = vpop.f32.mrf.mxu2 }
 0x3bb   : > { %4950 = vst.msk [vmem:[%s9270_s11 + $0x80] sm:$0xff] %vm306_vm0, %v4918_v33  ;;  %v4679_v38 = vsub.f32 1.0, %v4678_v34  ;;  %v9625_v5 = vadd.f32 %v9588_v26, %v4246_v37 }
 0x3bd   : > { %v5586_v3 = vpop.eup %5585  ;;  %v4680_v29 = vmul.f32 %v5584_v31, %v4679_v38  ;;  %v5288_v58 = vmul.f32 -1.442695, %v9625_v5 }
 0x3be   : > { %v3248_v4 = vpop.f32.mrf.mxu3  ;;  %v5588_v17 = vpop.eup %5587  ;;  %v9627_v20 = vadd.f32 1.0, %v5586_v3 }
 0x3bf   : > { %v3302_v57 = vadd.f32 %v3248_v4, %v2399_v36  ;;  %v4681_v0 = vadd.f32 %v5584_v31, %v4680_v29  ;;  %v4693_v43 = vmul.f32 %v5588_v17, %v4408_v55  ;;  %vm4698_vm7 = vweird.f32 %v5588_v17 }
 0x3c0   : > { %5589 = vrcp.f32 %v9627_v20  ;;  %vm4699_vm14 = vmor %vm4697_vm10, %vm4698_vm7  ;;  %v4718_v52 = vand.u32 2147483648, %v9627_v20  ;;  %v4716_v55 = vand.u32 2147483647, %v9627_v20  ;;  %vm4712_vm3 = vweird.f32 %v9627_v20 }
 0x3c1   : > { %v4685_v28 = vsel %vm4684_vm9, %v5584_v31, %v4681_v0  ;;  %v4694_v7 = vsub.f32 1.0, %v4693_v43  ;;  %5591 = vpow2.f32 %v5288_v58  ;;  %v4247_v13 = vadd.f32 %v9582_v53, %v3302_v57  ;;  %v4202_v25 = vpop.f32.mrf.mxu1 }
 0x3c2   : > { %v4690_v60 = vsel %vm4687_vm11, %v4689_v14, %v4685_v28  ;;  %v2405_v31 = vadd.f32 %v9616_v30, %v10289_v8  ;;  %v4719_v37 = vor.u32 1.1754944e-38, %v4718_v52  ;;  %vm4717_vm13 = vcmp.eq.f32.partialorder %v4716_v55, 8.507059e+37  ;;  %v2413_v10 = vpop.f32.mrf.mxu2 }
 0x3c3   : > { %v4919_v51 = vmul.f32 %v4690_v60, %v9573_v24  ;;  %v4695_v39 = vmul.f32 %v5588_v17, %v4694_v7  ;;  %v9636_v2 = vadd.f32 %v9588_v26, %v4247_v13 }
 0x3c5   : > { %4951 = vst.msk [vmem:[%s9270_s11 + $0x88] sm:$0xff] %vm306_vm0, %v4919_v51  ;;  %v4696_v56 = vadd.f32 %v5588_v17, %v4695_v39  ;;  %v5289_v53 = vmul.f32 -1.442695, %v9636_v2 }
 0x3c6   : > { %v3251_v23 = vpop.f32.mrf.mxu3  ;;  %v5590_v1 = vpop.eup %5589 }
 0x3c7   : > { %v3303_v24 = vadd.f32 %v3251_v23, %v2402_v12  ;;  %v5592_v42 = vpop.eup %5591  ;;  %v4700_v35 = vsel %vm4699_vm14, %v5588_v17, %v4696_v56  ;;  %v4708_v45 = vmul.f32 %v5590_v1, %v9627_v20  ;;  %5593 = vpow2.f32 %v5289_v53  ;;  %v10290_v20 = vld [vmem:[#allocation50_spill] sm:$0xff] }
 0x3c8   : > { %v4705_v41 = vsel %vm4702_vm1, %v4704_v59, %v4700_v35  ;;  %v4410_v6 = vadd.f32 1.0, %v5592_v42  ;;  %vm4713_vm6 = vweird.f32 %v5590_v1  ;;  %v2408_v58 = vadd.f32 %v2407_v46, %v10290_v20  ;;  %v10291_v42 = vld [vmem:[#allocation36_spill] sm:$0xff] }
 0x3c9   : > { %v4248_v47 = vadd.f32 %v9612_v32, %v3303_v24  ;;  %v4920_v11 = vmul.f32 %v4705_v41, %v9591_v61  ;;  %v4709_v9 = vsub.f32 1.0, %v4708_v45  ;;  %vm4714_vm12 = vmor %vm4712_vm3, %vm4713_vm6  ;;  %v4205_v4 = vpop.f32.mrf.mxu1  ;;  %v2411_v35 = vadd.f32 %v2410_v18, %v10291_v42 }
 0x3ca   : > { %5595 = vrcp.f32 %v4410_v6  ;;  %v4731_v57 = vand.u32 2147483647, %v4410_v6  ;;  %v4733_v0 = vand.u32 2147483648, %v4410_v6  ;;  %vm4727_vm2 = vweird.f32 %v4410_v6 }
 0x3cb   : > { %4952 = vst.msk [vmem:[%s9270_s11 + $0x90] sm:$0xff] %vm306_vm0, %v4920_v11  ;;  %v4710_v50 = vmul.f32 %v5590_v1, %v4709_v9  ;;  %v9651_v62 = vadd.f32 %v9588_v26, %v4248_v47 }
 0x3cc   : > { %vm4732_vm5 = vcmp.eq.f32.partialorder %v4731_v57, 8.507059e+37  ;;  %v4734_v46 = vor.u32 1.1754944e-38, %v4733_v0 }
 0x3cd   : > { %v5594_v32 = vpop.eup %5593  ;;  %v4711_v33 = vadd.f32 %v5590_v1, %v4710_v50  ;;  %v5290_v61 = vmul.f32 -1.442695, %v9651_v62 }
 0x3ce   : > { %v3254_v34 = vpop.f32.mrf.mxu3  ;;  %v4411_v38 = vadd.f32 1.0, %v5594_v32  ;;  %v2416_v32 = vpop.f32.mrf.mxu2 }
 0x3cf   : > { %v3304_v49 = vadd.f32 %v3254_v34, %v2405_v31  ;;  %v4715_v36 = vsel %vm4714_vm12, %v5590_v1, %v4711_v33  ;;  %5597 = vpow2.f32 %v5290_v61 }
 0x3d0   : > { %v5596_v22 = vpop.eup %5595  ;;  %v4720_v48 = vsel %vm4717_vm13, %v4719_v37, %v4715_v36  ;;  %5599 = vrcp.f32 %v4411_v38  ;;  %v4746_v53 = vand.u32 2147483647, %v4411_v38  ;;  %v4748_v23 = vand.u32 2147483648, %v4411_v38 }
 0x3d1   : > { %v4921_v30 = vmul.f32 %v4720_v48, %v9608_v21  ;;  %v4723_v3 = vmul.f32 %v5596_v22, %v4410_v6  ;;  %v4249_v29 = vadd.f32 %v9630_v16, %v3304_v49  ;;  %vm4728_vm15 = vweird.f32 %v5596_v22  ;;  %v4208_v45 = vpop.f32.mrf.mxu1  ;;  %v10292_v49 = vld [vmem:[#allocation79_spill] sm:$0xff] }
 0x3d2   : > { %vm4729_vm4 = vmor %vm4727_vm2, %vm4728_vm15  ;;  %vm4742_vm9 = vweird.f32 %v4411_v38  ;;  %v4749_v11 = vor.u32 1.1754944e-38, %v4748_v23  ;;  %vm4747_vm7 = vcmp.eq.f32.partialorder %v4746_v53, 8.507059e+37  ;;  %v2414_v36 = vadd.f32 %v2413_v10, %v10292_v49 }
 0x3d3   : > { %4953 = vst.msk [vmem:[%s9270_s11 + $0x98] sm:$0xff] %vm306_vm0, %v4921_v30  ;;  %v4724_v17 = vsub.f32 1.0, %v4723_v3  ;;  %v9663_v43 = vadd.f32 %v9588_v26, %v4249_v29 }
 0x3d5   : > { %v5598_v14 = vpop.eup %5597  ;;  %v4725_v28 = vmul.f32 %v5596_v22, %v4724_v17  ;;  %v5291_v16 = vmul.f32 -1.442695, %v9663_v43 }
 0x3d6   : > { %v3257_v7 = vpop.f32.mrf.mxu3  ;;  %v5600_v13 = vpop.eup %5599  ;;  %v9665_v21 = vadd.f32 1.0, %v5598_v14 }
 0x3d7   : > { %v3305_v60 = vadd.f32 %v3257_v7, %v2408_v58  ;;  %v4726_v27 = vadd.f32 %v5596_v22, %v4725_v28  ;;  %v4738_v51 = vmul.f32 %v5600_v13, %v4411_v38  ;;  %vm4743_vm8 = vweird.f32 %v5600_v13  ;;  %v2419_v7 = vpop.f32.mrf.mxu2 }
 0x3d8   : > { %5601 = vrcp.f32 %v9665_v21  ;;  %vm4744_vm11 = vmor %vm4742_vm9, %vm4743_vm8  ;;  %v4763_v61 = vand.u32 2147483648, %v9665_v21  ;;  %v4761_v37 = vand.u32 2147483647, %v9665_v21  ;;  %vm4757_vm14 = vweird.f32 %v9665_v21 }
 0x3d9   : > { %v4730_v39 = vsel %vm4729_vm4, %v5596_v22, %v4726_v27  ;;  %v4739_v40 = vsub.f32 1.0, %v4738_v51  ;;  %5603 = vpow2.f32 %v5291_v16  ;;  %v4250_v12 = vadd.f32 %v4202_v25, %v3305_v60  ;;  %v4211_v17 = vpop.f32.mrf.mxu1 }
 0x3da   : > { %v4735_v56 = vsel %vm4732_vm5, %v4734_v46, %v4730_v39  ;;  %v4764_v3 = vor.u32 1.1754944e-38, %v4763_v61  ;;  %vm4762_vm6 = vcmp.eq.f32.partialorder %v4761_v37, 8.507059e+37 }
 0x3db   : > { %v4922_v1 = vmul.f32 %v4735_v56, %v9625_v5  ;;  %v4740_v59 = vmul.f32 %v5600_v13, %v4739_v40  ;;  %v9671_v24 = vadd.f32 %v9588_v26, %v4250_v12 }
 0x3dd   : > { %4954 = vst.msk [vmem:[%s9270_s11 + $0xa0] sm:$0xff] %vm306_vm0, %v4922_v1  ;;  %v4741_v41 = vadd.f32 %v5600_v13, %v4740_v59  ;;  %v5292_v6 = vmul.f32 -1.442695, %v9671_v24 }
 0x3de   : > { %v3260_v47 = vpop.f32.mrf.mxu3  ;;  %v5602_v25 = vpop.eup %5601 }
 0x3df   : > { %v3306_v5 = vadd.f32 %v3260_v47, %v2411_v35  ;;  %v5604_v9 = vpop.eup %5603  ;;  %v4745_v52 = vsel %vm4744_vm11, %v5600_v13, %v4741_v41  ;;  %v4753_v50 = vmul.f32 %v5602_v25, %v9665_v21  ;;  %5605 = vpow2.f32 %v5292_v6 }
 0x3e0   : > { %v4750_v55 = vsel %vm4747_vm7, %v4749_v11, %v4745_v52  ;;  %v4413_v8 = vadd.f32 1.0, %v5604_v9  ;;  %vm4758_vm10 = vweird.f32 %v5602_v25  ;;  %v2417_v21 = vadd.f32 %v2416_v32, %v9096_v54 }
 0x3e1   : > { %v4251_v31 = vadd.f32 %v4205_v4, %v3306_v5  ;;  %v4923_v18 = vmul.f32 %v4750_v55, %v9636_v2  ;;  %v4754_v33 = vsub.f32 1.0, %v4753_v50  ;;  %vm4759_vm1 = vmor %vm4757_vm14, %vm4758_vm10  ;;  %v4214_v23 = vpop.f32.mrf.mxu1  ;;  %v2420_v11 = vadd.f32 %v2419_v7, %v9122_v15  ;;  %v2422_v5 = vpop.f32.mrf.mxu2 }
 0x3e2   : > { %5607 = vrcp.f32 %v4413_v8  ;;  %v4776_v16 = vand.u32 2147483647, %v4413_v8  ;;  %v4778_v60 = vand.u32 2147483648, %v4413_v8  ;;  %vm4772_vm12 = vweird.f32 %v4413_v8 }
 0x3e3   : > { %4955 = vst.msk [vmem:[%s9270_s11 + $0xa8] sm:$0xff] %vm306_vm0, %v4923_v18  ;;  %v4755_v34 = vmul.f32 %v5602_v25, %v4754_v33  ;;  %v9684_v38 = vadd.f32 %v9588_v26, %v4251_v31 }
 0x3e4   : > { %vm4777_vm15 = vcmp.eq.f32.partialorder %v4776_v16, 8.507059e+37  ;;  %v4779_v54 = vor.u32 1.1754944e-38, %v4778_v60 }
 0x3e5   : > { %v5606_v22 = vpop.eup %5605  ;;  %v4756_v48 = vadd.f32 %v5602_v25, %v4755_v34  ;;  %v5293_v2 = vmul.f32 -1.442695, %v9684_v38 }
 0x3e6   : > { %v3263_v30 = vpop.f32.mrf.mxu3  ;;  %v4414_v29 = vadd.f32 1.0, %v5606_v22 }
 0x3e7   : > { %v3307_v4 = vadd.f32 %v3263_v30, %v2414_v36  ;;  %v4760_v20 = vsel %vm4759_vm1, %v5602_v25, %v4756_v48  ;;  %5609 = vpow2.f32 %v5293_v2  ;;  %v2423_v30 = vadd.f32 %v2422_v5, %v9142_v44 }
 0x3e8   : > { %v5608_v58 = vpop.eup %5607  ;;  %v4765_v57 = vsel %vm4762_vm6, %v4764_v3, %v4760_v20  ;;  %5611 = vrcp.f32 %v4414_v29  ;;  %v4793_v41 = vand.u32 2147483648, %v4414_v29  ;;  %vm4787_vm4 = vweird.f32 %v4414_v29 }
 0x3e9   : > { %v4924_v0 = vmul.f32 %v4765_v57, %v9651_v62  ;;  %v4768_v14 = vmul.f32 %v5608_v58, %v4413_v8  ;;  %v4252_v28 = vadd.f32 %v4208_v45, %v3307_v4  ;;  %vm4773_vm3 = vweird.f32 %v5608_v58  ;;  %v4217_v36 = vpop.f32.mrf.mxu1  ;;  %v2425_v57 = vpop.f32.mrf.mxu2 }
 0x3ea   : > { %vm4774_vm13 = vmor %vm4772_vm12, %vm4773_vm3  ;;  %v4791_v45 = vand.u32 2147483647, %v4414_v29  ;;  %v4794_v8 = vor.u32 1.1754944e-38, %v4793_v41  ;;  %v2426_v16 = vadd.f32 %v2425_v57, %v9155_v19 }
 0x3eb   : > { %4956 = vst.msk [vmem:[%s9270_s11 + $0xb0] sm:$0xff] %vm306_vm0, %v4924_v0  ;;  %v4769_v13 = vsub.f32 1.0, %v4768_v14  ;;  %v9694_v10 = vadd.f32 %v9588_v26, %v4252_v28 }
 0x3ec   : > { %vm4792_vm8 = vcmp.eq.f32.partialorder %v4791_v45, 8.507059e+37 }
 0x3ed   : > { %v5610_v27 = vpop.eup %5609  ;;  %v4770_v51 = vmul.f32 %v5608_v58, %v4769_v13  ;;  %v5294_v62 = vmul.f32 -1.442695, %v9694_v10 }
 0x3ee   : > { %v3266_v46 = vpop.f32.mrf.mxu3  ;;  %v5612_v39 = vpop.eup %5611  ;;  %v9696_v40 = vadd.f32 1.0, %v5610_v27 }
 0x3ef   : > { %v3308_v12 = vadd.f32 %v3266_v46, %v2417_v21  ;;  %v4771_v56 = vadd.f32 %v5608_v58, %v4770_v51  ;;  %v4783_v53 = vmul.f32 %v5612_v39, %v4414_v29  ;;  %vm4788_vm2 = vweird.f32 %v5612_v39 }
 0x3f0   : > { %5613 = vrcp.f32 %v9696_v40  ;;  %vm4789_vm5 = vmor %vm4787_vm4, %vm4788_vm2  ;;  %v4808_v49 = vand.u32 2147483648, %v9696_v40  ;;  %v4806_v48 = vand.u32 2147483647, %v9696_v40  ;;  %vm4802_vm11 = vweird.f32 %v9696_v40 }
 0x3f1   : > { %v4775_v1 = vsel %vm4774_vm13, %v5608_v58, %v4771_v56  ;;  %v4784_v59 = vsub.f32 1.0, %v4783_v53  ;;  %5615 = vpow2.f32 %v5294_v62  ;;  %v4253_v42 = vadd.f32 %v4211_v17, %v3308_v12 }
 0x3f2   : > { %v4780_v35 = vsel %vm4777_vm15, %v4779_v54, %v4775_v1  ;;  %v4809_v17 = vor.u32 1.1754944e-38, %v4808_v49  ;;  %vm4807_vm10 = vcmp.eq.f32.partialorder %v4806_v48, 8.507059e+37  ;;  %v2428_v1 = vpop.f32.mrf.mxu2 }
 0x3f3   : > { %v4925_v6 = vmul.f32 %v4780_v35, %v9663_v43  ;;  %v4785_v47 = vmul.f32 %v5612_v39, %v4784_v59  ;;  %v9702_v25 = vadd.f32 %v9588_v26, %v4253_v42 }
 0x3f5   : > { %4957 = vst.msk [vmem:[%s9270_s11 + $0xb8] sm:$0xff] %vm306_vm0, %v4925_v6  ;;  %v4786_v9 = vadd.f32 %v5612_v39, %v4785_v47  ;;  %v5295_v52 = vmul.f32 -1.442695, %v9702_v25 }
 0x3f6   : > { %v3269_v50 = vpop.f32.mrf.mxu3  ;;  %v5614_v55 = vpop.eup %5613 }
 0x3f7   : > { %v3309_v43 = vadd.f32 %v3269_v50, %v2420_v11  ;;  %v5616_v31 = vpop.eup %5615  ;;  %v4790_v32 = vsel %vm4789_vm5, %v5612_v39, %v4786_v9  ;;  %v4798_v18 = vmul.f32 %v5614_v55, %v9696_v40  ;;  %5617 = vpow2.f32 %v5295_v52  ;;  %v4220_v39 = vpop.f32.mrf.mxu1 }
 0x3f8   : > { %v4795_v15 = vsel %vm4792_vm8, %v4794_v8, %v4790_v32  ;;  %v4416_v33 = vadd.f32 1.0, %v5616_v31  ;;  %vm4803_vm9 = vweird.f32 %v5614_v55  ;;  %v2429_v9 = vadd.f32 %v2428_v1, %v9167_v63 }
 0x3f9   : > { %v4254_v61 = vadd.f32 %v4214_v23, %v3309_v43  ;;  %v4926_v34 = vmul.f32 %v4795_v15, %v9671_v24  ;;  %v4799_v37 = vsub.f32 1.0, %v4798_v18  ;;  %vm4804_vm7 = vmor %vm4802_vm11, %vm4803_vm9 }
 0x3fa   : > { %5619 = vrcp.f32 %v4416_v33  ;;  %v4821_v60 = vand.u32 2147483647, %v4416_v33  ;;  %v4823_v27 = vand.u32 2147483648, %v4416_v33  ;;  %vm4817_vm1 = vweird.f32 %v4416_v33 }
 0x3fb   : > { %4958 = vst.msk [vmem:[%s9270_s11 + $0xc0] sm:$0xff] %vm306_vm0, %v4926_v34  ;;  %v4800_v22 = vmul.f32 %v5614_v55, %v4799_v37  ;;  %v9715_v2 = vadd.f32 %v9588_v26, %v4254_v61 }
 0x3fc   : > { %vm4822_vm3 = vcmp.eq.f32.partialorder %v4821_v60, 8.507059e+37  ;;  %v4824_v19 = vor.u32 1.1754944e-38, %v4823_v27 }
 0x3fd   : > { %v5618_v3 = vpop.eup %5617  ;;  %v4801_v29 = vadd.f32 %v5614_v55, %v4800_v22  ;;  %v5296_v24 = vmul.f32 -1.442695, %v9715_v2 }
 0x3fe   : > { %v3272_v4 = vpop.f32.mrf.mxu3  ;;  %v4417_v20 = vadd.f32 1.0, %v5618_v3 }
 0x3ff   : > { %v3310_v58 = vadd.f32 %v3272_v4, %v2423_v30  ;;  %v4805_v0 = vsel %vm4804_vm7, %v5614_v55, %v4801_v29  ;;  %5621 = vpow2.f32 %v5296_v24  ;;  %v4223_v32 = vpop.f32.mrf.mxu1 }
 0x400   : > { %v5620_v14 = vpop.eup %5619  ;;  %v4810_v28 = vsel %vm4807_vm10, %v4809_v17, %v4805_v0  ;;  %5623 = vrcp.f32 %v4417_v20  ;;  %v4836_v41 = vand.u32 2147483647, %v4417_v20  ;;  %v4838_v6 = vand.u32 2147483648, %v4417_v20 }
 0x401   : > { %v4927_v44 = vmul.f32 %v4810_v28, %v9684_v38  ;;  %v4813_v7 = vmul.f32 %v5620_v14, %v4416_v33  ;;  %v4255_v13 = vadd.f32 %v4217_v36, %v3310_v58  ;;  %vm4818_vm14 = vweird.f32 %v5620_v14 }
 0x402   : > { %vm4819_vm6 = vmor %vm4817_vm1, %vm4818_vm14  ;;  %vm4832_vm13 = vweird.f32 %v4417_v20  ;;  %v4839_v43 = vor.u32 1.1754944e-38, %v4838_v6  ;;  %vm4837_vm2 = vcmp.eq.f32.partialorder %v4836_v41, 8.507059e+37 }
 0x403   : > { %4959 = vst.msk [vmem:[%s9270_s11 + $0xc8] sm:$0xff] %vm306_vm0, %v4927_v44  ;;  %v4814_v21 = vsub.f32 1.0, %v4813_v7  ;;  %v9725_v51 = vadd.f32 %v9588_v26, %v4255_v13 }
 0x405   : > { %v5622_v46 = vpop.eup %5621  ;;  %v4815_v40 = vmul.f32 %v5620_v14, %v4814_v21  ;;  %v5297_v38 = vmul.f32 -1.442695, %v9725_v51 }
 0x406   : > { %v3275_v62 = vpop.f32.mrf.mxu3  ;;  %v5624_v12 = vpop.eup %5623  ;;  %v4418_v56 = vadd.f32 1.0, %v5622_v46 }
 0x407   : > { %v3311_v53 = vadd.f32 %v3275_v62, %v2426_v16  ;;  %v4816_v54 = vadd.f32 %v5620_v14, %v4815_v40  ;;  %v4828_v23 = vmul.f32 %v5624_v12, %v4417_v20  ;;  %vm4833_vm12 = vweird.f32 %v5624_v12 }
 0x408   : > { %5625 = vrcp.f32 %v4418_v56  ;;  %vm4834_vm15 = vmor %vm4832_vm13, %vm4833_vm12  ;;  %v4853_v49 = vand.u32 2147483648, %v4418_v56  ;;  %v4851_v22 = vand.u32 2147483647, %v4418_v56  ;;  %vm4847_vm5 = vweird.f32 %v4418_v56 }
 0x409   : > { %v4820_v59 = vsel %vm4819_vm6, %v5620_v14, %v4816_v54  ;;  %v4829_v42 = vsub.f32 1.0, %v4828_v23  ;;  %5627 = vpow2.f32 %v5297_v38  ;;  %v4256_v35 = vadd.f32 %v4220_v39, %v3311_v53 }
 0x40a   : > { %v4825_v45 = vsel %vm4822_vm3, %v4824_v19, %v4820_v59  ;;  %v4854_v24 = vor.u32 1.1754944e-38, %v4853_v49  ;;  %vm4852_vm9 = vcmp.eq.f32.partialorder %v4851_v22, 8.507059e+37 }
 0x40b   : > { %v4928_v47 = vmul.f32 %v4825_v45, %v9694_v10  ;;  %v4830_v11 = vmul.f32 %v5624_v12, %v4829_v42  ;;  %v9730_v5 = vadd.f32 %v9588_v26, %v4256_v35 }
 0x40d   : > { %4960 = vst.msk [vmem:[%s9270_s11 + $0xd0] sm:$0xff] %vm306_vm0, %v4928_v47  ;;  %v4831_v52 = vadd.f32 %v5624_v12, %v4830_v11  ;;  %v5298_v50 = vmul.f32 -1.442695, %v9730_v5 }
 0x40e   : > { %v3278_v55 = vpop.f32.mrf.mxu3  ;;  %v5626_v8 = vpop.eup %5625 }
 0x40f   : > { %v3312_v31 = vadd.f32 %v3278_v55, %v2429_v9  ;;  %v5628_v10 = vpop.eup %5627  ;;  %v4835_v18 = vsel %vm4834_vm15, %v5624_v12, %v4831_v52  ;;  %v4843_v15 = vmul.f32 %v5626_v8, %v4418_v56  ;;  %5629 = vpow2.f32 %v5298_v50 }
 0x410   : > { %v4840_v33 = vsel %vm4837_vm2, %v4839_v43, %v4835_v18  ;;  %v4419_v63 = vadd.f32 1.0, %v5628_v10  ;;  %vm4848_vm4 = vweird.f32 %v5626_v8 }
 0x411   : > { %v4257_v61 = vadd.f32 %v4223_v32, %v3312_v31  ;;  %v4929_v34 = vmul.f32 %v4840_v33, %v9702_v25  ;;  %v4844_v37 = vsub.f32 1.0, %v4843_v15  ;;  %vm4849_vm8 = vmor %vm4847_vm5, %vm4848_vm4 }
 0x412   : > { %5631 = vrcp.f32 %v4419_v63  ;;  %v4868_v0 = vand.u32 2147483648, %v4419_v63  ;;  %v4866_v44 = vand.u32 2147483647, %v4419_v63  ;;  %vm4862_vm7 = vweird.f32 %v4419_v63 }
 0x413   : > { %4961 = vst.msk [vmem:[%s9270_s11 + $0xd8] sm:$0xff] %vm306_vm0, %v4929_v34  ;;  %v4845_v36 = vmul.f32 %v5626_v8, %v4844_v37  ;;  %v9740_v48 = vadd.f32 %v9588_v26, %v4257_v61 }
 0x414   : > { %v4869_v60 = vor.u32 1.1754944e-38, %v4868_v0  ;;  %vm4867_vm14 = vcmp.eq.f32.partialorder %v4866_v44, 8.507059e+37 }
 0x415   : > { %v5630_v30 = vpop.eup %5629  ;;  %v4846_v3 = vadd.f32 %v5626_v8, %v4845_v36  ;;  %v5299_v29 = vmul.f32 -1.442695, %v9740_v48 }
 0x416   : > { %v4420_v25 = vadd.f32 1.0, %v5630_v30 }
 0x417   : > { %v4850_v4 = vsel %vm4849_vm8, %v5626_v8, %v4846_v3  ;;  %5633 = vpow2.f32 %v5299_v29 }
 0x418   : > { %v5632_v17 = vpop.eup %5631  ;;  %v4855_v20 = vsel %vm4852_vm9, %v4854_v24, %v4850_v4  ;;  %5635 = vrcp.f32 %v4420_v25  ;;  %v4883_v39 = vand.u32 2147483648, %v4420_v25  ;;  %v4881_v12 = vand.u32 2147483647, %v4420_v25 }
 0x419   : > { %v4930_v58 = vmul.f32 %v4855_v20, %v9715_v2  ;;  %v4858_v57 = vmul.f32 %v5632_v17, %v4419_v63  ;;  %vm4863_vm11 = vweird.f32 %v5632_v17  ;;  %vm4877_vm6 = vweird.f32 %v4420_v25 }
 0x41a   : > { %vm4864_vm10 = vmor %vm4862_vm7, %vm4863_vm11  ;;  %v4884_v53 = vor.u32 1.1754944e-38, %v4883_v39  ;;  %vm4882_vm12 = vcmp.eq.f32.partialorder %v4881_v12, 8.507059e+37 }
 0x41b   : > { %4962 = vst.msk [vmem:[%s9270_s11 + $0xe0] sm:$0xff] %vm306_vm0, %v4930_v58  ;;  %v4859_v26 = vsub.f32 1.0, %v4858_v57 }
 0x41d   : > { %v5634_v14 = vpop.eup %5633  ;;  %v4860_v28 = vmul.f32 %v5632_v17, %v4859_v26 }
 0x41e   : > { %v5636_v7 = vpop.eup %5635  ;;  %v4421_v13 = vadd.f32 1.0, %v5634_v14 }
 0x41f   : > { %v4861_v21 = vadd.f32 %v5632_v17, %v4860_v28  ;;  %v4873_v16 = vmul.f32 %v5636_v7, %v4420_v25  ;;  %vm4878_vm1 = vweird.f32 %v5636_v7 }
 0x420   : > { %5637 = vrcp.f32 %v4421_v13  ;;  %vm4879_vm3 = vmor %vm4877_vm6, %vm4878_vm1  ;;  %v4898_v59 = vand.u32 2147483648, %v4421_v13  ;;  %v4896_v35 = vand.u32 2147483647, %v4421_v13  ;;  %vm4892_vm15 = vweird.f32 %v4421_v13 }
 0x421   : > { %v4865_v27 = vsel %vm4864_vm10, %v5632_v17, %v4861_v21  ;;  %v4874_v2 = vsub.f32 1.0, %v4873_v16 }
 0x422   : > { %v4870_v46 = vsel %vm4867_vm14, %v4869_v60, %v4865_v27  ;;  %v4899_v41 = vor.u32 1.1754944e-38, %v4898_v59  ;;  %vm4897_vm4 = vcmp.eq.f32.partialorder %v4896_v35, 8.507059e+37 }
 0x423   : > { %v4931_v40 = vmul.f32 %v4870_v46, %v9725_v51  ;;  %v4875_v62 = vmul.f32 %v5636_v7, %v4874_v2 }
 0x425   : > { %4963 = vst.msk [vmem:[%s9270_s11 + $0xe8] sm:$0xff] %vm306_vm0, %v4931_v40  ;;  %v4876_v56 = vadd.f32 %v5636_v7, %v4875_v62 }
 0x426   : > { %v5638_v38 = vpop.eup %5637 }
 0x427   : > { %v4880_v54 = vsel %vm4879_vm3, %v5636_v7, %v4876_v56  ;;  %v4888_v23 = vmul.f32 %v5638_v38, %v4421_v13  ;;  %vm4893_vm13 = vweird.f32 %v5638_v38 }
 0x428   : > { %v4885_v19 = vsel %vm4882_vm12, %v4884_v53, %v4880_v54  ;;  %vm4894_vm2 = vmor %vm4892_vm15, %vm4893_vm13 }
 0x429   : > { %v4932_v1 = vmul.f32 %v4885_v19, %v9730_v5  ;;  %v4889_v51 = vsub.f32 1.0, %v4888_v23 }
 0x42b   : > { %4964 = vst.msk [vmem:[%s9270_s11 + $0xf0] sm:$0xff] %vm306_vm0, %v4932_v1  ;;  %v4890_v42 = vmul.f32 %v5638_v38, %v4889_v51 }
 0x42d   : > { %v4891_v45 = vadd.f32 %v5638_v38, %v4890_v42 }
 0x42f   : > { %v4895_v6 = vsel %vm4894_vm2, %v5638_v38, %v4891_v45 }
 0x430   : > { %v4900_v47 = vsel %vm4897_vm4, %v4899_v41, %v4895_v6 }
 0x431   : > { %v4933_v11 = vmul.f32 %v4900_v47, %v9740_v48 }
 0x433   : > { %4965 = vst.msk [vmem:[%s9270_s11 + $0xf8] sm:$0xff] %vm306_vm0, %v4933_v11 }
 0x434   : > { %5741 = shalt.err (!%p5738_p10)
}
 0x435   : > { %s5790_s28 = smov 128   ;;  %s5791_s11 = smov 8  }
 0x436   : > { %5325 = dma.vmem_to_hbm [thread:$0]  (%p5891_p3), %s4980_s10, 4096, %s4982_s22, %s4967_s24, %s5790_s28, %s5790_s28, %s5791_s11  }
 0x437 PF: > { %s4996_s29 = sand.u32 1, %s5772_s18   ;;  %p10293_p12 = scmp.ge.s32.totalorder %s5784_s21, 2 }
 0x438   : > { %s4997_s9 = scalar_lea.sflag [#allocation5], %s4996_s29 }
 0x439   : > { %p5336_p13 = pnand %p10293_p12, %p5857_p6 }
 0x43b   : > { %p5337_p0 = pneg %p5336_p13 }
 0x43d   : > { %5767 = dma.done.wait (%p5337_p0), %s4997_s9, 4096  }
 0x43e   : > { %5769 = vsyncadd (%p5337_p0), %s4997_s9, 4294963200  ;;  %p19_p5 = scmp.ge.s32.totalorder %s5875_s7, 4   ;;  %s10294_s18 = smov %s5776_s19 }
 0x43f   : > { %s10295_s19 = smov %s5780_s20  ;;  %s10296_s20 = smov %s5887_s12 }
 0x440   : > { %s10297_s21 = smov %s5875_s7  ;;  %21 = sbr.rel (!%p19_p5) target bundleno = 6 (0x6), region = 93 }
 0x445   :  { %5003 = vsyncpa [#allocation4], 1 }
 0x446   :  { %5005 = vsyncpa [#allocation4 + $0x1], 1 }
 0x447   :  { %5006 = vsyncpa [#allocation7], 1 }
 0x448   :  { %5007 = vsyncpa [#allocation5], 1 }
 0x449   :  { %5009 = vsyncpa [#allocation5 + $0x1], 1 }

</bundles_post_ra>
